<compile_context>
chip_gen: v7x
topology: tpu7x:2x2x1
jax: 0.10.0
libtpu: 0.0.40
codegen_flags: <defaults>
</compile_context>

<pallas_src>
import functools

import jax
import jax.numpy as jnp
from jax.experimental import pallas as pl
from jax.experimental.pallas import tpu as pltpu

_BN_EPS = 1e-5


# ----------------------------------------------------------------------------
# Pallas kernel
# ----------------------------------------------------------------------------
def _conv3x3_bn_relu_kernel(x_ref, w_ref, scale_ref, shift_ref, ml_ref, mr_ref,
                            o_ref, *, th, W):
    """One (batch, row-band, cout-tile) grid step.

    x_ref     : ((th+2)*W + 2, Cin) bf16 — H-padded, row-flattened band
    w_ref     : (9, Cin, tn)        bf16 — taps ordered t = dy*3 + dx
    scale_ref : (1, tn)             f32  — folded BN scale
    shift_ref : (1, tn)             f32  — folded BN shift (includes conv bias)
    ml_ref    : (th*W, 1)           f32  — mask zeroing w==0   rows (dx==0 tap)
    mr_ref    : (th*W, 1)           f32  — mask zeroing w==W-1 rows (dx==2 tap)
    o_ref     : (th*W, tn)          f32
    """
    thW = th * W
    acc = jnp.zeros(o_ref.shape, jnp.float32)
    for dy in range(3):
        for dx in range(3):
            t = dy * 3 + dx
            start = dy * W + dx
            lhs = x_ref[start:start + thW, :]                       # (thW, Cin)
            pp = jnp.dot(lhs, w_ref[t], preferred_element_type=jnp.float32)
            if dx == 0:
                pp = pp * ml_ref[...]
            elif dx == 2:
                pp = pp * mr_ref[...]
            acc = acc + pp
    y = acc * scale_ref[...] + shift_ref[...]
    o_ref[...] = jnp.maximum(y, 0.0)


# ----------------------------------------------------------------------------
# tiling / layout helpers
# ----------------------------------------------------------------------------
def _pick_row_tile(H, W):
    """Largest divisor of H keeping the matmul M-tile (th*W) around ~512 rows."""
    best = 1
    limit = max(512, W)
    for d in range(1, H + 1):
        if H % d == 0 and d * W <= limit:
            best = d
    return best


def _pick_cout_tile(Cout):
    if Cout > 256 and Cout % 256 == 0:
        return 256
    if Cout > 128 and Cout % 128 == 0:
        return 128
    return Cout


def _build_bands(x_nhwc, th):
    """(N,H,W,Cin) -> (N, B, (th+2)*W + 2, Cin): H-padded, row-flattened bands."""
    N, H, W, Cin = x_nhwc.shape
    B = H // th
    band_len = (th + 2) * W + 2
    xph = jnp.pad(x_nhwc, ((0, 0), (1, 1), (0, 0), (0, 0)))      # (N, H+2, W, Cin)
    xflat = xph.reshape(N, (H + 2) * W, Cin)
    xflat = jnp.pad(xflat, ((0, 0), (1, 1), (0, 0)))             # (N, (H+2)*W+2, Cin)
    bands = [xflat[:, b * th * W: b * th * W + band_len, :] for b in range(B)]
    return jnp.stack(bands, axis=1)                              # (N, B, band_len, Cin)


# ----------------------------------------------------------------------------
# single_conv forward (Conv3x3 s1 p1 + BN(inference) + ReLU), NCHW in/out
# ----------------------------------------------------------------------------
def single_conv_forward(params, x_nchw):
    x = jnp.transpose(x_nchw, (0, 2, 3, 1))                      # NHWC
    N, H, W, Cin = x.shape
    w_pt = params["weight"]                                      # (Cout, Cin, 3, 3)
    Cout = w_pt.shape[0]

    # fold conv bias + inference-mode BatchNorm into per-channel scale/shift
    scale = params["bn_gamma"] / jnp.sqrt(params["bn_var"] + _BN_EPS)
    shift = params["bn_beta"] + (params["bias"] - params["bn_mean"]) * scale

    th = _pick_row_tile(H, W)
    B = H // th
    tn = _pick_cout_tile(Cout)
    NT = Cout // tn
    assert H % th == 0 and Cout % tn == 0
    thW = th * W
    band_len = (th + 2) * W + 2

    # ---- layout prep (single cheap HBM copies; bf16 halves the DMA bytes) ----
    xb = _build_bands(x.astype(jnp.bfloat16), th)                # (N,B,band_len,Cin)
    w9 = jnp.transpose(w_pt, (2, 3, 1, 0)).reshape(9, Cin, Cout).astype(jnp.bfloat16)
    scale2 = scale.reshape(1, Cout).astype(jnp.float32)
    shift2 = shift.reshape(1, Cout).astype(jnp.float32)
    col = jnp.arange(thW, dtype=jnp.int32) % W
    mask_l = (col != 0).astype(jnp.float32).reshape(thW, 1)
    mask_r = (col != (W - 1)).astype(jnp.float32).reshape(thW, 1)

    # explicit VMEM budget with headroom (double-buffered inputs/output + acc)
    est = 2 * (band_len * Cin * 2 + 9 * Cin * tn * 2 + thW * tn * 4
               + 2 * thW * 4 + 4 * tn * 4) + thW * tn * 4
    vmem_limit = int(min(64 * 1024 * 1024, max(8 * 1024 * 1024, 4 * est)))

    out = pl.pallas_call(
        functools.partial(_conv3x3_bn_relu_kernel, th=th, W=W),
        out_shape=jax.ShapeDtypeStruct((N, B, thW, Cout), jnp.float32),
        grid=(N, B, NT),
        in_specs=[
            pl.BlockSpec((None, None, band_len, Cin), lambda n, b, j: (n, b, 0, 0)),
            pl.BlockSpec((9, Cin, tn), lambda n, b, j: (0, 0, j)),
            pl.BlockSpec((1, tn), lambda n, b, j: (0, j)),
            pl.BlockSpec((1, tn), lambda n, b, j: (0, j)),
            pl.BlockSpec((thW, 1), lambda n, b, j: (0, 0)),
            pl.BlockSpec((thW, 1), lambda n, b, j: (0, 0)),
        ],
        out_specs=pl.BlockSpec((None, None, thW, tn), lambda n, b, j: (n, b, 0, j)),
        compiler_params=pltpu.CompilerParams(
            dimension_semantics=("parallel", "parallel", "arbitrary"),
            vmem_limit_bytes=vmem_limit,
        ),
    )(xb, w9, scale2, shift2, mask_l, mask_r)

    y = out.reshape(N, H, W, Cout)
    return jnp.transpose(y, (0, 3, 1, 2))                        # NCHW


# ----------------------------------------------------------------------------
# deterministic parameter init (PyTorch-default BN stats, inference mode)
# ----------------------------------------------------------------------------
def init_single_conv(key, ch_in, ch_out):
    kw, kb = jax.random.split(key)
    fan_in = 9 * ch_in
    weight = jax.random.normal(kw, (ch_out, ch_in, 3, 3), jnp.float32) * (2.0 / fan_in) ** 0.5
    bias = jax.random.normal(kb, (ch_out,), jnp.float32) * 0.01
    return {
        "weight": weight,
        "bias": bias,
        "bn_gamma": jnp.ones((ch_out,), jnp.float32),
        "bn_beta": jnp.zeros((ch_out,), jnp.float32),
        "bn_mean": jnp.zeros((ch_out,), jnp.float32),
        "bn_var": jnp.ones((ch_out,), jnp.float32),
    }


# ----------------------------------------------------------------------------
# main
# ----------------------------------------------------------------------------
if __name__ == "__main__":
    key = jax.random.PRNGKey(0)
    k_in, k_par = jax.random.split(key)

    N, CH_IN, CH_OUT, HW = 2, 4, 16, 16
    x = jax.random.normal(k_in, (N, CH_IN, HW, HW), dtype=jnp.float32)
    params = init_single_conv(k_par, CH_IN, CH_OUT)

    fwd = jax.jit(single_conv_forward)
    out = jax.block_until_ready(fwd(params, x))

    assert out.shape == (N, CH_OUT, HW, HW), out.shape
    assert bool(jnp.all(jnp.isfinite(out)))

    # reference check: XLA conv on the same bf16-rounded inputs, f32 math
    xr = jnp.transpose(x, (0, 2, 3, 1)).astype(jnp.bfloat16).astype(jnp.float32)
    wr = jnp.transpose(params["weight"], (2, 3, 1, 0)).astype(jnp.bfloat16).astype(jnp.float32)
    scale = params["bn_gamma"] / jnp.sqrt(params["bn_var"] + _BN_EPS)
    shift = params["bn_beta"] + (params["bias"] - params["bn_mean"]) * scale
    conv = jax.lax.conv_general_dilated(
        xr, wr, window_strides=(1, 1), padding=((1, 1), (1, 1)),
        dimension_numbers=("NHWC", "HWIO", "NHWC"),
        precision=jax.lax.Precision.HIGHEST)
    ref = jnp.maximum(conv * scale.reshape(1, 1, 1, -1) + shift.reshape(1, 1, 1, -1), 0.0)
    ref = jnp.transpose(ref, (0, 3, 1, 2))
    err = float(jnp.max(jnp.abs(out - ref)))
    assert err < 1e-2, f"max abs err {err}"

    print("KERNEL_OK")
</pallas_src>

<mosaic_0001>
module attributes {stable_mosaic.version = 11 : i64} {
  func.func @_conv3x3_bn_relu_kernel(%arg0: i32, %arg1: i32, %arg2: i32, %arg3: memref<1x1x290x4xbf16, #tpu.memory_space<vmem>>, %arg4: memref<9x4x16xbf16, #tpu.memory_space<vmem>>, %arg5: memref<1x16xf32, #tpu.memory_space<vmem>>, %arg6: memref<1x16xf32, #tpu.memory_space<vmem>>, %arg7: memref<256x1xf32, #tpu.memory_space<vmem>>, %arg8: memref<256x1xf32, #tpu.memory_space<vmem>>, %arg9: memref<1x1x256x16xf32, #tpu.memory_space<vmem>>) attributes {dimension_semantics = [#tpu.dimension_semantics<parallel>, #tpu.dimension_semantics<parallel>, #tpu.dimension_semantics<arbitrary>], iteration_bounds = array<i64: 2, 1, 1>, scalar_prefetch = 0 : i64, scratch_operands = 0 : i64, tpu.core_type = #tpu.core_type<tc>, window_params = [{transform_indices = @transform_0, window_bounds = array<i64: 1, 1, 290, 4>}, {transform_indices = @transform_1, window_bounds = array<i64: 9, 4, 16>}, {transform_indices = @transform_2, window_bounds = array<i64: 1, 16>}, {transform_indices = @transform_3, window_bounds = array<i64: 1, 16>}, {pipeline_mode = #tpu.pipeline_mode<synchronous>, transform_indices = @transform_4, window_bounds = array<i64: 256, 1>}, {pipeline_mode = #tpu.pipeline_mode<synchronous>, transform_indices = @transform_5, window_bounds = array<i64: 256, 1>}, {transform_indices = @transform_6, window_bounds = array<i64: 1, 1, 256, 16>}]} {
    %cst = arith.constant 0.000000e+00 : f32
    %0 = vector.broadcast %cst : f32 to vector<256x16xf32>
    %c0 = arith.constant 0 : index
    %c0_0 = arith.constant 0 : index
    %c0_1 = arith.constant 0 : index
    %c0_2 = arith.constant 0 : index
    %1 = vector.load %arg3[%c0, %c0_0, %c0_1, %c0_2] : memref<1x1x290x4xbf16, #tpu.memory_space<vmem>>, vector<1x1x256x4xbf16>
    %2 = vector.shape_cast %1 : vector<1x1x256x4xbf16> to vector<256x4xbf16>
    %c0_3 = arith.constant 0 : index
    %c0_4 = arith.constant 0 : index
    %c0_5 = arith.constant 0 : index
    %3 = vector.load %arg4[%c0_3, %c0_4, %c0_5] : memref<9x4x16xbf16, #tpu.memory_space<vmem>>, vector<1x4x16xbf16>
    %4 = vector.shape_cast %3 : vector<1x4x16xbf16> to vector<4x16xbf16>
    %cst_6 = arith.constant dense<0.000000e+00> : vector<256x16xf32>
    %5 = tpu.matmul %2, %4, %cst_6 {dimension_numbers = #tpu.dot_dimension_numbers<[1], [0], [0], [1], [0, 0, 1, 1], [], []>} : vector<256x4xbf16>, vector<4x16xbf16>, vector<256x16xf32> -> vector<256x16xf32>
    %c0_7 = arith.constant 0 : index
    %c0_8 = arith.constant 0 : index
    %6 = vector.load %arg7[%c0_7, %c0_8] : memref<256x1xf32, #tpu.memory_space<vmem>>, vector<256x1xf32>
    %7 = vector.broadcast %6 : vector<256x1xf32> to vector<256x16xf32>
    %8 = arith.mulf %5, %7 : vector<256x16xf32>
    %9 = arith.addf %0, %8 : vector<256x16xf32>
    %c0_9 = arith.constant 0 : index
    %c0_10 = arith.constant 0 : index
    %c1 = arith.constant 1 : index
    %c0_11 = arith.constant 0 : index
    %10 = vector.load %arg3[%c0_9, %c0_10, %c1, %c0_11] : memref<1x1x290x4xbf16, #tpu.memory_space<vmem>>, vector<1x1x256x4xbf16>
    %11 = vector.shape_cast %10 : vector<1x1x256x4xbf16> to vector<256x4xbf16>
    %c1_12 = arith.constant 1 : index
    %c0_13 = arith.constant 0 : index
    %c0_14 = arith.constant 0 : index
    %12 = vector.load %arg4[%c1_12, %c0_13, %c0_14] : memref<9x4x16xbf16, #tpu.memory_space<vmem>>, vector<1x4x16xbf16>
    %13 = vector.shape_cast %12 : vector<1x4x16xbf16> to vector<4x16xbf16>
    %cst_15 = arith.constant dense<0.000000e+00> : vector<256x16xf32>
    %14 = tpu.matmul %11, %13, %cst_15 {dimension_numbers = #tpu.dot_dimension_numbers<[1], [0], [0], [1], [0, 0, 1, 1], [], []>} : vector<256x4xbf16>, vector<4x16xbf16>, vector<256x16xf32> -> vector<256x16xf32>
    %15 = arith.addf %9, %14 : vector<256x16xf32>
    %c0_16 = arith.constant 0 : index
    %c0_17 = arith.constant 0 : index
    %c2 = arith.constant 2 : index
    %c0_18 = arith.constant 0 : index
    %16 = vector.load %arg3[%c0_16, %c0_17, %c2, %c0_18] : memref<1x1x290x4xbf16, #tpu.memory_space<vmem>>, vector<1x1x256x4xbf16>
    %17 = vector.shape_cast %16 : vector<1x1x256x4xbf16> to vector<256x4xbf16>
    %c2_19 = arith.constant 2 : index
    %c0_20 = arith.constant 0 : index
    %c0_21 = arith.constant 0 : index
    %18 = vector.load %arg4[%c2_19, %c0_20, %c0_21] : memref<9x4x16xbf16, #tpu.memory_space<vmem>>, vector<1x4x16xbf16>
    %19 = vector.shape_cast %18 : vector<1x4x16xbf16> to vector<4x16xbf16>
    %cst_22 = arith.constant dense<0.000000e+00> : vector<256x16xf32>
    %20 = tpu.matmul %17, %19, %cst_22 {dimension_numbers = #tpu.dot_dimension_numbers<[1], [0], [0], [1], [0, 0, 1, 1], [], []>} : vector<256x4xbf16>, vector<4x16xbf16>, vector<256x16xf32> -> vector<256x16xf32>
    %c0_23 = arith.constant 0 : index
    %c0_24 = arith.constant 0 : index
    %21 = vector.load %arg8[%c0_23, %c0_24] : memref<256x1xf32, #tpu.memory_space<vmem>>, vector<256x1xf32>
    %22 = vector.broadcast %21 : vector<256x1xf32> to vector<256x16xf32>
    %23 = arith.mulf %20, %22 : vector<256x16xf32>
    %24 = arith.addf %15, %23 : vector<256x16xf32>
    %c0_25 = arith.constant 0 : index
    %c0_26 = arith.constant 0 : index
    %c16 = arith.constant 16 : index
    %c0_27 = arith.constant 0 : index
    %25 = vector.load %arg3[%c0_25, %c0_26, %c16, %c0_27] : memref<1x1x290x4xbf16, #tpu.memory_space<vmem>>, vector<1x1x256x4xbf16>
    %26 = vector.shape_cast %25 : vector<1x1x256x4xbf16> to vector<256x4xbf16>
    %c3 = arith.constant 3 : index
    %c0_28 = arith.constant 0 : index
    %c0_29 = arith.constant 0 : index
    %27 = vector.load %arg4[%c3, %c0_28, %c0_29] : memref<9x4x16xbf16, #tpu.memory_space<vmem>>, vector<1x4x16xbf16>
    %28 = vector.shape_cast %27 : vector<1x4x16xbf16> to vector<4x16xbf16>
    %cst_30 = arith.constant dense<0.000000e+00> : vector<256x16xf32>
    %29 = tpu.matmul %26, %28, %cst_30 {dimension_numbers = #tpu.dot_dimension_numbers<[1], [0], [0], [1], [0, 0, 1, 1], [], []>} : vector<256x4xbf16>, vector<4x16xbf16>, vector<256x16xf32> -> vector<256x16xf32>
    %c0_31 = arith.constant 0 : index
    %c0_32 = arith.constant 0 : index
    %30 = vector.load %arg7[%c0_31, %c0_32] : memref<256x1xf32, #tpu.memory_space<vmem>>, vector<256x1xf32>
    %31 = vector.broadcast %30 : vector<256x1xf32> to vector<256x16xf32>
    %32 = arith.mulf %29, %31 : vector<256x16xf32>
    %33 = arith.addf %24, %32 : vector<256x16xf32>
    %c0_33 = arith.constant 0 : index
    %c0_34 = arith.constant 0 : index
    %c17 = arith.constant 17 : index
    %c0_35 = arith.constant 0 : index
    %34 = vector.load %arg3[%c0_33, %c0_34, %c17, %c0_35] : memref<1x1x290x4xbf16, #tpu.memory_space<vmem>>, vector<1x1x256x4xbf16>
    %35 = vector.shape_cast %34 : vector<1x1x256x4xbf16> to vector<256x4xbf16>
    %c4 = arith.constant 4 : index
    %c0_36 = arith.constant 0 : index
    %c0_37 = arith.constant 0 : index
    %36 = vector.load %arg4[%c4, %c0_36, %c0_37] : memref<9x4x16xbf16, #tpu.memory_space<vmem>>, vector<1x4x16xbf16>
    %37 = vector.shape_cast %36 : vector<1x4x16xbf16> to vector<4x16xbf16>
    %cst_38 = arith.constant dense<0.000000e+00> : vector<256x16xf32>
    %38 = tpu.matmul %35, %37, %cst_38 {dimension_numbers = #tpu.dot_dimension_numbers<[1], [0], [0], [1], [0, 0, 1, 1], [], []>} : vector<256x4xbf16>, vector<4x16xbf16>, vector<256x16xf32> -> vector<256x16xf32>
    %39 = arith.addf %33, %38 : vector<256x16xf32>
    %c0_39 = arith.constant 0 : index
    %c0_40 = arith.constant 0 : index
    %c18 = arith.constant 18 : index
    %c0_41 = arith.constant 0 : index
    %40 = vector.load %arg3[%c0_39, %c0_40, %c18, %c0_41] : memref<1x1x290x4xbf16, #tpu.memory_space<vmem>>, vector<1x1x256x4xbf16>
    %41 = vector.shape_cast %40 : vector<1x1x256x4xbf16> to vector<256x4xbf16>
    %c5 = arith.constant 5 : index
    %c0_42 = arith.constant 0 : index
    %c0_43 = arith.constant 0 : index
    %42 = vector.load %arg4[%c5, %c0_42, %c0_43] : memref<9x4x16xbf16, #tpu.memory_space<vmem>>, vector<1x4x16xbf16>
    %43 = vector.shape_cast %42 : vector<1x4x16xbf16> to vector<4x16xbf16>
    %cst_44 = arith.constant dense<0.000000e+00> : vector<256x16xf32>
    %44 = tpu.matmul %41, %43, %cst_44 {dimension_numbers = #tpu.dot_dimension_numbers<[1], [0], [0], [1], [0, 0, 1, 1], [], []>} : vector<256x4xbf16>, vector<4x16xbf16>, vector<256x16xf32> -> vector<256x16xf32>
    %c0_45 = arith.constant 0 : index
    %c0_46 = arith.constant 0 : index
    %45 = vector.load %arg8[%c0_45, %c0_46] : memref<256x1xf32, #tpu.memory_space<vmem>>, vector<256x1xf32>
    %46 = vector.broadcast %45 : vector<256x1xf32> to vector<256x16xf32>
    %47 = arith.mulf %44, %46 : vector<256x16xf32>
    %48 = arith.addf %39, %47 : vector<256x16xf32>
    %c0_47 = arith.constant 0 : index
    %c0_48 = arith.constant 0 : index
    %c32 = arith.constant 32 : index
    %c0_49 = arith.constant 0 : index
    %49 = vector.load %arg3[%c0_47, %c0_48, %c32, %c0_49] : memref<1x1x290x4xbf16, #tpu.memory_space<vmem>>, vector<1x1x256x4xbf16>
    %50 = vector.shape_cast %49 : vector<1x1x256x4xbf16> to vector<256x4xbf16>
    %c6 = arith.constant 6 : index
    %c0_50 = arith.constant 0 : index
    %c0_51 = arith.constant 0 : index
    %51 = vector.load %arg4[%c6, %c0_50, %c0_51] : memref<9x4x16xbf16, #tpu.memory_space<vmem>>, vector<1x4x16xbf16>
    %52 = vector.shape_cast %51 : vector<1x4x16xbf16> to vector<4x16xbf16>
    %cst_52 = arith.constant dense<0.000000e+00> : vector<256x16xf32>
    %53 = tpu.matmul %50, %52, %cst_52 {dimension_numbers = #tpu.dot_dimension_numbers<[1], [0], [0], [1], [0, 0, 1, 1], [], []>} : vector<256x4xbf16>, vector<4x16xbf16>, vector<256x16xf32> -> vector<256x16xf32>
    %c0_53 = arith.constant 0 : index
    %c0_54 = arith.constant 0 : index
    %54 = vector.load %arg7[%c0_53, %c0_54] : memref<256x1xf32, #tpu.memory_space<vmem>>, vector<256x1xf32>
    %55 = vector.broadcast %54 : vector<256x1xf32> to vector<256x16xf32>
    %56 = arith.mulf %53, %55 : vector<256x16xf32>
    %57 = arith.addf %48, %56 : vector<256x16xf32>
    %c0_55 = arith.constant 0 : index
    %c0_56 = arith.constant 0 : index
    %c33 = arith.constant 33 : index
    %c0_57 = arith.constant 0 : index
    %58 = vector.load %arg3[%c0_55, %c0_56, %c33, %c0_57] : memref<1x1x290x4xbf16, #tpu.memory_space<vmem>>, vector<1x1x256x4xbf16>
    %59 = vector.shape_cast %58 : vector<1x1x256x4xbf16> to vector<256x4xbf16>
    %c7 = arith.constant 7 : index
    %c0_58 = arith.constant 0 : index
    %c0_59 = arith.constant 0 : index
    %60 = vector.load %arg4[%c7, %c0_58, %c0_59] : memref<9x4x16xbf16, #tpu.memory_space<vmem>>, vector<1x4x16xbf16>
    %61 = vector.shape_cast %60 : vector<1x4x16xbf16> to vector<4x16xbf16>
    %cst_60 = arith.constant dense<0.000000e+00> : vector<256x16xf32>
    %62 = tpu.matmul %59, %61, %cst_60 {dimension_numbers = #tpu.dot_dimension_numbers<[1], [0], [0], [1], [0, 0, 1, 1], [], []>} : vector<256x4xbf16>, vector<4x16xbf16>, vector<256x16xf32> -> vector<256x16xf32>
    %63 = arith.addf %57, %62 : vector<256x16xf32>
    %c0_61 = arith.constant 0 : index
    %c0_62 = arith.constant 0 : index
    %c34 = arith.constant 34 : index
    %c0_63 = arith.constant 0 : index
    %64 = vector.load %arg3[%c0_61, %c0_62, %c34, %c0_63] : memref<1x1x290x4xbf16, #tpu.memory_space<vmem>>, vector<1x1x256x4xbf16>
    %65 = vector.shape_cast %64 : vector<1x1x256x4xbf16> to vector<256x4xbf16>
    %c8 = arith.constant 8 : index
    %c0_64 = arith.constant 0 : index
    %c0_65 = arith.constant 0 : index
    %66 = vector.load %arg4[%c8, %c0_64, %c0_65] : memref<9x4x16xbf16, #tpu.memory_space<vmem>>, vector<1x4x16xbf16>
    %67 = vector.shape_cast %66 : vector<1x4x16xbf16> to vector<4x16xbf16>
    %cst_66 = arith.constant dense<0.000000e+00> : vector<256x16xf32>
    %68 = tpu.matmul %65, %67, %cst_66 {dimension_numbers = #tpu.dot_dimension_numbers<[1], [0], [0], [1], [0, 0, 1, 1], [], []>} : vector<256x4xbf16>, vector<4x16xbf16>, vector<256x16xf32> -> vector<256x16xf32>
    %c0_67 = arith.constant 0 : index
    %c0_68 = arith.constant 0 : index
    %69 = vector.load %arg8[%c0_67, %c0_68] : memref<256x1xf32, #tpu.memory_space<vmem>>, vector<256x1xf32>
    %70 = vector.broadcast %69 : vector<256x1xf32> to vector<256x16xf32>
    %71 = arith.mulf %68, %70 : vector<256x16xf32>
    %72 = arith.addf %63, %71 : vector<256x16xf32>
    %c0_69 = arith.constant 0 : index
    %c0_70 = arith.constant 0 : index
    %73 = vector.load %arg5[%c0_69, %c0_70] : memref<1x16xf32, #tpu.memory_space<vmem>>, vector<1x16xf32>
    %74 = vector.broadcast %73 : vector<1x16xf32> to vector<256x16xf32>
    %75 = arith.mulf %72, %74 : vector<256x16xf32>
    %c0_71 = arith.constant 0 : index
    %c0_72 = arith.constant 0 : index
    %76 = vector.load %arg6[%c0_71, %c0_72] : memref<1x16xf32, #tpu.memory_space<vmem>>, vector<1x16xf32>
    %77 = vector.broadcast %76 : vector<1x16xf32> to vector<256x16xf32>
    %78 = arith.addf %75, %77 : vector<256x16xf32>
    %cst_73 = arith.constant 0.000000e+00 : f32
    %79 = vector.broadcast %cst_73 : f32 to vector<256x16xf32>
    %80 = arith.maximumf %78, %79 : vector<256x16xf32>
    %c0_74 = arith.constant 0 : index
    %c0_75 = arith.constant 0 : index
    %c0_76 = arith.constant 0 : index
    %c0_77 = arith.constant 0 : index
    %81 = vector.load %arg9[%c0_74, %c0_75, %c0_76, %c0_77] : memref<1x1x256x16xf32, #tpu.memory_space<vmem>>, vector<1x1x256x16xf32>
    %82 = vector.shape_cast %81 : vector<1x1x256x16xf32> to vector<256x16xf32>
    %83 = vector.shape_cast %80 : vector<256x16xf32> to vector<1x1x256x16xf32>
    tpu.vector_store %arg9[%c0_74, %c0_75, %c0_76, %c0_77], %83 {strides = array<i32>} : memref<1x1x256x16xf32, #tpu.memory_space<vmem>>, vector<1x1x256x16xf32>,
    return
  }
  func.func @transform_0(%arg0: i32, %arg1: i32, %arg2: i32) -> (i32, i32, i32, i32) {
    %c0_i32 = arith.constant 0 : i32
    %c0_i32_0 = arith.constant 0 : i32
    %c0_i32_1 = arith.constant 0 : i32
    return %arg0, %arg1, %c0_i32, %c0_i32_0 : i32, i32, i32, i32
  }
  func.func @transform_1(%arg0: i32, %arg1: i32, %arg2: i32) -> (i32, i32, i32) {
    %c0_i32 = arith.constant 0 : i32
    %c0_i32_0 = arith.constant 0 : i32
    %c0_i32_1 = arith.constant 0 : i32
    return %c0_i32, %c0_i32_0, %arg2 : i32, i32, i32
  }
  func.func @transform_2(%arg0: i32, %arg1: i32, %arg2: i32) -> (i32, i32) {
    %c0_i32 = arith.constant 0 : i32
    %c0_i32_0 = arith.constant 0 : i32
    return %c0_i32, %arg2 : i32, i32
  }
  func.func @transform_3(%arg0: i32, %arg1: i32, %arg2: i32) -> (i32, i32) {
    %c0_i32 = arith.constant 0 : i32
    %c0_i32_0 = arith.constant 0 : i32
    return %c0_i32, %arg2 : i32, i32
  }
  func.func @transform_4(%arg0: i32, %arg1: i32, %arg2: i32) -> (i32, i32) {
    %c0_i32 = arith.constant 0 : i32
    %c0_i32_0 = arith.constant 0 : i32
    %c0_i32_1 = arith.constant 0 : i32
    return %c0_i32, %c0_i32_0 : i32, i32
  }
  func.func @transform_5(%arg0: i32, %arg1: i32, %arg2: i32) -> (i32, i32) {
    %c0_i32 = arith.constant 0 : i32
    %c0_i32_0 = arith.constant 0 : i32
    %c0_i32_1 = arith.constant 0 : i32
    return %c0_i32, %c0_i32_0 : i32, i32
  }
  func.func @transform_6(%arg0: i32, %arg1: i32, %arg2: i32) -> (i32, i32, i32, i32) {
    %c0_i32 = arith.constant 0 : i32
    %c0_i32_0 = arith.constant 0 : i32
    return %arg0, %arg1, %c0_i32, %arg2 : i32, i32, i32, i32
  }
}

</mosaic_0001>

<bundles_post_ra>
// kernel: single_conv_forward.1
= control target key start
LH: loop header
LB: loop body
LE: loop exit
PB: predicated region body
PF: predicated region fallthrough
CT: control target
= control target key end

     0   :  { %s5776_s21 = smov 0   ;;  %s5778_s22 = smov 0   ;;  %s7521_s0 = inlined_call_operand.vmem [shape: bf16[2,1,290,4], index: 0, kind: input, shape index: {}]   ;;  %s7522_s1 = inlined_call_operand.vmem [shape: bf16[9,4,16], index: 1, kind: input, shape index: {}]   ;;  %s7523_s2 = inlined_call_operand.vmem [shape: f32[1,16], index: 2, kind: input, shape index: {}]   ;;  %s7524_s3 = inlined_call_operand.vmem [shape: f32[1,16], index: 3, kind: input, shape index: {}]   ;;  %s7525_s4 = inlined_call_operand.vmem [shape: f32[256,1], index: 4, kind: input, shape index: {}]   ;;  %s7526_s5 = inlined_call_operand.vmem [shape: f32[256,1], index: 5, kind: input, shape index: {}]   ;;  %s7527_s6 = inlined_call_operand.vmem [shape: f32[2,1,256,16], index: 6, kind: output, shape index: {}]  }
   0x1   :  { %s5780_s23 = smov 0  }
   0x2 LB: > { %s35_s24 = sadd.s32 1, %s5734_s22  ;;  %p4628_p0 = scmp.ge.s32.totalorder %s5738_s23, 1  ;;  %s5738_s23 = sphi %s5780_s23, %s16_s23   ;;  %s5734_s22 = sphi %s5778_s22, %s7840_s22   ;;  %s5730_s21 = sphi %s5776_s21, %s7839_s21  }
   0x3   : > { %p37_p1 = scmp.ge.s32.totalorder %s35_s24, 2  ;;  %p266_p2 = scmp.lt.s32.totalorder %s5738_s23, 3 }
   0x5   : > { %s7842_s24 = smov (%p37_p1, %s35_s24), 0  ;;  %p267_p3 = pnand %p4628_p0, %p266_p2 }
   0x7   : > { %270 = sbr.rel (%p267_p3) target bundleno = 530 (0x212), region = 44 }
   0xe   : > { %v381_v0 = vld [vmem:[%s7522_s1] sm:$0x3]  ;;  %vm511_vm0 = vcmask 1041408   ;;  %p317_p4 = scmp.lt.s32.totalorder %s5730_s21, 1  ;;  %v4664_v2 = vld [vmem:[%s7522_s1 + $0x2] sm:$0x3] }
   0xf   : > { %5576 = vmatprep.subr.msk.bf16.mxu0 %vm511_vm0, %v381_v0  ;;  %5577 = vmatprep.subr.msk.bf16.mxu1 %vm511_vm0, %v381_v0  ;;  %v513_v1 = vsel %vm511_vm0, %v381_v0, 0  ;;  %v4698_v3 = vld [vmem:[%s7522_s1 + $0x4] sm:$0x3]  ;;  %v678_v5 = vld [vmem:[%s7525_s4 + $0x10] sm:$0xff]  ;;  %v5740_v6 = vmov 0   ;;  %vm462_vm1 = vcmask 31744  }
  0x10   : > { %5045 = vmatpush3.bf16.msra.mxu0 %v513_v1  ;;  %5351 = vmatpush3.bf16.msra.mxu1 %v513_v1  ;;  %s7844_s21 = smov (!%p317_p4, %s5730_s21), 1  ;;  %v676_v4 = vld [vmem:[%s7525_s4] sm:$0xff]  ;;  %v677_v7 = vld [vmem:[%s7525_s4 + $0x8] sm:$0xff]  ;;  %v679_v8 = vld [vmem:[%s7525_s4 + $0x18] sm:$0xff]  ;;  %v1516_v12 = vsel %vm511_vm0, %v4698_v3, 0  ;;  %v1232_v15 = vsel %vm511_vm0, %v4664_v2, 0 }
  0x11   : > { %5578 = vmatprep.subr.msk.bf16.mxu1 %vm511_vm0, %v4664_v2  ;;  %5579 = vmatprep.subr.msk.bf16.mxu0 %vm511_vm0, %v4698_v3  ;;  %s5586_s11 = smul.u32 148, %s7844_s21  ;;  %v5836_v13 = vld [vmem:[%s7522_s1 + $0x6] sm:$0x3]  ;;  %v5844_v16 = vld [vmem:[%s7522_s1 + $0xa] sm:$0x3]  ;;  %v682_v22 = vld [vmem:[%s7525_s4 + $0x30] sm:$0xff] }
  0x12   : > { %5612 = vset.pattern.permute.xlu0 %v5740_v6  ;;  %5613 = vset.pattern.permute.xlu1 %v5740_v6  ;;  %v680_v17 = vld [vmem:[%s7525_s4 + $0x20] sm:$0xff]  ;;  %v681_v20 = vld [vmem:[%s7525_s4 + $0x28] sm:$0xff]  ;;  %v683_v26 = vld [vmem:[%s7525_s4 + $0x38] sm:$0xff]  ;;  %vm1433_vm2 = vcmask 1046528   ;;  %vm1050_vm3 = vsmask.f32 7424 }
  0x13   : > { %710 = vperm.xlu0 %5612, %v676_v4   ;;  %720 = vperm.xlu1 %5613, %v678_v5   ;;  %s5820_s14 = scalar_lea.vmem %s7521_s0, %s5586_s11  ;;  %v684_v27 = vld [vmem:[%s7525_s4 + $0x40] sm:$0xff]  ;;  %v685_v28 = vld [vmem:[%s7525_s4 + $0x48] sm:$0xff]  ;;  %v686_v32 = vld [vmem:[%s7525_s4 + $0x50] sm:$0xff]  ;;  %s4890_s25 = sshll.u32 %s7844_s21, 8  ;;  %vm4443_vm4 = vcmask 130048  }
  0x14   : > { %v5614_v9 = vld [vmem:[%s5820_s14] sm:$0xff]   ;;  %v5616_v11 = vld [vmem:[%s5820_s14 + $0x8] sm:$0xff]   ;;  %v5618_v18 = vld [vmem:[%s5820_s14 + $0x10] sm:$0xff]   ;;  %s7330_s28 = scalar_lea.vmem %s7527_s6, %s4890_s25 }
  0x15   : > { %v5615_v10 = vld [vmem:[%s5820_s14 + $0x40] sm:$0xff]   ;;  %5046 = vmatprep.mubr.msk.bf16.mxu0 %vm462_vm1, %v5614_v9  ;;  %v5617_v14 = vld [vmem:[%s5820_s14 + $0x48] sm:$0xff]   ;;  %v5619_v19 = vld [vmem:[%s5820_s14 + $0x50] sm:$0xff]  }
  0x16   : > { %5062 = vmatprep.mubr.msk.bf16.mxu1 %vm462_vm1, %v5615_v10  ;;  %5047 = vmatmul.mubr.msk.bf16.vlgmr.msra.gmra.mrb[0].mxu0 %vm462_vm1, %v5616_v11  ;;  %v5620_v21 = vld [vmem:[%s5820_s14 + $0x18] sm:$0xff]   ;;  %v5622_v24 = vld [vmem:[%s5820_s14 + $0x20] sm:$0xff]   ;;  %v5624_v29 = vld [vmem:[%s5820_s14 + $0x28] sm:$0xff]   ;;  %v2098_v10 = vsel %vm511_vm0, %v5836_v13, 0 }
  0x17   : > { %715 = vperm.xlu0 %5612, %v677_v7   ;;  %725 = vperm.xlu1 %5613, %v679_v8   ;;  %v5621_v23 = vld [vmem:[%s5820_s14 + $0x58] sm:$0xff]   ;;  %v5623_v25 = vld [vmem:[%s5820_s14 + $0x60] sm:$0xff]   ;;  %v5625_v30 = vld [vmem:[%s5820_s14 + $0x68] sm:$0xff]   ;;  %v2907_v8 = vsel %vm511_vm0, %v5844_v16, 0 }
  0x18   : > { %5063 = vmatmul.mubr.msk.bf16.vlgmr.msra.gmra.mrb[0].mxu1 %vm462_vm1, %v5617_v14  ;;  %5113 = vmatpush3.bf16.msra.mxu0 %v1516_v12  ;;  %v5626_v31 = vld [vmem:[%s5820_s14 + $0x30] sm:$0xff]   ;;  %v932_v33 = vld [vmem:[%s5820_s14] sm:$0xf]  ;;  %v933_v34 = vld [vmem:[%s5820_s14 + $0x4] sm:$0xf] }
  0x19   : > { %5079 = vmatpush3.bf16.msra.mxu1 %v1232_v15  ;;  %5050 = vmatprep.mubr.msk.bf16.mxu0 %vm462_vm1, %v5618_v18  ;;  %v4665_v35 = vcombine.low %v932_v33, %v933_v34  ;;  %v5631_v36 = vld [vmem:[%s5820_s14 + $0x8] sm:$0xff]   ;;  %v1427_v37 = vld [vmem:[%s5820_s14] sm:$0xe]  ;;  %v5627_v38 = vld [vmem:[%s5820_s14 + $0x70] sm:$0xff]  }
  0x1a   : > { %5066 = vmatprep.mubr.msk.bf16.mxu1 %vm462_vm1, %v5619_v19  ;;  %5580 = vmatprep.subr.msk.bf16.mxu1 %vm511_vm0, %v5836_v13  ;;  %v4699_v39 = vcombine.low %v1427_v37, %v933_v34  ;;  %v1059_v42 = vshll.u32 %v5631_v36, 16  ;;  %v5633_v44 = vld [vmem:[%s5820_s14 + $0x10] sm:$0xff]   ;;  %v1435_v46 = vrot.slane %v5631_v36, 1  ;;  %v5634_v49 = vld [vmem:[%s5820_s14 + $0x18] sm:$0xff]   ;;  %v1063_v53 = vshrl.u32 %v5631_v36, 16  ;;  %v5635_v60 = vld [vmem:[%s5820_s14 + $0x20] sm:$0xff]  }
  0x1b   : > { %5582 = vmatprep.subr.msk.bf16.mxu0 %vm511_vm0, %v5844_v16  ;;  %730 = vperm.xlu0 %5612, %v680_v17   ;;  %v1052_v40 = vshrl.u32 %v4665_v35, 16  ;;  %v1054_v41 = vshll.u32 %v4665_v35, 16  ;;  %v5628_v50 = vld [vmem:[%s5820_s14 + $0x38] sm:$0xff]   ;;  %v1067_v52 = vshll.u32 %v5633_v44, 16  ;;  %v1071_v56 = vshrl.u32 %v5633_v44, 16  ;;  %v5912_v1 = vld [vmem:[%s5820_s14 + $0x28] sm:$0xff]  }
  0x1c   : > { %735 = vperm.xlu1 %5613, %v681_v20   ;;  %v1434_v45 = vrot.slane %v4699_v39, 1  ;;  %v1061_v48 = vrot.slane %v1059_v42, 1  ;;  %v5629_v51 = vld [vmem:[%s5820_s14 + $0x78] sm:$0xff]   ;;  %v1075_v57 = vshll.u32 %v5634_v49, 16  ;;  %v1437_v58 = vrot.slane %v5633_v44, 1  ;;  %v688_v3 = vld [vmem:[%s7525_s4 + $0x60] sm:$0xff] }
  0x1d   : > { %v1056_v43 = vrot.slane %v1054_v41, 1  ;;  %v1069_v59 = vrot.slane %v1067_v52, 1  ;;  %v687_v62 = vld [vmem:[%s7525_s4 + $0x58] sm:$0xff]  ;;  %v1439_v2 = vrot.slane %v5634_v49, 1  ;;  %v1083_v5 = vshll.u32 %v5635_v60, 16  ;;  %v689_v6 = vld [vmem:[%s7525_s4 + $0x68] sm:$0xff] }
  0x1e   : > { %5051 = vmatmul.mubr.msk.bf16.gmra.mrb[4].mxu0 %vm462_vm1, %v5620_v21  ;;  %v1436_v54 = vsel %vm1433_vm2, %v1434_v45, %v1435_v46  ;;  %v1065_v61 = vor.u32 %v1063_v53, %v1061_v48  ;;  %v1077_v0 = vrot.slane %v1075_v57, 1  ;;  %v1438_v4 = vsel %vm1433_vm2, %v1435_v46, %v1437_v58  ;;  %v690_v17 = vld [vmem:[%s7525_s4 + $0x70] sm:$0xff]  ;;  %v691_v19 = vld [vmem:[%s7525_s4 + $0x78] sm:$0xff]  ;;  %v5963_v36 = vld [vmem:[%s7522_s1 + $0x8] sm:$0x3] }
  0x1f   : > { %740 = vperm.xlu0 %5612, %v682_v22   ;;  %5054 = vmatprep.mubr.msk.bf16.mxu0 %vm462_vm1, %v5622_v24  ;;  %v1057_v47 = vor.u32 %v1056_v43, %v1052_v40  ;;  %v1073_v63 = vor.u32 %v1071_v56, %v1069_v59  ;;  %v1079_v9 = vshrl.u32 %v5634_v49, 16  ;;  %v1087_v12 = vshrl.u32 %v5635_v60, 16  ;;  %v5637_v18 = vld [vmem:[%s5820_s14 + $0x30] sm:$0xff]   ;;  %v5942_v24 = vld [vmem:[%s5820_s14 + $0x38] sm:$0xff]   ;;  %v5639_v39 = vld [vmem:[%s5820_s14 + $0x40] sm:$0xff]  }
  0x20   : > { %5067 = vmatmul.mubr.msk.bf16.gmra.mrb[4].mxu1 %vm462_vm1, %v5621_v23  ;;  %745 = vperm.xlu1 %5613, %v683_v26   ;;  %v1070_v7 = vsel %vm1050_vm3, %v1065_v61, %v1069_v59  ;;  %v1091_v14 = vshll.u32 %v5912_v1, 16  ;;  %v1440_v15 = vsel %vm1433_vm2, %v1437_v58, %v1439_v2  ;;  %v1085_v16 = vrot.slane %v1083_v5, 1  ;;  %v694_v35 = vld [vmem:[%s7525_s4 + $0x90] sm:$0xff]  ;;  %v695_v40 = vld [vmem:[%s7525_s4 + $0x98] sm:$0xff]  ;;  %v5976_v45 = vld [vmem:[%s5820_s14 + $0x48] sm:$0xff]  }
  0x21   : > { %5070 = vmatprep.mubr.msk.bf16.mxu1 %vm462_vm1, %v5623_v25  ;;  %v1062_v55 = vsel %vm1050_vm3, %v1057_v47, %v1061_v48  ;;  %v1078_v11 = vsel %vm1050_vm3, %v1073_v63, %v1077_v0  ;;  %v1441_v13 = vrot.slane %v5635_v60, 1  ;;  %v1081_v20 = vor.u32 %v1079_v9, %v1077_v0  ;;  %v692_v25 = vld [vmem:[%s7525_s4 + $0x80] sm:$0xff]  ;;  %v5981_v46 = vld [vmem:[%s7522_s1 + $0xc] sm:$0x3]  ;;  %v5641_v58 = vld [vmem:[%s5820_s14 + $0x50] sm:$0xff]  }
  0x22   : > { %v1443_v21 = vrot.slane %v5912_v1, 1  ;;  %v1089_v22 = vor.u32 %v1087_v12, %v1085_v16  ;;  %v1093_v23 = vrot.slane %v1091_v14, 1  ;;  %v1103_v33 = vshrl.u32 %v5637_v18, 16  ;;  %v696_v47 = vld [vmem:[%s7525_s4 + $0xa0] sm:$0xff]  ;;  %v698_v59 = vld [vmem:[%s7525_s4 + $0xb0] sm:$0xff]  ;;  %v699_v61 = vld [vmem:[%s7525_s4 + $0xb8] sm:$0xff] }
  0x23   : > { %750 = vperm.xlu0 %5612, %v684_v27   ;;  %v1442_v26 = vsel %vm1433_vm2, %v1439_v2, %v1441_v13  ;;  %v1099_v27 = vshll.u32 %v5637_v18, 16  ;;  %v1107_v34 = vshll.u32 %v5942_v24, 16  ;;  %v1447_v42 = vrot.slane %v5942_v24, 1  ;;  %v6010_v2 = vld [vmem:[%s5820_s14 + $0x58] sm:$0xff]  }
  0x24   : > { %755 = vperm.xlu1 %5613, %v685_v28   ;;  %v693_v28 = vld [vmem:[%s7525_s4 + $0x88] sm:$0xff]  ;;  %v1115_v49 = vshll.u32 %v5639_v39, 16  ;;  %v1111_v53 = vshrl.u32 %v5942_v24, 16  ;;  %v1123_v56 = vshll.u32 %v5976_v45, 16  ;;  %v1449_v57 = vrot.slane %v5639_v39, 1  ;;  %v6047_v24 = vld [vmem:[%s5820_s14 + $0x30] sm:$0xff]  }
  0x25   : > { %v1101_v37 = vrot.slane %v1099_v27, 1  ;;  %v1109_v44 = vrot.slane %v1107_v34, 1  ;;  %v1451_v63 = vrot.slane %v5976_v45, 1  ;;  %v1135_v14 = vshrl.u32 %v5641_v58, 16 }
  0x26   : > { %5055 = vmatmul.mubr.msk.bf16.gmra.mrb[8].mxu0 %vm462_vm1, %v5624_v29  ;;  %v1086_v29 = vsel %vm1050_vm3, %v1081_v20, %v1085_v16  ;;  %v1117_v60 = vrot.slane %v1115_v49, 1  ;;  %v1450_v5 = vsel %vm1433_vm2, %v1447_v42, %v1449_v57  ;;  %v1453_v16 = vrot.slane %v5641_v58, 1 }
  0x27   : > { %760 = vperm.xlu0 %5612, %v686_v32   ;;  %5058 = vmatprep.mubr.msk.bf16.mxu0 %vm462_vm1, %v5626_v31  ;;  %v1095_v31 = vshrl.u32 %v5912_v1, 16  ;;  %v1094_v32 = vsel %vm1050_vm3, %v1089_v22, %v1093_v23  ;;  %v1105_v43 = vor.u32 %v1103_v33, %v1101_v37  ;;  %v1125_v1 = vrot.slane %v1123_v56, 1 }
  0x28   : > { %5071 = vmatmul.mubr.msk.bf16.gmra.mrb[8].mxu1 %vm462_vm1, %v5625_v30  ;;  %765 = vperm.xlu1 %5613, %v687_v62   ;;  %v1444_v30 = vsel %vm1433_vm2, %v1441_v13, %v1443_v21  ;;  %v1113_v62 = vor.u32 %v1111_v53, %v1109_v44  ;;  %v6032_v13 = vld [vmem:[%s5820_s14 + $0x68] sm:$0xff]   ;;  %v1143_v33 = vshrl.u32 %v6010_v2, 16 }
  0x29   : > { %5074 = vmatprep.mubr.msk.bf16.mxu1 %vm462_vm1, %v5627_v38  ;;  %v1445_v38 = vrot.slane %v5637_v18, 1  ;;  %v1097_v41 = vor.u32 %v1095_v31, %v1093_v23  ;;  %v702_v18 = vld [vmem:[%s7525_s4 + $0xd0] sm:$0xff]  ;;  %v1455_v23 = vrot.slane %v6010_v2, 1  ;;  %v2483_v31 = vshll.u32 %v6047_v24, 16 }
  0x2a   : > { %v1118_v9 = vsel %vm1050_vm3, %v1113_v62, %v1117_v60  ;;  %v1459_v49 = vrot.slane %v6032_v13, 1  ;;  %v6104_v62 = vld [vmem:[%s5820_s14 + $0x48] sm:$0xff]  }
  0x2b   : > { %770 = vperm.xlu0 %5612, %v688_v3   ;;  %v1446_v48 = vsel %vm1433_vm2, %v1443_v21, %v1445_v38  ;;  %v1448_v52 = vsel %vm1433_vm2, %v1445_v38, %v1447_v42  ;;  %v1131_v3 = vshll.u32 %v5641_v58, 16  ;;  %v703_v21 = vld [vmem:[%s7525_s4 + $0xd8] sm:$0xff] }
  0x2c   : > { %775 = vperm.xlu1 %5613, %v689_v6   ;;  %v1127_v6 = vshrl.u32 %v5976_v45, 16  ;;  %v6071_v42 = vld [vmem:[%s5820_s14 + $0x78] sm:$0xff]  }
  0x2e   : > { %5059 = vmatmul.mubr.msk.bf16.gmra.mrb[12].mxu0 %vm462_vm1, %v5628_v50  ;;  %v697_v50 = vld [vmem:[%s7525_s4 + $0xa8] sm:$0xff]  ;;  %v1129_v20 = vor.u32 %v1127_v6, %v1125_v1  ;;  %v2507_v6 = vshll.u32 %v6104_v62, 16 }
  0x2f   : > { %5114 = vmatprep.mubr.msk.bf16.mxu0 %vm462_vm1, %v1436_v54  ;;  %780 = vperm.xlu0 %5612, %v690_v17   ;;  %v1110_v54 = vsel %vm1050_vm3, %v1105_v43, %v1109_v44  ;;  %v1133_v17 = vrot.slane %v1131_v3, 1  ;;  %v6074_v43 = vld [vmem:[%s5820_s14 + $0x38] sm:$0xff]   ;;  %v6076_v44 = vrot.slane %v2483_v31, 1  ;;  %v1683_v31 = vld [vmem:[%s7526_s5 + $0x20] sm:$0xff] }
  0x30   : > { %5075 = vmatmul.mubr.msk.bf16.gmra.mrb[12].mxu1 %vm462_vm1, %v5629_v51  ;;  %785 = vperm.xlu1 %5613, %v691_v19   ;;  %v1102_v51 = vsel %vm1050_vm3, %v1097_v41, %v1101_v37  ;;  %v705_v37 = vld [vmem:[%s7525_s4 + $0xe8] sm:$0xff]  ;;  %v1155_v41 = vshll.u32 %v6032_v13, 16  ;;  %v2491_v53 = vshll.u32 %v6074_v43, 16 }
  0x31   : > { %5080 = vmatprep.mubr.msk.bf16.mxu1 %vm462_vm1, %v1062_v55  ;;  %v1119_v55 = vshrl.u32 %v5639_v39, 16  ;;  %v1456_v39 = vsel %vm1433_vm2, %v1453_v16, %v1455_v23 }
  0x32   : > { %v1157_v58 = vrot.slane %v1155_v41, 1 }
  0x33   : > { %790 = vperm.xlu0 %5612, %v692_v25   ;;  %v1121_v0 = vor.u32 %v1119_v55, %v1117_v60  ;;  %v1137_v25 = vor.u32 %v1135_v14, %v1133_v17 }
  0x34   : > { %795 = vperm.xlu1 %5613, %v693_v28  }
  0x35   : > { %v1126_v12 = vsel %vm1050_vm3, %v1121_v0, %v1125_v1  ;;  %v1171_v1 = vshll.u32 %v6071_v42, 16 }
  0x36   : > { %5115 = vmatmul.mubr.msk.bf16.vlgmr.msra.gmra.mrb[16].mxu0 %vm462_vm1, %v1438_v4  ;;  %v700_v4 = vld [vmem:[%s7525_s4 + $0xc0] sm:$0xff] }
  0x37   : > { %5215 = vmatpush3.bf16.msra.mxu0 %v2907_v8  ;;  %5118 = vmatprep.mubr.msk.bf16.mxu0 %vm462_vm1, %v1440_v15  ;;  %v701_v8 = vld [vmem:[%s7525_s4 + $0xc8] sm:$0xff]  ;;  %v1139_v15 = vshll.u32 %v6010_v2, 16  ;;  %v1679_v2 = vld [vmem:[%s7526_s5] sm:$0xff] }
  0x38   : > { %5081 = vmatmul.mubr.msk.bf16.vlgmr.msra.gmra.mrb[16].mxu1 %vm462_vm1, %v1070_v7  ;;  %800 = vperm.xlu0 %5612, %v694_v35   ;;  %v6018_v7 = vld [vmem:[%s5820_s14 + $0x60] sm:$0xff]   ;;  %v6061_v35 = vld [vmem:[%s5820_s14 + $0x70] sm:$0xff]  }
  0x39   : > { %5147 = vmatpush3.bf16.msra.mxu1 %v2098_v10  ;;  %5084 = vmatprep.mubr.msk.bf16.mxu1 %vm462_vm1, %v1078_v11  ;;  %v1452_v10 = vsel %vm1433_vm2, %v1449_v57, %v1451_v63  ;;  %v6026_v11 = vld [vmem:[%s5820_s14 + $0x28] sm:$0xff]   ;;  %v1147_v27 = vshll.u32 %v6018_v7, 16  ;;  %v1457_v34 = vrot.slane %v6018_v7, 1  ;;  %v1163_v60 = vshll.u32 %v6061_v35, 16 }
  0x3a   : > { %5581 = vmatprep.subr.msk.bf16.mxu1 %vm511_vm0, %v5963_v36  ;;  %805 = vperm.xlu1 %5613, %v695_v40   ;;  %v2475_v19 = vshll.u32 %v6026_v11, 16  ;;  %v2479_v22 = vshrl.u32 %v6026_v11, 16  ;;  %v1151_v40 = vshrl.u32 %v6018_v7, 16  ;;  %v1167_v14 = vshrl.u32 %v6061_v35, 16 }
  0x3b   : > { %5583 = vmatprep.subr.msk.bf16.mxu0 %vm511_vm0, %v5981_v46  ;;  %v1458_v3 = vsel %vm1433_vm2, %v1455_v23, %v1457_v34 }
  0x3c   : > { %810 = vperm.xlu0 %5612, %v696_v47   ;;  %v6050_v28 = vrot.slane %v2475_v19, 1  ;;  %v1149_v47 = vrot.slane %v1147_v27, 1  ;;  %v1463_v19 = vrot.slane %v6071_v42, 1  ;;  %v1682_v27 = vld [vmem:[%s7526_s5 + $0x18] sm:$0xff] }
  0x3e   : > { %5119 = vmatmul.mubr.msk.bf16.gmra.mrb[20].mxu0 %vm462_vm1, %v1442_v26  ;;  %815 = vperm.xlu1 %5613, %v697_v50   ;;  %v1141_v26 = vrot.slane %v1139_v15, 1  ;;  %v2481_v38 = vor.u32 %v2479_v22, %v6050_v28  ;;  %v706_v50 = vld [vmem:[%s7525_s4 + $0xf0] sm:$0xff]  ;;  %v1153_v57 = vor.u32 %v1151_v40, %v1149_v47  ;;  %v6131_v15 = vld [vmem:[%s5820_s14 + $0x80] ss:$0 sps:$4 sm:$0x11]  }
  0x3f   : > { %5122 = vmatprep.mubr.msk.bf16.mxu0 %vm462_vm1, %v1444_v30  ;;  %v704_v30 = vld [vmem:[%s7525_s4 + $0xe0] sm:$0xff] }
  0x40   : > { %5085 = vmatmul.mubr.msk.bf16.gmra.mrb[20].mxu1 %vm462_vm1, %v1086_v29  ;;  %820 = vperm.xlu0 %5612, %v698_v59   ;;  %v1454_v29 = vsel %vm1433_vm2, %v1451_v63, %v1453_v16  ;;  %v1142_v45 = vsel %vm1050_vm3, %v1137_v25, %v1141_v26  ;;  %v1145_v56 = vor.u32 %v1143_v33, %v1141_v26  ;;  %v1159_v59 = vshrl.u32 %v6032_v13, 16  ;;  %v6151_v25 = vld [vmem:[%s5820_s14 + $0xc] sm:$0xf]  ;;  %v2819_v26 = vld [vmem:[%s5820_s14 + $0x8] sm:$0xe] }
  0x41   : > { %5088 = vmatprep.mubr.msk.bf16.mxu1 %vm462_vm1, %v1094_v32  ;;  %v1134_v32 = vsel %vm1050_vm3, %v1129_v20, %v1133_v17  ;;  %v6106_v63 = vrot.slane %v2491_v53, 1  ;;  %v6134_v17 = vld [vmem:[%s5820_s14 + $0x58] sm:$0xff]   ;;  %v1681_v20 = vld [vmem:[%s7526_s5 + $0x10] sm:$0xff] }
  0x42   : > { %825 = vperm.xlu1 %5613, %v699_v61   ;;  %v1461_v61 = vrot.slane %v6061_v35, 1  ;;  %v1150_v7 = vsel %vm1050_vm3, %v1145_v56, %v1149_v47  ;;  %v1161_v23 = vor.u32 %v1159_v59, %v1157_v58  ;;  %v6165_v35 = vld [vmem:[%s5820_s14 + $0x60] sm:$0xff]   ;;  %v2527_v41 = vshrl.u32 %v6134_v17, 16  ;;  %v6192_v53 = vld [vmem:[%s5820_s14 + $0x10] sm:$0xff]  }
  0x43   : > { %v1179_v47 = vshll.u32 %v6131_v15, 16  ;;  %v2531_v13 = vshll.u32 %v6165_v35, 16  ;;  %v1465_v59 = vrot.slane %v6131_v15, 1 }
  0x44   : > { %830 = vperm.xlu0 %5612, %v700_v4   ;;  %v1680_v4 = vld [vmem:[%s7526_s5 + $0x8] sm:$0xff] }
  0x46   : > { %5123 = vmatmul.mubr.msk.bf16.gmra.mrb[24].mxu0 %vm462_vm1, %v1446_v48  ;;  %835 = vperm.xlu1 %5613, %v701_v8   ;;  %v6080_v48 = vld [vmem:[%s5820_s14 + $0x40] sm:$0xff]   ;;  %v1460_v8 = vsel %vm1433_vm2, %v1457_v34, %v1459_v49  ;;  %v1175_v34 = vshrl.u32 %v6071_v42, 16  ;;  %v1689_v42 = vld [vmem:[%s7526_s5 + $0x50] sm:$0xff] }
  0x47   : > { %5126 = vmatprep.mubr.msk.bf16.mxu0 %vm462_vm1, %v1448_v52  ;;  %v6092_v52 = vsel %vm1050_vm3, %v2481_v38, %v6076_v44  ;;  %v2499_v55 = vshll.u32 %v6080_v48, 16 }
  0x48   : > { %5089 = vmatmul.mubr.msk.bf16.gmra.mrb[24].mxu1 %vm462_vm1, %v1102_v51  ;;  %840 = vperm.xlu0 %5612, %v702_v18   ;;  %v707_v51 = vld [vmem:[%s7525_s4 + $0xf8] sm:$0xff]  ;;  %v1165_v18 = vrot.slane %v1163_v60, 1 }
  0x49   : > { %5092 = vmatprep.mubr.msk.bf16.mxu1 %vm462_vm1, %v1110_v54  ;;  %v2495_v54 = vshrl.u32 %v6074_v43, 16  ;;  %v6108_v0 = vrot.slane %v2499_v55, 1  ;;  %v1686_v60 = vld [vmem:[%s7526_s5 + $0x38] sm:$0xff] }
  0x4a   : > { %845 = vperm.xlu1 %5613, %v703_v21   ;;  %v6145_v21 = vrot.slane %v2507_v6, 1  ;;  %v1169_v33 = vor.u32 %v1167_v14, %v1165_v18 }
  0x4c   : > { %850 = vperm.xlu0 %5612, %v704_v30   ;;  %v1173_v30 = vrot.slane %v1171_v1, 1  ;;  %v6209_v1 = vrot.slane %v2531_v13, 1 }
  0x4e   : > { %5127 = vmatmul.mubr.msk.bf16.gmra.mrb[28].mxu0 %vm462_vm1, %v1450_v5  ;;  %855 = vperm.xlu1 %5613, %v705_v37   ;;  %v2497_v5 = vor.u32 %v2495_v54, %v6106_v63  ;;  %v6168_v37 = vld [vmem:[%s5820_s14 + $0x68] sm:$0xff]   ;;  %v4784_v54 = vcombine.low %v2819_v26, %v6151_v25 }
  0x4f   : > { %5130 = vmatprep.mubr.msk.bf16.mxu0 %vm462_vm1, %v1452_v10  ;;  %v2511_v10 = vshrl.u32 %v6104_v62, 16  ;;  %v2539_v56 = vshll.u32 %v6168_v37, 16  ;;  %v1688_v26 = vld [vmem:[%s7526_s5 + $0x48] sm:$0xff] }
  0x50   : > { %5093 = vmatmul.mubr.msk.bf16.gmra.mrb[28].mxu1 %vm462_vm1, %v1118_v9  ;;  %860 = vperm.xlu0 %5612, %v706_v50   ;;  %v6125_v9 = vld [vmem:[%s5820_s14 + $0x50] sm:$0xff]   ;;  %v6138_v16 = vsel %vm1050_vm3, %v2497_v5, %v6108_v0  ;;  %v1684_v50 = vld [vmem:[%s7526_s5 + $0x28] sm:$0xff]  ;;  %v1181_v5 = vrot.slane %v1179_v47, 1  ;;  %v2825_v6 = vrot.slane %v4784_v54, 1 }
  0x51   : > { %5096 = vmatprep.mubr.msk.bf16.mxu1 %vm462_vm1, %v1126_v12  ;;  %v1158_v12 = vsel %vm1050_vm3, %v1153_v57, %v1157_v58  ;;  %v2515_v22 = vshll.u32 %v6125_v9, 16  ;;  %v1174_v57 = vsel %vm1050_vm3, %v1169_v33, %v1173_v30  ;;  %v1685_v58 = vld [vmem:[%s7526_s5 + $0x30] sm:$0xff]  ;;  %v6256_v33 = vld [vmem:[%s5820_s14 + $0x88] ss:$0 sps:$4 sm:$0x11]  }
  0x52   : > { %865 = vperm.xlu1 %5613, %v707_v51   ;;  %v5652_v54 = vld [vmem:[%s5820_s14 + $0x10] sm:$0xff]  }
  0x53   : > { %v6170_v38 = vrot.slane %v2515_v22, 1  ;;  %v1466_v22 = vsel %vm1433_vm2, %v1463_v19, %v1465_v59  ;;  %v2624_v59 = vsel %vm511_vm0, %v5963_v36, 0  ;;  %v1693_v36 = vld [vmem:[%s7526_s5 + $0x70] sm:$0xff] }
  0x54   : > { %1713 = vperm.xlu0 %5612, %v1679_v2   ;;  %v1177_v2 = vor.u32 %v1175_v34, %v1173_v30 }
  0x56   : > { %5131 = vmatmul.mubr.msk.bf16.gmra.mrb[32].mxu0 %vm462_vm1, %v1454_v29  ;;  %1718 = vperm.xlu1 %5613, %v1680_v4   ;;  %v2523_v29 = vshll.u32 %v6134_v17, 16  ;;  %v2543_v4 = vshrl.u32 %v6168_v37, 16 }
  0x57   : > { %5134 = vmatprep.mubr.msk.bf16.mxu0 %vm462_vm1, %v1456_v39  ;;  %v1462_v39 = vsel %vm1433_vm2, %v1459_v49, %v1461_v61  ;;  %v1464_v49 = vsel %vm1433_vm2, %v1461_v61, %v1463_v19  ;;  %v6207_v61 = vld [vmem:[%s5820_s14 + $0x70] sm:$0xff]   ;;  %v6253_v19 = vld [vmem:[%s5820_s14 + $0x80] sm:$0xff]  }
  0x58   : > { %5097 = vmatmul.mubr.msk.bf16.gmra.mrb[32].mxu1 %vm462_vm1, %v1134_v32  ;;  %v2513_v32 = vor.u32 %v2511_v10, %v6145_v21  ;;  %1723 = vperm.xlu0 %5612, %v1681_v20   ;;  %v6175_v40 = vrot.slane %v2523_v29, 1  ;;  %v2547_v15 = vshll.u32 %v6207_v61, 16  ;;  %v1182_v29 = vsel %vm1050_vm3, %v1177_v2, %v1181_v5  ;;  %v1692_v2 = vld [vmem:[%s7526_s5 + $0x68] sm:$0xff] }
  0x59   : > { %5100 = vmatprep.mubr.msk.bf16.mxu1 %vm462_vm1, %v1142_v45  ;;  %v1166_v45 = vsel %vm1050_vm3, %v1161_v23, %v1165_v18  ;;  %v1687_v18 = vld [vmem:[%s7526_s5 + $0x40] sm:$0xff]  ;;  %v5648_v23 = vld [vmem:[%s5820_s14 + $0x8] sm:$0xff]   ;;  %v2563_v47 = vshll.u32 %v6253_v19, 16  ;;  %v2567_v13 = vshrl.u32 %v6253_v19, 16 }
  0x5a   : > { %1728 = vperm.xlu1 %5613, %v1682_v27   ;;  %v6185_v51 = vsel %vm1050_vm3, %v2513_v32, %v6170_v38  ;;  %v2529_v55 = vor.u32 %v2527_v41, %v6175_v40  ;;  %v6241_v27 = vrot.slane %v2547_v15, 1  ;;  %v2832_v15 = vrot.slane %v6026_v11, 1  ;;  %v6310_v11 = vld [vmem:[%s7522_s1 + $0xe] sm:$0x3] }
  0x5c   : > { %1733 = vperm.xlu0 %5612, %v1683_v31   ;;  %v6223_v10 = vsel %vm1050_vm3, %v2529_v55, %v6209_v1  ;;  %v6246_v31 = vld [vmem:[%s5820_s14 + $0x20] sm:$0xff]  }
  0x5d   : > { %v2830_v55 = vrot.slane %v6246_v31, 1 }
  0x5e   : > { %5135 = vmatmul.mubr.msk.bf16.gmra.mrb[36].mxu0 %vm462_vm1, %v1458_v3  ;;  %1738 = vperm.xlu1 %5613, %v1684_v50   ;;  %v6213_v3 = vrot.slane %v2539_v56, 1  ;;  %v2565_v56 = vrot.slane %v2563_v47, 1  ;;  %v1698_v47 = vld [vmem:[%s7526_s5 + $0x98] sm:$0xff] }
  0x5f   : > { %5138 = vmatprep.mubr.msk.bf16.mxu0 %vm462_vm1, %v1460_v8  ;;  %v6219_v8 = vld [vmem:[%s5820_s14 + $0x78] sm:$0xff]  }
  0x60   : > { %5101 = vmatmul.mubr.msk.bf16.gmra.mrb[36].mxu1 %vm462_vm1, %v1150_v7  ;;  %v2826_v7 = vrot.slane %v6192_v53, 1  ;;  %1743 = vperm.xlu0 %5612, %v1685_v58   ;;  %v2545_v14 = vor.u32 %v2543_v4, %v6213_v3  ;;  %v2555_v20 = vshll.u32 %v6219_v8, 16  ;;  %v2559_v41 = vshrl.u32 %v6219_v8, 16 }
  0x61   : > { %5104 = vmatprep.mubr.msk.bf16.mxu1 %vm462_vm1, %v1158_v12  ;;  %v6226_v12 = vld [vmem:[%s5820_s14 + $0x18] sm:$0xff]   ;;  %v2569_v5 = vor.u32 %v2567_v13, %v2565_v56  ;;  %v1699_v13 = vld [vmem:[%s7526_s5 + $0xa0] sm:$0xff] }
  0x62   : > { %1748 = vperm.xlu1 %5613, %v1686_v60   ;;  %v2827_v30 = vsel %vm1433_vm2, %v2825_v6, %v2826_v7  ;;  %v2828_v32 = vrot.slane %v6226_v12, 1  ;;  %v6260_v34 = vsel %vm1050_vm3, %v2545_v14, %v6241_v27  ;;  %v3297_v6 = vsel %vm511_vm0, %v5981_v46, 0  ;;  %v5654_v14 = vld [vmem:[%s5820_s14 + $0x18] sm:$0xff]  }
  0x63   : > { %v1694_v46 = vld [vmem:[%s7526_s5 + $0x78] sm:$0xff] }
  0x64   : > { %1753 = vperm.xlu0 %5612, %v1687_v18   ;;  %v2829_v60 = vsel %vm1433_vm2, %v2826_v7, %v2828_v32  ;;  %v2831_v18 = vsel %vm1433_vm2, %v2828_v32, %v2830_v55  ;;  %v5658_v32 = vld [vmem:[%s5820_s14 + $0x28] sm:$0xff]  }
  0x66   : > { %5139 = vmatmul.mubr.msk.bf16.gmra.mrb[40].mxu0 %vm462_vm1, %v1462_v39  ;;  %1758 = vperm.xlu1 %5613, %v1688_v26   ;;  %v6263_v39 = vrot.slane %v2555_v20, 1  ;;  %v2834_v20 = vrot.slane %v6047_v24, 1  ;;  %v1695_v26 = vld [vmem:[%s7526_s5 + $0x80] sm:$0xff] }
  0x67   : > { %5142 = vmatprep.mubr.msk.bf16.mxu0 %vm462_vm1, %v1464_v49  ;;  %v2571_v49 = vshll.u32 %v6256_v33, 16 }
  0x68   : > { %5105 = vmatmul.mubr.msk.bf16.gmra.mrb[40].mxu1 %vm462_vm1, %v1166_v45  ;;  %v1690_v45 = vld [vmem:[%s7526_s5 + $0x58] sm:$0xff]  ;;  %v2561_v50 = vor.u32 %v2559_v41, %v6263_v39  ;;  %1763 = vperm.xlu0 %5612, %v1689_v42   ;;  %v2835_v42 = vsel %vm1433_vm2, %v2832_v15, %v2834_v20  ;;  %v1697_v41 = vld [vmem:[%s7526_s5 + $0x90] sm:$0xff] }
  0x69   : > { %5108 = vmatprep.mubr.msk.bf16.mxu1 %vm462_vm1, %v1174_v57  ;;  %v1691_v57 = vld [vmem:[%s7526_s5 + $0x60] sm:$0xff]  ;;  %v2573_v58 = vrot.slane %v2571_v49, 1  ;;  %v5660_v49 = vld [vmem:[%s5820_s14 + $0x30] sm:$0xff]  }
  0x6a   : > { %1768 = vperm.xlu1 %5613, %v1690_v45   ;;  %v6288_v4 = vsel %vm1050_vm3, %v2561_v50, %v2565_v56  ;;  %v2836_v45 = vrot.slane %v6074_v43, 1  ;;  %v2838_v50 = vrot.slane %v6080_v48, 1  ;;  %v1700_v43 = vld [vmem:[%s7526_s5 + $0xa8] sm:$0xff] }
  0x6b   : > { %v6298_v7 = vsel %vm1050_vm3, %v2569_v5, %v2573_v58  ;;  %v2840_v58 = vrot.slane %v6104_v62, 1  ;;  %v1703_v5 = vld [vmem:[%s7526_s5 + $0xc0] sm:$0xff]  ;;  %v1704_v62 = vld [vmem:[%s7526_s5 + $0xc8] sm:$0xff] }
  0x6c   : > { %1773 = vperm.xlu0 %5612, %v1691_v57   ;;  %v2839_v56 = vsel %vm1433_vm2, %v2836_v45, %v2838_v50  ;;  %v1701_v57 = vld [vmem:[%s7526_s5 + $0xb0] sm:$0xff] }
  0x6e   : > { %5143 = vmatmul.mubr.msk.bf16.gmra.mrb[44].mxu0 %vm462_vm1, %v1466_v22  ;;  %1778 = vperm.xlu1 %5613, %v1692_v2   ;;  %v6316_v22 = vld [vmem:[%s7522_s1 + $0x10] sm:$0x3]  ;;  %v5664_v2 = vld [vmem:[%s5820_s14 + $0x40] sm:$0xff]  }
  0x6f   : > { %5216 = vmatprep.mubr.msk.bf16.mxu0 %vm462_vm1, %v2827_v30  ;;  %v1696_v30 = vld [vmem:[%s7526_s5 + $0x88] sm:$0xff] }
  0x70   : > { %5109 = vmatmul.mubr.msk.bf16.gmra.mrb[44].mxu1 %vm462_vm1, %v1182_v29  ;;  %1783 = vperm.xlu0 %5612, %v1693_v36   ;;  %v2833_v29 = vsel %vm1433_vm2, %v2830_v55, %v2832_v15  ;;  %v5662_v55 = vld [vmem:[%s5820_s14 + $0x38] sm:$0xff]   ;;  %v1705_v36 = vld [vmem:[%s7526_s5 + $0xd0] sm:$0xff] }
  0x71   : > { %5148 = vmatprep.mubr.msk.bf16.mxu1 %vm462_vm1, %v5648_v23  ;;  %v5656_v23 = vld [vmem:[%s5820_s14 + $0x20] sm:$0xff]  }
  0x72   : > { %1788 = vperm.xlu1 %5613, %v1694_v46  }
  0x74   : > { %1793 = vperm.xlu0 %5612, %v1695_v26  }
  0x76   : > { %5217 = vmatmul.mubr.msk.bf16.vlgmr.msra.gmra.mrb[48].mxu0 %vm462_vm1, %v2829_v60  ;;  %1798 = vperm.xlu1 %5613, %v1696_v30   ;;  %v2842_v60 = vrot.slane %v6125_v9, 1 }
  0x77   : > { %5249 = vmatpush3.bf16.msra.mxu0 %v3297_v6  ;;  %5220 = vmatprep.mubr.msk.bf16.mxu0 %vm462_vm1, %v2831_v18  ;;  %v2841_v6 = vsel %vm1433_vm2, %v2838_v50, %v2840_v58  ;;  %v2844_v18 = vrot.slane %v6134_v17, 1  ;;  %v1707_v17 = vld [vmem:[%s7526_s5 + $0xe0] sm:$0xff]  ;;  %v2848_v50 = vrot.slane %v6168_v37, 1 }
  0x78   : > { %5149 = vmatmul.mubr.msk.bf16.vlgmr.msra.gmra.mrb[48].mxu1 %vm462_vm1, %v5652_v54  ;;  %5585 = vmatprep.subr.msk.bf16.mxu0 %vm511_vm0, %v6316_v22  ;;  %v2837_v54 = vsel %vm1433_vm2, %v2834_v20, %v2836_v45  ;;  %v2843_v15 = vsel %vm1433_vm2, %v2840_v58, %v2842_v60  ;;  %v1706_v20 = vld [vmem:[%s7526_s5 + $0xd8] sm:$0xff] }
  0x79   : > { %5181 = vmatpush3.bf16.msra.mxu1 %v2624_v59  ;;  %5152 = vmatprep.mubr.msk.bf16.mxu1 %vm462_vm1, %v5654_v14  ;;  %v1702_v59 = vld [vmem:[%s7526_s5 + $0xb8] sm:$0xff]  ;;  %v5666_v14 = vld [vmem:[%s5820_s14 + $0x48] sm:$0xff]   ;;  %v2845_v30 = vsel %vm1433_vm2, %v2842_v60, %v2844_v18 }
  0x7a   : > { %5584 = vmatprep.subr.msk.bf16.mxu1 %vm511_vm0, %v6310_v11  ;;  %1803 = vperm.xlu0 %5612, %v1697_v41  }
  0x7b   : > { %1808 = vperm.xlu1 %5613, %v1698_v47   ;;  %v1709_v47 = vld [vmem:[%s7526_s5 + $0xf0] sm:$0xff] }
  0x7e   : > { %5221 = vmatmul.mubr.msk.bf16.gmra.mrb[52].mxu0 %vm462_vm1, %v2833_v29  ;;  %1813 = vperm.xlu0 %5612, %v1699_v13   ;;  %v5668_v29 = vld [vmem:[%s5820_s14 + $0x50] sm:$0xff]   ;;  %v1710_v13 = vld [vmem:[%s7526_s5 + $0xf8] sm:$0xff] }
  0x7f   : > { %5224 = vmatprep.mubr.msk.bf16.mxu0 %vm462_vm1, %v2835_v42  ;;  %1818 = vperm.xlu1 %5613, %v1700_v43   ;;  %v5670_v42 = vld [vmem:[%s5820_s14 + $0x58] sm:$0xff]   ;;  %v2325_v43 = vld [vmem:[%s5820_s14 + $0x8] sm:$0xf] }
  0x80   : > { %5153 = vmatmul.mubr.msk.bf16.gmra.mrb[52].mxu1 %vm462_vm1, %v5656_v23  ;;  %v2846_v23 = vrot.slane %v6165_v35, 1 }
  0x81   : > { %5156 = vmatprep.mubr.msk.bf16.mxu1 %vm462_vm1, %v5658_v32  ;;  %v1708_v32 = vld [vmem:[%s7526_s5 + $0xe8] sm:$0xff] }
  0x82   : > { %1823 = vperm.xlu0 %5612, %v1701_v57   ;;  %v2847_v41 = vsel %vm1433_vm2, %v2844_v18, %v2846_v23  ;;  %v2849_v37 = vsel %vm1433_vm2, %v2846_v23, %v2848_v50  ;;  %v5674_v57 = vld [vmem:[%s5820_s14 + $0x68] sm:$0xff]  }
  0x83   : > { %1828 = vperm.xlu1 %5613, %v1702_v59   ;;  %v4750_v59 = vcombine.low %v2325_v43, %v6151_v25 }
  0x86   : > { %5225 = vmatmul.mubr.msk.bf16.gmra.mrb[56].mxu0 %vm462_vm1, %v2837_v54  ;;  %1833 = vperm.xlu0 %5612, %v1703_v5   ;;  %v2854_v5 = vrot.slane %v6253_v19, 1 }
  0x87   : > { %5228 = vmatprep.mubr.msk.bf16.mxu0 %vm462_vm1, %v2839_v56  ;;  %1838 = vperm.xlu1 %5613, %v1704_v62   ;;  %v5672_v56 = vld [vmem:[%s5820_s14 + $0x60] sm:$0xff]   ;;  %v2446_v62 = vshll.u32 %v4750_v59, 16 }
  0x88   : > { %5157 = vmatmul.mubr.msk.bf16.gmra.mrb[56].mxu1 %vm462_vm1, %v5660_v49  ;;  %v2850_v49 = vrot.slane %v6207_v61, 1 }
  0x89   : > { %5160 = vmatprep.mubr.msk.bf16.mxu1 %vm462_vm1, %v5662_v55  ;;  %v2448_v23 = vrot.slane %v2446_v62, 1  ;;  %v4106_v62 = vsel %vm511_vm0, %v6316_v22, 0 }
  0x8a   : > { %1843 = vperm.xlu0 %5612, %v1705_v36   ;;  %v2851_v58 = vsel %vm1433_vm2, %v2848_v50, %v2850_v49  ;;  %v2459_v50 = vshll.u32 %v6226_v12, 16 }
  0x8b   : > { %1848 = vperm.xlu1 %5613, %v1706_v20   ;;  %v2444_v20 = vshrl.u32 %v4750_v59, 16 }
  0x8e   : > { %5229 = vmatmul.mubr.msk.bf16.gmra.mrb[60].mxu0 %vm462_vm1, %v2841_v6  ;;  %1853 = vperm.xlu0 %5612, %v1707_v17   ;;  %v2856_v17 = vrot.slane %v6256_v33, 1  ;;  %v2463_v33 = vshrl.u32 %v6226_v12, 16 }
  0x8f   : > { %5232 = vmatprep.mubr.msk.bf16.mxu0 %vm462_vm1, %v2843_v15  ;;  %1858 = vperm.xlu1 %5613, %v1708_v32   ;;  %v5678_v15 = vld [vmem:[%s5820_s14 + $0x78] sm:$0xff]  }
  0x90   : > { %5161 = vmatmul.mubr.msk.bf16.gmra.mrb[60].mxu1 %vm462_vm1, %v5664_v2  ;;  %v2852_v2 = vrot.slane %v6219_v8, 1  ;;  %v2451_v8 = vshll.u32 %v6192_v53, 16 }
  0x91   : > { %5164 = vmatprep.mubr.msk.bf16.mxu1 %vm462_vm1, %v5666_v14  ;;  %v5676_v14 = vld [vmem:[%s5820_s14 + $0x70] sm:$0xff]  }
  0x92   : > { %v6387_v46 = vpop.permute.xlu0 %710  ;;  %v6394_v26 = vpop.permute.xlu1 %720  ;;  %1863 = vperm.xlu0 %5612, %v1709_v47   ;;  %v2853_v25 = vsel %vm1433_vm2, %v2850_v49, %v2852_v2  ;;  %v2855_v36 = vsel %vm1433_vm2, %v2852_v2, %v2854_v5  ;;  %v5682_v47 = vld [vmem:[%s5820_s14 + $0x10] sm:$0xff]   ;;  %v5683_v2 = vld [vmem:[%s5820_s14 + $0x18] sm:$0xff]  }
  0x93   : > { %7612 = vst [vmem:[#allocation2_spill] sm:$0xff] %v6387_v46  ;;  %7613 = vst [vmem:[#allocation3_spill] sm:$0xff] %v6394_v26  ;;  %1868 = vperm.xlu1 %5613, %v1710_v13   ;;  %v2455_v13 = vshrl.u32 %v6192_v53, 16 }
  0x96   : > { %v6403_v45 = vpop.permute.xlu0 %715  ;;  %5233 = vmatmul.mubr.msk.bf16.gmra.mrb[64].mxu0 %vm462_vm1, %v2845_v30  ;;  %v6417_v54 = vpop.permute.xlu1 %725  ;;  %v2453_v30 = vrot.slane %v2451_v8, 1  ;;  %v5686_v8 = vld [vmem:[%s5820_s14 + $0x30] sm:$0xff]  }
  0x97   : > { %5236 = vmatprep.mubr.msk.bf16.mxu0 %vm462_vm1, %v2847_v41  ;;  %v2857_v41 = vsel %vm1433_vm2, %v2854_v5, %v2856_v17 }
  0x98   : > { %5165 = vmatmul.mubr.msk.bf16.gmra.mrb[64].mxu1 %vm462_vm1, %v5668_v29  ;;  %v2449_v29 = vor.u32 %v2448_v23, %v2444_v20  ;;  %v5684_v20 = vld [vmem:[%s5820_s14 + $0x20] sm:$0xff]  }
  0x99   : > { %5168 = vmatprep.mubr.msk.bf16.mxu1 %vm462_vm1, %v5670_v42  ;;  %v5680_v42 = vld [vmem:[%s5820_s14 + $0x80] sm:$0xff]  }
  0x9a   : > { %v6420_v55 = vpop.permute.xlu0 %730  ;;  %v2454_v43 = vsel %vm1050_vm3, %v2449_v29, %v2453_v30  ;;  %v2487_v29 = vshrl.u32 %v6047_v24, 16 }
  0x9b   : > { %v6428_v60 = vpop.permute.xlu1 %735 }
  0x9e   : > { %5237 = vmatmul.mubr.msk.bf16.gmra.mrb[68].mxu0 %vm462_vm1, %v2849_v37  ;;  %v6435_v6 = vpop.permute.xlu0 %740  ;;  %v2461_v37 = vrot.slane %v2459_v50, 1  ;;  %v5688_v50 = vld [vmem:[%s5820_s14 + $0x40] sm:$0xff]  }
  0x9f   : > { %5240 = vmatprep.mubr.msk.bf16.mxu0 %vm462_vm1, %v2851_v58  ;;  %v6441_v18 = vpop.permute.xlu1 %745 }
  0xa0   : > { %5169 = vmatmul.mubr.msk.bf16.gmra.mrb[68].mxu1 %vm462_vm1, %v5672_v56  ;;  %v2467_v56 = vshll.u32 %v6246_v31, 16  ;;  %v2465_v58 = vor.u32 %v2463_v33, %v2461_v37 }
  0xa1   : > { %5172 = vmatprep.mubr.msk.bf16.mxu1 %vm462_vm1, %v5674_v57  ;;  %v2457_v57 = vor.u32 %v2455_v13, %v2453_v30 }
  0xa2   : > { %v6445_v19 = vpop.permute.xlu0 %750  ;;  %v2469_v59 = vrot.slane %v2467_v56, 1 }
  0xa3   : > { %v6451_v32 = vpop.permute.xlu1 %755  ;;  %v2462_v12 = vsel %vm1050_vm3, %v2457_v57, %v2461_v37  ;;  %v5690_v37 = vld [vmem:[%s5820_s14 + $0x50] sm:$0xff]  }
  0xa6   : > { %5241 = vmatmul.mubr.msk.bf16.gmra.mrb[72].mxu0 %vm462_vm1, %v2853_v25  ;;  %v6458_v49 = vpop.permute.xlu0 %760 }
  0xa7   : > { %5244 = vmatprep.mubr.msk.bf16.mxu0 %vm462_vm1, %v2855_v36  ;;  %v6467_v53 = vpop.permute.xlu1 %765  ;;  %v2470_v36 = vsel %vm1050_vm3, %v2465_v58, %v2469_v59  ;;  %v2519_v58 = vshrl.u32 %v6125_v9, 16 }
  0xa8   : > { %5173 = vmatmul.mubr.msk.bf16.gmra.mrb[72].mxu1 %vm462_vm1, %v5676_v14  ;;  %v2471_v14 = vshrl.u32 %v6246_v31, 16 }
  0xa9   : > { %5176 = vmatprep.mubr.msk.bf16.mxu1 %vm462_vm1, %v5678_v15  ;;  %v3823_v15 = vsel %vm511_vm0, %v6310_v11, 0  ;;  %v5685_v11 = vld [vmem:[%s5820_s14 + $0x28] sm:$0xff]  }
  0xaa   : > { %v6470_v5 = vpop.permute.xlu0 %770  ;;  %v2473_v22 = vor.u32 %v2471_v14, %v2469_v59  ;;  %v2535_v14 = vshrl.u32 %v6165_v35, 16  ;;  %v3524_v35 = vld [vmem:[%s5820_s14 + $0x10] sm:$0xf] }
  0xab   : > { %7614 = vst [vmem:[#allocation4_spill] sm:$0xff] %v6470_v5  ;;  %v6476_v25 = vpop.permute.xlu1 %775 }
  0xac   : > { %7615 = vst [vmem:[#allocation5_spill] sm:$0xff] %v6476_v25  ;;  %v2478_v17 = vsel %vm1050_vm3, %v2473_v22, %v6050_v28  ;;  %v5687_v28 = vld [vmem:[%s5820_s14 + $0x38] sm:$0xff]   ;;  %v5694_v22 = vld [vmem:[%s5820_s14 + $0x70] sm:$0xff]  }
  0xae   : > { %5245 = vmatmul.mubr.msk.bf16.gmra.mrb[76].mxu0 %vm462_vm1, %v2857_v41  ;;  %v6485_v23 = vpop.permute.xlu0 %780  ;;  %v2489_v41 = vor.u32 %v2487_v29, %v6076_v44 }
  0xaf   : > { %5250 = vmatprep.mubr.msk.bf16.mxu0 %vm462_vm1, %v5682_v47  ;;  %7616 = vst [vmem:[#allocation6_spill] sm:$0xff] %v6485_v23  ;;  %v6488_v31 = vpop.permute.xlu1 %785 }
  0xb0   : > { %5177 = vmatmul.mubr.msk.bf16.gmra.mrb[76].mxu1 %vm462_vm1, %v5680_v42  ;;  %7617 = vst [vmem:[#allocation7_spill] sm:$0xff] %v6488_v31  ;;  %v2494_v13 = vsel %vm1050_vm3, %v2489_v41, %v6106_v63  ;;  %v5689_v63 = vld [vmem:[%s5820_s14 + $0x48] sm:$0xff]  }
  0xb1   : > { %5182 = vmatprep.mubr.msk.bf16.mxu1 %vm462_vm1, %v2454_v43  ;;  %v2503_v43 = vshrl.u32 %v6080_v48, 16  ;;  %v6737_v31 = vld [vmem:[%s5820_s14 + $0x68] sm:$0xff]  }
  0xb2   : > { %v6495_v30 = vpop.permute.xlu0 %790 }
  0xb3   : > { %7618 = vst [vmem:[#allocation8_spill] sm:$0xff] %v6495_v30  ;;  %v6497_v42 = vpop.permute.xlu1 %795  ;;  %v2505_v44 = vor.u32 %v2503_v43, %v6108_v0  ;;  %v2521_v0 = vor.u32 %v2519_v58, %v6170_v38  ;;  %v2537_v38 = vor.u32 %v2535_v14, %v6209_v1  ;;  %v6602_v14 = vld [vmem:[%s5820_s14 + $0x28] sm:$0xff]  }
  0xb4   : > { %7619 = vst [vmem:[#allocation9_spill] sm:$0xff] %v6497_v42  ;;  %v6693_v42 = vld [vmem:[%s5820_s14 + $0x50] sm:$0xff]  }
  0xb5   : > { %v2510_v57 = vsel %vm1050_vm3, %v2505_v44, %v6145_v21  ;;  %v5691_v21 = vld [vmem:[%s5820_s14 + $0x58] sm:$0xff]   ;;  %v4039_v25 = vrot.slane %v6693_v42, 1 }
  0xb6   : > { %5251 = vmatmul.mubr.msk.bf16.vlgmr.msra.gmra.mrb[80].mxu0 %vm462_vm1, %v5683_v2 }
  0xb7   : > { %5317 = vmatpush3.bf16.msra.mxu0 %v4106_v62  ;;  %5254 = vmatprep.mubr.msk.bf16.mxu0 %vm462_vm1, %v5684_v20  ;;  %v6505_v47 = vpop.permute.xlu0 %800  ;;  %v2526_v62 = vsel %vm1050_vm3, %v2521_v0, %v6175_v40  ;;  %v5693_v40 = vld [vmem:[%s5820_s14 + $0x68] sm:$0xff]   ;;  %v3525_v20 = vld [vmem:[%s5820_s14 + $0x14] sm:$0xf] }
  0xb8   : > { %5183 = vmatmul.mubr.msk.bf16.vlgmr.msra.gmra.mrb[16].mxu1 %vm462_vm1, %v2462_v12  ;;  %7620 = vst [vmem:[#allocation10_spill] sm:$0xff] %v6505_v47  ;;  %v5692_v12 = vld [vmem:[%s5820_s14 + $0x60] sm:$0xff]  }
  0xb9   : > { %5283 = vmatpush3.bf16.msra.mxu1 %v3823_v15  ;;  %5186 = vmatprep.mubr.msk.bf16.mxu1 %vm462_vm1, %v2470_v36  ;;  %v6507_v24 = vpop.permute.xlu1 %805 }
  0xba   : > { %7621 = vst [vmem:[#allocation11_spill] sm:$0xff] %v6507_v24 }
  0xbb   : > { %v6514_v33 = vpop.permute.xlu0 %810 }
  0xbc   : > { %7622 = vst [vmem:[#allocation12_spill] sm:$0xff] %v6514_v33 }
  0xbd   : > { %v6516_v56 = vpop.permute.xlu1 %815 }
  0xbe   : > { %5255 = vmatmul.mubr.msk.bf16.gmra.mrb[84].mxu0 %vm462_vm1, %v5685_v11  ;;  %7623 = vst [vmem:[#allocation13_spill] sm:$0xff] %v6516_v56  ;;  %v2542_v11 = vsel %vm1050_vm3, %v2537_v38, %v6213_v3  ;;  %v5699_v3 = vld [vmem:[%s5820_s14 + $0x18] sm:$0xff]  }
  0xbf   : > { %5258 = vmatprep.mubr.msk.bf16.mxu0 %vm462_vm1, %v5686_v8  ;;  %v2551_v8 = vshrl.u32 %v6207_v61, 16  ;;  %v4018_v61 = vld [vmem:[%s5820_s14 + $0x10] sm:$0xe]  ;;  %v4025_v0 = vrot.slane %v5699_v3, 1 }
  0xc0   : > { %5187 = vmatmul.mubr.msk.bf16.gmra.mrb[20].mxu1 %vm462_vm1, %v2478_v17 }
  0xc1   : > { %5190 = vmatprep.mubr.msk.bf16.mxu1 %vm462_vm1, %v6092_v52  ;;  %v6524_v52 = vpop.permute.xlu0 %820  ;;  %v6526_v48 = vpop.permute.xlu1 %825  ;;  %v2553_v1 = vor.u32 %v2551_v8, %v6241_v27  ;;  %v5701_v27 = vld [vmem:[%s5820_s14 + $0x20] sm:$0xff]  }
  0xc2   : > { %7624 = vst [vmem:[#allocation14_spill] sm:$0xff] %v6524_v52  ;;  %7625 = vst [vmem:[#allocation15_spill] sm:$0xff] %v6526_v48 }
  0xc3   : > { %v2558_v44 = vsel %vm1050_vm3, %v2553_v1, %v6263_v39  ;;  %v3654_v1 = vshrl.u32 %v5699_v3, 16 }
  0xc5   : > { %v6533_v59 = vpop.permute.xlu0 %830  ;;  %v6535_v2 = vpop.permute.xlu1 %835 }
  0xc6   : > { %5259 = vmatmul.mubr.msk.bf16.gmra.mrb[88].mxu0 %vm462_vm1, %v5687_v28  ;;  %7626 = vst [vmem:[#allocation16_spill] sm:$0xff] %v6533_v59  ;;  %7627 = vst [vmem:[#allocation17_spill] sm:$0xff] %v6535_v2  ;;  %v5695_v28 = vld [vmem:[%s5820_s14 + $0x78] sm:$0xff]   ;;  %v3670_v2 = vshrl.u32 %v6602_v14, 16 }
  0xc7   : > { %5262 = vmatprep.mubr.msk.bf16.mxu0 %vm462_vm1, %v5688_v50 }
  0xc8   : > { %5191 = vmatmul.mubr.msk.bf16.gmra.mrb[24].mxu1 %vm462_vm1, %v2494_v13  ;;  %v5696_v13 = vld [vmem:[%s5820_s14 + $0x80] sm:$0xff]  }
  0xc9   : > { %5194 = vmatprep.mubr.msk.bf16.mxu1 %vm462_vm1, %v6138_v16  ;;  %v6543_v16 = vpop.permute.xlu0 %840  ;;  %v6545_v9 = vpop.permute.xlu1 %845 }
  0xca   : > { %7628 = vst [vmem:[#allocation18_spill] sm:$0xff] %v6543_v16  ;;  %7629 = vst [vmem:[#allocation19_spill] sm:$0xff] %v6545_v9 }
  0xcd   : > { %v6552_v15 = vpop.permute.xlu0 %850 }
  0xce   : > { %5263 = vmatmul.mubr.msk.bf16.gmra.mrb[92].mxu0 %vm462_vm1, %v5689_v63  ;;  %7630 = vst [vmem:[#allocation20_spill] sm:$0xff] %v6552_v15  ;;  %v4869_v63 = vcombine.low %v4018_v61, %v3525_v20 }
  0xcf   : > { %5266 = vmatprep.mubr.msk.bf16.mxu0 %vm462_vm1, %v5690_v37 }
  0xd0   : > { %5195 = vmatmul.mubr.msk.bf16.gmra.mrb[28].mxu1 %vm462_vm1, %v2510_v57  ;;  %v4024_v58 = vrot.slane %v4869_v63, 1 }
  0xd1   : > { %5198 = vmatprep.mubr.msk.bf16.mxu1 %vm462_vm1, %v6185_v51  ;;  %v6555_v51 = vpop.permute.xlu1 %855  ;;  %v6562_v36 = vpop.permute.xlu0 %860 }
  0xd2   : > { %7631 = vst [vmem:[#allocation21_spill] sm:$0xff] %v6555_v51  ;;  %7632 = vst [vmem:[#allocation22_spill] sm:$0xff] %v6562_v36 }
  0xd5   : > { %v6571_v17 = vpop.permute.xlu1 %865  ;;  %v6573_v29 = vpop.permute.xlu0 %1713 }
  0xd6   : > { %5267 = vmatmul.mubr.msk.bf16.gmra.mrb[96].mxu0 %vm462_vm1, %v5691_v21  ;;  %7633 = vst [vmem:[#allocation23_spill] sm:$0xff] %v6571_v17  ;;  %7634 = vst [vmem:[#allocation24_spill] sm:$0xff] %v6573_v29 }
  0xd7   : > { %5270 = vmatprep.mubr.msk.bf16.mxu0 %vm462_vm1, %v5692_v12 }
  0xd8   : > { %5199 = vmatmul.mubr.msk.bf16.gmra.mrb[32].mxu1 %vm462_vm1, %v2526_v62 }
  0xd9   : > { %5202 = vmatprep.mubr.msk.bf16.mxu1 %vm462_vm1, %v6223_v10  ;;  %v4835_v10 = vcombine.low %v3524_v35, %v3525_v20  ;;  %v6584_v50 = vpop.permute.xlu1 %1718  ;;  %v6587_v43 = vpop.permute.xlu0 %1723  ;;  %v5697_v20 = vld [vmem:[%s5820_s14 + $0x88] sm:$0xff]  }
  0xda   : > { %7635 = vst [vmem:[#allocation25_spill] sm:$0xff] %v6584_v50  ;;  %7636 = vst [vmem:[#allocation26_spill] sm:$0xff] %v6587_v43 }
  0xdb   : > { %v3645_v41 = vshll.u32 %v4835_v10, 16  ;;  %v3643_v37 = vshrl.u32 %v4835_v10, 16 }
  0xdd   : > { %v3647_v57 = vrot.slane %v3645_v41, 1  ;;  %v6597_v21 = vpop.permute.xlu1 %1728  ;;  %v6604_v38 = vpop.permute.xlu0 %1733  ;;  %v4026_v41 = vsel %vm1433_vm2, %v4024_v58, %v4025_v0 }
  0xde   : > { %5271 = vmatmul.mubr.msk.bf16.gmra.mrb[100].mxu0 %vm462_vm1, %v5693_v40  ;;  %7637 = vst [vmem:[#allocation27_spill] sm:$0xff] %v6597_v21  ;;  %7638 = vst [vmem:[#allocation28_spill] sm:$0xff] %v6604_v38 }
  0xdf   : > { %5274 = vmatprep.mubr.msk.bf16.mxu0 %vm462_vm1, %v5694_v22  ;;  %v3648_v12 = vor.u32 %v3647_v57, %v3643_v37  ;;  %v4027_v37 = vrot.slane %v5701_v27, 1 }
  0xe0   : > { %5203 = vmatmul.mubr.msk.bf16.gmra.mrb[36].mxu1 %vm462_vm1, %v2542_v11  ;;  %v3658_v11 = vshll.u32 %v5701_v27, 16 }
  0xe1   : > { %5206 = vmatprep.mubr.msk.bf16.mxu1 %vm462_vm1, %v6260_v34  ;;  %v3650_v34 = vshll.u32 %v5699_v3, 16  ;;  %v5703_v3 = vld [vmem:[%s5820_s14 + $0x30] sm:$0xff]   ;;  %v6631_v58 = vpop.permute.xlu1 %1738  ;;  %v6638_v15 = vpop.permute.xlu0 %1743 }
  0xe2   : > { %v3660_v63 = vrot.slane %v3658_v11, 1  ;;  %7643 = vst [vmem:[#allocation33_spill] sm:$0xff] %v6631_v58  ;;  %7644 = vst [vmem:[#allocation34_spill] sm:$0xff] %v6638_v15  ;;  %v3678_v16 = vshrl.u32 %v5703_v3, 16 }
  0xe3   : > { %v3652_v62 = vrot.slane %v3650_v34, 1  ;;  %v4029_v34 = vrot.slane %v6602_v14, 1 }
  0xe5   : > { %v3656_v57 = vor.u32 %v3654_v1, %v3652_v62  ;;  %v4028_v1 = vsel %vm1433_vm2, %v4025_v0, %v4027_v37  ;;  %v4030_v36 = vsel %vm1433_vm2, %v4027_v37, %v4029_v34  ;;  %v5705_v0 = vld [vmem:[%s5820_s14 + $0x40] sm:$0xff]   ;;  %v6673_v33 = vpop.permute.xlu0 %1753 }
  0xe6   : > { %5275 = vmatmul.mubr.msk.bf16.gmra.mrb[104].mxu0 %vm462_vm1, %v5695_v28  ;;  %v3653_v28 = vsel %vm1050_vm3, %v3648_v12, %v3652_v62  ;;  %7650 = vst [vmem:[#allocation40_spill] sm:$0xff] %v6673_v33 }
  0xe7   : > { %5278 = vmatprep.mubr.msk.bf16.mxu0 %vm462_vm1, %v5696_v13  ;;  %v3662_v13 = vshrl.u32 %v5701_v27, 16 }
  0xe8   : > { %5207 = vmatmul.mubr.msk.bf16.gmra.mrb[40].mxu1 %vm462_vm1, %v2558_v44  ;;  %v3666_v44 = vshll.u32 %v6602_v14, 16 }
  0xe9   : > { %5210 = vmatprep.mubr.msk.bf16.mxu1 %vm462_vm1, %v6288_v4  ;;  %v6599_v39 = vpop.f32.mrb[0].mxu0  ;;  %v3664_v51 = vor.u32 %v3662_v13, %v3660_v63 }
  0xea   : > { %v6608_v35 = vpop.f32.mrb[1].mxu0  ;;  %v3668_v17 = vrot.slane %v3666_v44, 1  ;;  %v3661_v44 = vsel %vm1050_vm3, %v3656_v57, %v3660_v63  ;;  %v4031_v57 = vrot.slane %v5703_v3, 1 }
  0xeb   : > { %v6606_v40 = vpop.f32.mrb[0].mxu1  ;;  %v6613_v4 = vpop.f32.mrb[2].mxu0 }
  0xec   : > { %7639 = vst [vmem:[#allocation29_spill] sm:$0xff] %v6606_v40  ;;  %v6611_v22 = vpop.f32.mrb[1].mxu1  ;;  %v6617_v10 = vpop.f32.mrb[3].mxu0  ;;  %v3669_v59 = vsel %vm1050_vm3, %v3664_v51, %v3668_v17  ;;  %v3672_v37 = vor.u32 %v3670_v2, %v3668_v17 }
  0xed   : > { %7640 = vst [vmem:[#allocation30_spill] sm:$0xff] %v6611_v22  ;;  %v6615_v8 = vpop.f32.mrb[2].mxu1  ;;  %v6669_v51 = vpop.permute.xlu1 %1748 }
  0xee   : > { %7641 = vst [vmem:[#allocation31_spill] sm:$0xff] %v6615_v8  ;;  %v6620_v61 = vpop.f32.mrb[3].mxu1  ;;  %5279 = vmatmul.mubr.msk.bf16.gmra.mrb[108].mxu0 %vm462_vm1, %v5697_v20  ;;  %v6636_v20 = vld [vmem:[%s5820_s14 + $0x38] sm:$0xff]   ;;  %7649 = vst [vmem:[#allocation39_spill] sm:$0xff] %v6669_v51  ;;  %v3706_v8 = vshll.u32 %v6693_v42, 16 }
  0xef   : > { %7642 = vst [vmem:[#allocation32_spill] sm:$0xff] %v6620_v61  ;;  %5318 = vmatprep.mubr.msk.bf16.mxu0 %vm462_vm1, %v4026_v41  ;;  %v3674_v41 = vshll.u32 %v5703_v3, 16  ;;  %v3682_v56 = vshll.u32 %v6636_v20, 16  ;;  %v4033_v14 = vrot.slane %v6636_v20, 1  ;;  %v4032_v3 = vsel %vm1433_vm2, %v4029_v34, %v4031_v57  ;;  %v6699_v34 = vld [vmem:[%s5820_s14 + $0x58] sm:$0xff]  }
  0xf0   : > { %5211 = vmatmul.mubr.msk.bf16.gmra.mrb[44].mxu1 %vm462_vm1, %v6298_v7  ;;  %v3708_v47 = vrot.slane %v3706_v8, 1  ;;  %v3730_v8 = vshll.u32 %v6737_v31, 16 }
  0xf1   : > { %5284 = vmatprep.mubr.msk.bf16.mxu1 %vm462_vm1, %v3653_v28  ;;  %v6633_v12 = vpop.f32.mrb[4].mxu0  ;;  %v3676_v63 = vrot.slane %v3674_v41, 1  ;;  %v3686_v41 = vshrl.u32 %v6636_v20, 16 }
  0xf2   : > { %v6642_v27 = vpop.f32.mrb[5].mxu0 }
  0xf3   : > { %v6640_v7 = vpop.f32.mrb[4].mxu1  ;;  %v6646_v11 = vpop.f32.mrb[6].mxu0  ;;  %v3680_v48 = vor.u32 %v3678_v16, %v3676_v63 }
  0xf4   : > { %7645 = vst [vmem:[#allocation35_spill] sm:$0xff] %v6640_v7  ;;  %v6644_v62 = vpop.f32.mrb[5].mxu1  ;;  %v6651_v13 = vpop.f32.mrb[7].mxu0  ;;  %v3694_v7 = vshrl.u32 %v5705_v0, 16 }
  0xf5   : > { %7646 = vst [vmem:[#allocation36_spill] sm:$0xff] %v6644_v62  ;;  %v6649_v28 = vpop.f32.mrb[6].mxu1 }
  0xf6   : > { %7647 = vst [vmem:[#allocation37_spill] sm:$0xff] %v6649_v28  ;;  %v6656_v9 = vpop.f32.mrb[7].mxu1  ;;  %5319 = vmatmul.mubr.msk.bf16.vlgmr.msra.gmra.mrb[112].mxu0 %vm462_vm1, %v4028_v1  ;;  %v3684_v1 = vrot.slane %v3682_v56, 1  ;;  %v3677_v56 = vsel %vm1050_vm3, %v3672_v37, %v3676_v63  ;;  %v6704_v37 = vpop.permute.xlu1 %1758 }
  0xf7   : > { %7648 = vst [vmem:[#allocation38_spill] sm:$0xff] %v6656_v9  ;;  %5322 = vmatprep.mubr.msk.bf16.mxu0 %vm462_vm1, %v4030_v36  ;;  %v6667_v9 = vld [vmem:[%s5820_s14 + $0x48] sm:$0xff]   ;;  %7655 = vst [vmem:[#allocation45_spill] sm:$0xff] %v6704_v37 }
  0xf8   : > { %5285 = vmatmul.mubr.msk.bf16.vlgmr.msra.gmra.mrb[16].mxu1 %vm462_vm1, %v3661_v44  ;;  %v3698_v52 = vshll.u32 %v6667_v9, 16  ;;  %v3685_v61 = vsel %vm1050_vm3, %v3680_v48, %v3684_v1  ;;  %v3688_v63 = vor.u32 %v3686_v41, %v3684_v1  ;;  %v4037_v48 = vrot.slane %v6667_v9, 1 }
  0xf9   : > { %5288 = vmatprep.mubr.msk.bf16.mxu1 %vm462_vm1, %v3669_v59  ;;  %v6671_v28 = vpop.f32.mrb[8].mxu0  ;;  %v3690_v59 = vshll.u32 %v5705_v0, 16 }
  0xfa   : > { %v6677_v36 = vpop.f32.mrb[9].mxu0 }
  0xfb   : > { %v6675_v44 = vpop.f32.mrb[8].mxu1  ;;  %v6681_v17 = vpop.f32.mrb[10].mxu0  ;;  %v3692_v20 = vrot.slane %v3690_v59, 1  ;;  %v3702_v59 = vshrl.u32 %v6667_v9, 16 }
  0xfc   : > { %7651 = vst [vmem:[#allocation41_spill] sm:$0xff] %v6675_v44  ;;  %v6679_v2 = vpop.f32.mrb[9].mxu1  ;;  %v6687_v16 = vpop.f32.mrb[11].mxu0  ;;  %v4034_v44 = vsel %vm1433_vm2, %v4031_v57, %v4033_v14  ;;  %v4035_v57 = vrot.slane %v5705_v0, 1 }
  0xfd   : > { %7652 = vst [vmem:[#allocation42_spill] sm:$0xff] %v6679_v2  ;;  %v6685_v62 = vpop.f32.mrb[10].mxu1  ;;  %v6716_v0 = vpop.permute.xlu0 %1763 }
  0xfe   : > { %7653 = vst [vmem:[#allocation43_spill] sm:$0xff] %v6685_v62  ;;  %v6695_v2 = vpop.f32.mrb[11].mxu1  ;;  %5323 = vmatmul.mubr.msk.bf16.gmra.mrb[116].mxu0 %vm462_vm1, %v4032_v3  ;;  %v3696_v62 = vor.u32 %v3694_v7, %v3692_v20  ;;  %v3714_v3 = vshll.u32 %v6699_v34, 16  ;;  %7656 = vst [vmem:[#allocation46_spill] sm:$0xff] %v6716_v0  ;;  %v4036_v9 = vsel %vm1433_vm2, %v4033_v14, %v4035_v57 }
  0xff   : > { %7654 = vst [vmem:[#allocation44_spill] sm:$0xff] %v6695_v2  ;;  %5326 = vmatprep.mubr.msk.bf16.mxu0 %vm462_vm1, %v4034_v44  ;;  %v3700_v2 = vrot.slane %v3698_v52, 1  ;;  %v6714_v44 = vld [vmem:[%s5820_s14 + $0x60] sm:$0xff]   ;;  %v3710_v52 = vshrl.u32 %v6693_v42, 16  ;;  %v4041_v42 = vrot.slane %v6699_v34, 1 }
 0x100   : > { %5289 = vmatmul.mubr.msk.bf16.gmra.mrb[20].mxu1 %vm462_vm1, %v3677_v56  ;;  %v3693_v56 = vsel %vm1050_vm3, %v3688_v63, %v3692_v20  ;;  %v3716_v5 = vrot.slane %v3714_v3, 1  ;;  %v3718_v20 = vshrl.u32 %v6699_v34, 16  ;;  %v3722_v14 = vshll.u32 %v6714_v44, 16  ;;  %v6743_v63 = vpop.permute.xlu1 %1768 }
 0x101   : > { %5292 = vmatprep.mubr.msk.bf16.mxu1 %vm462_vm1, %v3685_v61  ;;  %v6709_v24 = vpop.f32.mrb[12].mxu0  ;;  %v3701_v40 = vsel %vm1050_vm3, %v3696_v62, %v3700_v2  ;;  %7662 = vst [vmem:[#allocation52_spill] sm:$0xff] %v6743_v63  ;;  %v3712_v62 = vor.u32 %v3710_v52, %v3708_v47  ;;  %v870_v52 = vmul.f32 %v6599_v39, %v6394_v26  ;;  %v3732_v26 = vrot.slane %v3730_v8, 1 }
 0x102   : > { %v6720_v61 = vpop.f32.mrb[13].mxu0  ;;  %v3720_v3 = vor.u32 %v3718_v20, %v3716_v5  ;;  %v4042_v20 = vsel %vm1433_vm2, %v4039_v25, %v4041_v42 }
 0x103   : > { %v6718_v1 = vpop.f32.mrb[12].mxu1  ;;  %v6725_v41 = vpop.f32.mrb[14].mxu0  ;;  %v3717_v34 = vsel %vm1050_vm3, %v3712_v62, %v3716_v5 }
 0x104   : > { %7657 = vst [vmem:[#allocation47_spill] sm:$0xff] %v6718_v1  ;;  %v6723_v7 = vpop.f32.mrb[13].mxu1  ;;  %7659 = vst [vmem:[#allocation49_spill] sm:$0xff] %v6725_v41  ;;  %v6731_v22 = vpop.f32.mrb[15].mxu0  ;;  %v4038_v1 = vsel %vm1433_vm2, %v4035_v57, %v4037_v48  ;;  %v3704_v41 = vor.u32 %v3702_v59, %v3700_v2  ;;  %v4040_v59 = vsel %vm1433_vm2, %v4037_v48, %v4039_v25 }
 0x105   : > { %7658 = vst [vmem:[#allocation48_spill] sm:$0xff] %v6723_v7  ;;  %v6729_v30 = vpop.f32.mrb[14].mxu1  ;;  %v6768_v39 = vpop.permute.xlu1 %1778 }
 0x106   : > { %7660 = vst [vmem:[#allocation50_spill] sm:$0xff] %v6729_v30  ;;  %v6739_v7 = vpop.f32.mrb[15].mxu1  ;;  %5327 = vmatmul.mubr.msk.bf16.gmra.mrb[120].mxu0 %vm462_vm1, %v4036_v9  ;;  %v3709_v57 = vsel %vm1050_vm3, %v3704_v41, %v3708_v47  ;;  %v6753_v9 = vpop.permute.xlu0 %1773  ;;  %v6761_v30 = vld [vmem:[%s5820_s14 + $0x70] sm:$0xff]   ;;  %v868_v47 = vmul.f32 %v6387_v46, %v6608_v35  ;;  %7664 = vst [vmem:[#allocation54_spill] sm:$0xff] %v6768_v39  ;;  %v869_v35 = vmul.f32 %v6403_v45, %v6617_v10  ;;  %v6792_v10 = vld [vmem:[%s5820_s14 + $0x78] sm:$0xff]  }
 0x107   : > { %7661 = vst [vmem:[#allocation51_spill] sm:$0xff] %v6739_v7  ;;  %5330 = vmatprep.mubr.msk.bf16.mxu0 %vm462_vm1, %v4038_v1  ;;  %v3724_v7 = vrot.slane %v3722_v14, 1  ;;  %7663 = vst [vmem:[#allocation53_spill] sm:$0xff] %v6753_v9  ;;  %v3726_v14 = vshrl.u32 %v6714_v44, 16 }
 0x108   : > { %5293 = vmatmul.mubr.msk.bf16.gmra.mrb[24].mxu1 %vm462_vm1, %v3693_v56 }
 0x109   : > { %5296 = vmatprep.mubr.msk.bf16.mxu1 %vm462_vm1, %v3701_v40  ;;  %v5116_v2 = vpop.f32.mrb[16].mxu0  ;;  %v4043_v40 = vrot.slane %v6714_v44, 1  ;;  %v3734_v44 = vshrl.u32 %v6737_v31, 16 }
 0x10a   : > { %v1873_v1 = vmul.f32 %v5116_v2, %v6587_v43  ;;  %v1552_v56 = vpop.f32.mrb[17].mxu0  ;;  %v871_v2 = vmul.f32 %v6613_v4, %v6417_v54  ;;  %v3738_v4 = vshll.u32 %v6761_v30, 16  ;;  %v6789_v8 = vpop.permute.xlu0 %1783 }
 0x10b   : > { %v1871_v48 = vmul.f32 %v6573_v29, %v1552_v56  ;;  %v5117_v41 = vpop.f32.mrb[18].mxu0  ;;  %7665 = vst [vmem:[#allocation55_spill] sm:$0xff] %v6789_v8 }
 0x10c   : > { %v6772_v5 = vadd.f32 %v1873_v1, %v870_v52  ;;  %v1874_v62 = vmul.f32 %v5117_v41, %v6597_v21  ;;  %v1555_v43 = vpop.f32.mrb[19].mxu0  ;;  %v3736_v41 = vor.u32 %v3734_v44, %v3732_v26 }
 0x10d   : > { %v6777_v56 = vadd.f32 %v1871_v48, %v868_v47  ;;  %v1872_v25 = vmul.f32 %v6584_v50, %v1555_v43  ;;  %v4045_v43 = vrot.slane %v6737_v31, 1  ;;  %v3725_v47 = vsel %vm1050_vm3, %v3720_v3, %v3724_v7 }
 0x10e   : > { %v6781_v29 = vadd.f32 %v1874_v62, %v871_v2  ;;  %5331 = vmatmul.mubr.msk.bf16.gmra.mrb[124].mxu0 %vm462_vm1, %v4040_v59  ;;  %v4044_v59 = vsel %vm1433_vm2, %v4041_v42, %v4043_v40  ;;  %v3728_v48 = vor.u32 %v3726_v14, %v3724_v7  ;;  %v6798_v2 = vpop.permute.xlu1 %1788  ;;  %v872_v31 = vmul.f32 %v6420_v55, %v6642_v27 }
 0x10f   : > { %v6785_v52 = vadd.f32 %v1872_v25, %v869_v35  ;;  %5334 = vmatprep.mubr.msk.bf16.mxu0 %vm462_vm1, %v4042_v20  ;;  %7666 = vst [vmem:[#allocation56_spill] sm:$0xff] %v6798_v2  ;;  %v3740_v35 = vrot.slane %v3738_v4, 1  ;;  %v3742_v7 = vshrl.u32 %v6761_v30, 16  ;;  %v3746_v14 = vshll.u32 %v6792_v10, 16 }
 0x110   : > { %5297 = vmatmul.mubr.msk.bf16.gmra.mrb[28].mxu1 %vm462_vm1, %v3709_v57  ;;  %v874_v57 = vmul.f32 %v6633_v12, %v6435_v6  ;;  %v875_v12 = vmul.f32 %v6646_v11, %v6441_v18  ;;  %v873_v27 = vmul.f32 %v6428_v60, %v6651_v13 }
 0x111   : > { %5300 = vmatprep.mubr.msk.bf16.mxu1 %vm462_vm1, %v3717_v34  ;;  %v5120_v1 = vpop.f32.mrb[20].mxu0  ;;  %v4047_v34 = vrot.slane %v6761_v30, 1  ;;  %v3744_v13 = vor.u32 %v3742_v7, %v3740_v35 }
 0x112   : > { %v1877_v20 = vmul.f32 %v5120_v1, %v6638_v15  ;;  %v1568_v62 = vpop.f32.mrb[21].mxu0  ;;  %v4046_v1 = vsel %vm1433_vm2, %v4043_v40, %v4045_v43  ;;  %v6821_v15 = vpop.permute.xlu0 %1793  ;;  %v3748_v40 = vrot.slane %v3746_v14, 1  ;;  %v3750_v14 = vshrl.u32 %v6792_v10, 16 }
 0x113   : > { %v1875_v3 = vmul.f32 %v6604_v38, %v1568_v62  ;;  %v5121_v42 = vpop.f32.mrb[22].mxu0  ;;  %v3733_v38 = vsel %vm1050_vm3, %v3728_v48, %v3732_v26  ;;  %7667 = vst [vmem:[#allocation57_spill] sm:$0xff] %v6821_v15  ;;  %v6838_v26 = vld [vmem:[%s5820_s14 + $0x88] sm:$0xff]  }
 0x114   : > { %v6811_v25 = vadd.f32 %v1877_v20, %v874_v57  ;;  %v1878_v44 = vmul.f32 %v5121_v42, %v6669_v51  ;;  %v1571_v4 = vpop.f32.mrb[23].mxu0  ;;  %v6827_v57 = vld [vmem:[%s5820_s14 + $0x80] sm:$0xff]   ;;  %v4048_v42 = vsel %vm1433_vm2, %v4045_v43, %v4047_v34 }
 0x115   : > { %v6817_v62 = vadd.f32 %v1875_v3, %v872_v31  ;;  %v1876_v30 = vmul.f32 %v6631_v58, %v1571_v4  ;;  %v4049_v31 = vrot.slane %v6792_v10, 1  ;;  %v6834_v3 = vpop.permute.xlu1 %1798 }
 0x116   : > { %v6823_v11 = vadd.f32 %v1878_v44, %v875_v12  ;;  %5335 = vmatmul.mubr.msk.bf16.gmra.mrb[128].mxu0 %vm462_vm1, %v4044_v59  ;;  %7668 = vst [vmem:[#allocation58_spill] sm:$0xff] %v6834_v3  ;;  %v3741_v59 = vsel %vm1050_vm3, %v3736_v41, %v3740_v35  ;;  %v3754_v44 = vshll.u32 %v6827_v57, 16  ;;  %v3749_v41 = vsel %vm1050_vm3, %v3744_v13, %v3748_v40  ;;  %v6852_v35 = vpop.permute.xlu0 %1803 }
 0x117   : > { %v6829_v20 = vadd.f32 %v1876_v30, %v873_v27  ;;  %5338 = vmatprep.mubr.msk.bf16.mxu0 %vm462_vm1, %v4046_v1  ;;  %v4050_v43 = vsel %vm1433_vm2, %v4047_v34, %v4049_v31  ;;  %7669 = vst [vmem:[#allocation59_spill] sm:$0xff] %v6852_v35 }
 0x118   : > { %5301 = vmatmul.mubr.msk.bf16.gmra.mrb[32].mxu1 %vm462_vm1, %v3725_v47  ;;  %v878_v47 = vmul.f32 %v6671_v28, %v6458_v49  ;;  %v879_v28 = vmul.f32 %v6681_v17, %v6467_v53 }
 0x119   : > { %5304 = vmatprep.mubr.msk.bf16.mxu1 %vm462_vm1, %v3733_v38  ;;  %v5124_v48 = vpop.f32.mrb[24].mxu0  ;;  %v876_v38 = vmul.f32 %v6445_v19, %v6677_v36  ;;  %v3762_v36 = vshll.u32 %v6838_v26, 16  ;;  %v6865_v13 = vpop.permute.xlu1 %1808 }
 0x11a   : > { %v1881_v12 = vmul.f32 %v5124_v48, %v6716_v0  ;;  %v1584_v7 = vpop.f32.mrb[25].mxu0  ;;  %v877_v48 = vmul.f32 %v6451_v32, %v6687_v16  ;;  %7670 = vst [vmem:[#allocation60_spill] sm:$0xff] %v6865_v13  ;;  %v5715_v16 = vld [vmem:[%s5820_s14 + $0x90] ss:$0 sps:$4 sm:$0x11]  }
 0x11b   : > { %v1879_v4 = vmul.f32 %v6673_v33, %v1584_v7  ;;  %v5125_v1 = vpop.f32.mrb[26].mxu0  ;;  %v3758_v33 = vshrl.u32 %v6827_v57, 16 }
 0x11c   : > { %v6856_v27 = vadd.f32 %v1881_v12, %v878_v47  ;;  %v1882_v10 = vmul.f32 %v5125_v1, %v6743_v63  ;;  %v1587_v30 = vpop.f32.mrb[27].mxu0  ;;  %v3752_v47 = vor.u32 %v3750_v14, %v3748_v40  ;;  %v3756_v12 = vrot.slane %v3754_v44, 1 }
 0x11d   : > { %v6862_v7 = vadd.f32 %v1879_v4, %v876_v38  ;;  %v1880_v34 = vmul.f32 %v6704_v37, %v1587_v30  ;;  %v4051_v1 = vrot.slane %v6827_v57, 1  ;;  %v4053_v38 = vrot.slane %v6838_v26, 1  ;;  %v7674_v37 = vld [vmem:[#allocation7_spill] sm:$0xff] }
 0x11e   : > { %v6868_v17 = vadd.f32 %v1882_v10, %v879_v28  ;;  %5339 = vmatmul.mubr.msk.bf16.gmra.mrb[132].mxu0 %vm462_vm1, %v4048_v42  ;;  %v6879_v28 = vpop.permute.xlu0 %1813  ;;  %v3760_v10 = vor.u32 %v3758_v33, %v3756_v12  ;;  %v3764_v42 = vrot.slane %v3762_v36, 1  ;;  %v882_v40 = vmul.f32 %v6709_v24, %v6485_v23  ;;  %v6890_v36 = vpop.permute.xlu1 %1818  ;;  %v7675_v24 = vld [vmem:[#allocation49_spill] sm:$0xff] }
 0x11f   : > { %v6872_v63 = vadd.f32 %v1880_v34, %v877_v48  ;;  %5342 = vmatprep.mubr.msk.bf16.mxu0 %vm462_vm1, %v4050_v43  ;;  %7671 = vst [vmem:[#allocation61_spill] sm:$0xff] %v6879_v28  ;;  %v4052_v44 = vsel %vm1433_vm2, %v4049_v31, %v4051_v1  ;;  %v7672_v43 = vld [vmem:[#allocation4_spill] sm:$0xff]  ;;  %v3766_v34 = vshrl.u32 %v6838_v26, 16  ;;  %v3770_v33 = vshll.u32 %v5715_v16, 16  ;;  %7673 = vst [vmem:[#allocation62_spill] sm:$0xff] %v6890_v36 }
 0x120   : > { %5305 = vmatmul.mubr.msk.bf16.gmra.mrb[36].mxu1 %vm462_vm1, %v3741_v59  ;;  %v3757_v59 = vsel %vm1050_vm3, %v3752_v47, %v3756_v12  ;;  %v883_v23 = vmul.f32 %v7675_v24, %v7674_v37  ;;  %v4054_v31 = vsel %vm1433_vm2, %v4051_v1, %v4053_v38  ;;  %v4055_v1 = vrot.slane %v5715_v16, 1 }
 0x121   : > { %5308 = vmatprep.mubr.msk.bf16.mxu1 %vm462_vm1, %v3749_v41  ;;  %v5128_v4 = vpop.f32.mrb[28].mxu0  ;;  %v880_v41 = vmul.f32 %v7672_v43, %v6720_v61  ;;  %v7676_v61 = vld [vmem:[#allocation5_spill] sm:$0xff] }
 0x122   : > { %v1885_v57 = vmul.f32 %v5128_v4, %v6789_v8  ;;  %v1600_v14 = vpop.f32.mrb[29].mxu0  ;;  %v881_v8 = vmul.f32 %v7676_v61, %v6731_v22  ;;  %v3768_v22 = vor.u32 %v3766_v34, %v3764_v42 }
 0x123   : > { %v1883_v30 = vmul.f32 %v6753_v9, %v1600_v14  ;;  %v5129_v48 = vpop.f32.mrb[30].mxu0  ;;  %v3765_v9 = vsel %vm1050_vm3, %v3760_v10, %v3764_v42  ;;  %v7681_v10 = vld [vmem:[#allocation29_spill] sm:$0xff]  ;;  %v7685_v42 = vld [vmem:[#allocation31_spill] sm:$0xff] }
 0x124   : > { %v6894_v4 = vadd.f32 %v1885_v57, %v882_v40  ;;  %v1886_v47 = vmul.f32 %v5129_v48, %v6798_v2  ;;  %v1603_v12 = vpop.f32.mrb[31].mxu0  ;;  %v6911_v57 = vpop.permute.xlu0 %1823 }
 0x125   : > { %v6900_v14 = vadd.f32 %v1883_v30, %v880_v41  ;;  %v1884_v26 = vmul.f32 %v6768_v39, %v1603_v12  ;;  %7678 = vst [vmem:[#allocation49_spill] sm:$0xff] %v6911_v57  ;;  %v3772_v41 = vrot.slane %v3770_v33, 1  ;;  %v6914_v48 = vpop.permute.xlu1 %1828 }
 0x126   : > { %v6904_v43 = vadd.f32 %v1886_v47, %v883_v23  ;;  %5343 = vmatmul.mubr.msk.bf16.gmra.mrb[136].mxu0 %vm462_vm1, %v4052_v44  ;;  %7679 = vst [vmem:[#allocation5_spill] sm:$0xff] %v6914_v48  ;;  %v7680_v23 = vld [vmem:[#allocation10_spill] sm:$0xff] }
 0x127   : > { %v6907_v40 = vadd.f32 %v1884_v26, %v881_v8  ;;  %5346 = vmatprep.mubr.msk.bf16.mxu0 %vm462_vm1, %v4054_v31  ;;  %v886_v24 = vmul.f32 %v7681_v10, %v7680_v23  ;;  %v7682_v47 = vld [vmem:[#allocation30_spill] sm:$0xff]  ;;  %v4056_v26 = vsel %vm1433_vm2, %v4053_v38, %v4055_v1  ;;  %v3773_v10 = vsel %vm1050_vm3, %v3768_v22, %v3772_v41 }
 0x128   : > { %5309 = vmatmul.mubr.msk.bf16.gmra.mrb[40].mxu1 %vm462_vm1, %v3757_v59  ;;  %v7683_v59 = vld [vmem:[#allocation8_spill] sm:$0xff]  ;;  %v7692_v41 = vld [vmem:[#allocation14_spill] sm:$0xff] }
 0x129   : > { %7677 = vst [vmem:[#allocation7_spill] sm:$0xff] %v6907_v40  ;;  %5312 = vmatprep.mubr.msk.bf16.mxu1 %vm462_vm1, %v3765_v9  ;;  %v5132_v30 = vpop.f32.mrb[32].mxu0  ;;  %v884_v12 = vmul.f32 %v7683_v59, %v7682_v47  ;;  %v7684_v9 = vld [vmem:[#allocation11_spill] sm:$0xff]  ;;  %v6934_v47 = vpop.permute.xlu0 %1833 }
 0x12a   : > { %v1889_v8 = vmul.f32 %v5132_v30, %v6852_v35  ;;  %v1616_v44 = vpop.f32.mrb[33].mxu0  ;;  %v887_v34 = vmul.f32 %v7685_v42, %v7684_v9  ;;  %v7686_v30 = vld [vmem:[#allocation32_spill] sm:$0xff]  ;;  %v7687_v35 = vld [vmem:[#allocation9_spill] sm:$0xff]  ;;  %7688 = vst [vmem:[#allocation29_spill] sm:$0xff] %v6934_v47 }
 0x12b   : > { %v1887_v16 = vmul.f32 %v6821_v15, %v1616_v44  ;;  %v5133_v31 = vpop.f32.mrb[34].mxu0  ;;  %v885_v23 = vmul.f32 %v7687_v35, %v7686_v30  ;;  %v7695_v42 = vld [vmem:[#allocation12_spill] sm:$0xff] }
 0x12c   : > { %v6925_v33 = vadd.f32 %v1889_v8, %v886_v24  ;;  %v1890_v39 = vmul.f32 %v5133_v31, %v6865_v13  ;;  %v1619_v40 = vpop.f32.mrb[35].mxu0  ;;  %v6942_v24 = vpop.permute.xlu1 %1838  ;;  %v7693_v8 = vld [vmem:[#allocation35_spill] sm:$0xff] }
 0x12d   : > { %v6931_v2 = vadd.f32 %v1887_v16, %v884_v12  ;;  %v1888_v44 = vmul.f32 %v6834_v3, %v1619_v40  ;;  %7691 = vst [vmem:[#allocation31_spill] sm:$0xff] %v6942_v24  ;;  %v890_v31 = vmul.f32 %v7693_v8, %v7692_v41  ;;  %v7694_v40 = vld [vmem:[#allocation36_spill] sm:$0xff]  ;;  %v7699_v8 = vld [vmem:[#allocation38_spill] sm:$0xff]  ;;  %v7700_v41 = vld [vmem:[#allocation13_spill] sm:$0xff] }
 0x12e   : > { %v6936_v38 = vadd.f32 %v1890_v39, %v887_v34  ;;  %5347 = vmatmul.mubr.msk.bf16.gmra.mrb[140].mxu0 %vm462_vm1, %v4056_v26  ;;  %v888_v30 = vmul.f32 %v7695_v42, %v7694_v40  ;;  %v6950_v26 = vpop.permute.xlu0 %1843 }
 0x12f   : > { %v6939_v1 = vadd.f32 %v1888_v44, %v885_v23  ;;  %7696 = vst [vmem:[#allocation32_spill] sm:$0xff] %v6950_v26  ;;  %v7697_v23 = vld [vmem:[#allocation15_spill] sm:$0xff]  ;;  %v7698_v44 = vld [vmem:[#allocation37_spill] sm:$0xff] }
 0x130   : > { %7689 = vst [vmem:[#allocation30_spill] sm:$0xff] %v6936_v38  ;;  %5313 = vmatmul.mubr.msk.bf16.gmra.mrb[44].mxu1 %vm462_vm1, %v3773_v10  ;;  %v891_v10 = vmul.f32 %v7698_v44, %v7697_v23  ;;  %v6962_v42 = vpop.permute.xlu1 %1848 }
 0x131   : > { %7690 = vst [vmem:[#allocation8_spill] sm:$0xff] %v6939_v1  ;;  %v5136_v22 = vpop.f32.mrb[36].mxu0  ;;  %7702 = vst [vmem:[#allocation36_spill] sm:$0xff] %v6962_v42 }
 0x132   : > { %v1893_v12 = vmul.f32 %v5136_v22, %v6911_v57  ;;  %v1632_v16 = vpop.f32.mrb[37].mxu0  ;;  %v889_v22 = vmul.f32 %v7700_v41, %v7699_v8  ;;  %v6968_v44 = vpop.permute.xlu0 %1853  ;;  %v7708_v8 = vld [vmem:[#allocation42_spill] sm:$0xff] }
 0x133   : > { %v1891_v39 = vmul.f32 %v6879_v28, %v1632_v16  ;;  %v5137_v34 = vpop.f32.mrb[38].mxu0  ;;  %7705 = vst [vmem:[#allocation63_spill] sm:$0xff] %v6968_v44 }
 0x134   : > { %v6954_v3 = vadd.f32 %v1893_v12, %v890_v31  ;;  %v1894_v1 = vmul.f32 %v5137_v34, %v6914_v48  ;;  %v1635_v13 = vpop.f32.mrb[39].mxu0  ;;  %v7706_v31 = vld [vmem:[#allocation18_spill] sm:$0xff]  ;;  %v7707_v12 = vld [vmem:[#allocation41_spill] sm:$0xff]  ;;  %v6976_v41 = vpop.permute.xlu1 %1858 }
 0x135   : > { %v6959_v57 = vadd.f32 %v1891_v39, %v888_v30  ;;  %v1892_v40 = vmul.f32 %v6890_v36, %v1635_v13  ;;  %v894_v34 = vmul.f32 %v7707_v12, %v7706_v31  ;;  %v7709_v30 = vld [vmem:[#allocation16_spill] sm:$0xff]  ;;  %7710 = vst [vmem:[#allocation41_spill] sm:$0xff] %v6976_v41  ;;  %v7714_v31 = vld [vmem:[#allocation17_spill] sm:$0xff] }
 0x136   : > { %v6964_v16 = vadd.f32 %v1894_v1, %v891_v10  ;;  %v892_v39 = vmul.f32 %v7709_v30, %v7708_v8  ;;  %v7711_v1 = vld [vmem:[#allocation19_spill] sm:$0xff]  ;;  %v7713_v12 = vld [vmem:[#allocation44_spill] sm:$0xff] }
 0x137   : > { %7701 = vst [vmem:[#allocation35_spill] sm:$0xff] %v6959_v57  ;;  %v6966_v28 = vadd.f32 %v1892_v40, %v889_v22  ;;  %v7712_v10 = vld [vmem:[#allocation43_spill] sm:$0xff] }
 0x138   : > { %7703 = vst [vmem:[#allocation37_spill] sm:$0xff] %v6964_v16  ;;  %v895_v22 = vmul.f32 %v7712_v10, %v7711_v1  ;;  %v6994_v10 = vpop.permute.xlu1 %1868 }
 0x139   : > { %7704 = vst [vmem:[#allocation38_spill] sm:$0xff] %v6966_v28  ;;  %v5140_v38 = vpop.f32.mrb[40].mxu0  ;;  %7719 = vst [vmem:[#allocation65_spill] sm:$0xff] %v6994_v10 }
 0x13a   : > { %v1897_v48 = vmul.f32 %v5140_v38, %v6950_v26  ;;  %v1648_v23 = vpop.f32.mrb[41].mxu0  ;;  %v893_v38 = vmul.f32 %v7714_v31, %v7713_v12  ;;  %v7722_v12 = vld [vmem:[#allocation48_spill] sm:$0xff]  ;;  %v7727_v31 = vld [vmem:[#allocation51_spill] sm:$0xff] }
 0x13b   : > { %v1895_v13 = vmul.f32 %v6934_v47, %v1648_v23  ;;  %v5141_v36 = vpop.f32.mrb[42].mxu0  ;;  %v6992_v47 = vpop.permute.xlu0 %1863 }
 0x13c   : > { %v6980_v40 = vadd.f32 %v1897_v48, %v894_v34  ;;  %v1898_v28 = vmul.f32 %v5141_v36, %v6962_v42  ;;  %v1651_v16 = vpop.f32.mrb[43].mxu0  ;;  %7718 = vst [vmem:[#allocation64_spill] sm:$0xff] %v6992_v47  ;;  %v7720_v48 = vld [vmem:[#allocation22_spill] sm:$0xff]  ;;  %v7721_v34 = vld [vmem:[#allocation47_spill] sm:$0xff] }
 0x13d   : > { %v6985_v26 = vadd.f32 %v1895_v13, %v892_v39  ;;  %v1896_v8 = vmul.f32 %v6942_v24, %v1651_v16  ;;  %v898_v36 = vmul.f32 %v7721_v34, %v7720_v48  ;;  %v7723_v39 = vld [vmem:[#allocation20_spill] sm:$0xff] }
 0x13e   : > { %v6988_v30 = vadd.f32 %v1898_v28, %v895_v22  ;;  %v896_v13 = vmul.f32 %v7723_v39, %v7722_v12  ;;  %v7724_v22 = vld [vmem:[#allocation23_spill] sm:$0xff] }
 0x13f   : > { %7715 = vst [vmem:[#allocation42_spill] sm:$0xff] %v6985_v26  ;;  %v6990_v23 = vadd.f32 %v1896_v8, %v893_v38  ;;  %v7725_v38 = vld [vmem:[#allocation50_spill] sm:$0xff]  ;;  %v7728_v26 = vld [vmem:[#allocation21_spill] sm:$0xff] }
 0x140   : > { %7716 = vst [vmem:[#allocation43_spill] sm:$0xff] %v6988_v30  ;;  %v899_v8 = vmul.f32 %v7725_v38, %v7724_v22  ;;  %v897_v34 = vmul.f32 %v7728_v26, %v7727_v31  ;;  %v7729_v38 = vld [vmem:[#allocation3_spill] sm:$0xff] }
 0x141   : > { %7717 = vst [vmem:[#allocation44_spill] sm:$0xff] %v6990_v23  ;;  %v5144_v57 = vpop.f32.mrb[44].mxu0 }
 0x142   : > { %v1901_v42 = vmul.f32 %v5144_v57, %v6992_v47  ;;  %v1664_v1 = vpop.f32.mrb[45].mxu0 }
 0x143   : > { %v1899_v16 = vmul.f32 %v6968_v44, %v1664_v1  ;;  %v5145_v28 = vpop.f32.mrb[46].mxu0 }
 0x144   : > { %v7004_v24 = vadd.f32 %v1901_v42, %v898_v36  ;;  %v1902_v23 = vmul.f32 %v5145_v28, %v6994_v10  ;;  %v1667_v30 = vpop.f32.mrb[47].mxu0 }
 0x145   : > { %v7009_v48 = vadd.f32 %v1899_v16, %v896_v13  ;;  %v1900_v57 = vmul.f32 %v6976_v41, %v1667_v30  ;;  %v7730_v13 = vld [vmem:[#allocation26_spill] sm:$0xff] }
 0x146   : > { %7726 = vst [vmem:[#allocation47_spill] sm:$0xff] %v7004_v24  ;;  %v7012_v47 = vadd.f32 %v1902_v23, %v899_v8 }
 0x147   : > { %v7014_v12 = vadd.f32 %v1900_v57, %v897_v34  ;;  %v7731_v34 = vld [vmem:[#allocation24_spill] sm:$0xff] }
 0x149   : > { %v5218_v1 = vpop.f32.mrb[48].mxu0 }
 0x14a   : > { %v2943_v39 = vpop.f32.mrb[49].mxu0  ;;  %v3072_v16 = vmul.f32 %v5218_v1, %v7730_v13 }
 0x14b   : > { %v5150_v44 = vpop.f32.mrb[48].mxu1  ;;  %v5219_v22 = vpop.f32.mrb[50].mxu0  ;;  %v3070_v57 = vmul.f32 %v2943_v39, %v7731_v34 }
 0x14c   : > { %v2263_v42 = vmul.f32 %v5150_v44, %v7729_v38  ;;  %v2134_v36 = vpop.f32.mrb[49].mxu1  ;;  %v2946_v24 = vpop.f32.mrb[51].mxu0 }
 0x14d   : > { %v2261_v28 = vmul.f32 %v2134_v36, %v6387_v46  ;;  %v5151_v10 = vpop.f32.mrb[50].mxu1  ;;  %v3073_v36 = vmul.f32 %v5219_v22, %v6597_v21  ;;  %v3071_v1 = vmul.f32 %v2946_v24, %v6584_v50 }
 0x14e   : > { %v5353_v31 = vadd.f32 %v6772_v5, %v2263_v42  ;;  %v2264_v30 = vmul.f32 %v5151_v10, %v6417_v54  ;;  %v2137_v23 = vpop.f32.mrb[51].mxu1 }
 0x14f   : > { %v5358_v8 = vadd.f32 %v6777_v56, %v2261_v28  ;;  %v2262_v41 = vmul.f32 %v2137_v23, %v6403_v45 }
 0x150   : > { %v7024_v44 = vadd.f32 %v5353_v31, %v3072_v16  ;;  %v5363_v38 = vadd.f32 %v6781_v29, %v2264_v30 }
 0x151   : > { %v7028_v46 = vadd.f32 %v5358_v8, %v3070_v57  ;;  %v5368_v5 = vadd.f32 %v6785_v52, %v2262_v41  ;;  %v5222_v42 = vpop.f32.mrb[52].mxu0  ;;  %v7732_v52 = vld [vmem:[#allocation34_spill] sm:$0xff] }
 0x152   : > { %v7032_v10 = vadd.f32 %v5363_v38, %v3073_v36  ;;  %v2959_v28 = vpop.f32.mrb[53].mxu0  ;;  %v3076_v41 = vmul.f32 %v5222_v42, %v7732_v52  ;;  %v7733_v36 = vld [vmem:[#allocation28_spill] sm:$0xff] }
 0x153   : > { %v7034_v56 = vadd.f32 %v5368_v5, %v3071_v1  ;;  %v5154_v39 = vpop.f32.mrb[52].mxu1  ;;  %v5223_v23 = vpop.f32.mrb[54].mxu0  ;;  %v3074_v5 = vmul.f32 %v2959_v28, %v7733_v36 }
 0x154   : > { %v2267_v31 = vmul.f32 %v5154_v39, %v6435_v6  ;;  %v2150_v16 = vpop.f32.mrb[53].mxu1  ;;  %v2962_v30 = vpop.f32.mrb[55].mxu0 }
 0x155   : > { %v2265_v29 = vmul.f32 %v2150_v16, %v6420_v55  ;;  %v5155_v22 = vpop.f32.mrb[54].mxu1  ;;  %v3077_v16 = vmul.f32 %v5223_v23, %v6669_v51  ;;  %v3075_v42 = vmul.f32 %v2962_v30, %v6631_v58 }
 0x156   : > { %v5373_v8 = vadd.f32 %v6811_v25, %v2267_v31  ;;  %v2268_v24 = vmul.f32 %v5155_v22, %v6441_v18  ;;  %v2153_v38 = vpop.f32.mrb[55].mxu1 }
 0x157   : > { %v5378_v57 = vadd.f32 %v6817_v62, %v2265_v29  ;;  %v2266_v1 = vmul.f32 %v2153_v38, %v6428_v60 }
 0x158   : > { %v7044_v39 = vadd.f32 %v5373_v8, %v3076_v41  ;;  %v5383_v50 = vadd.f32 %v6823_v11, %v2268_v24 }
 0x159   : > { %v7048_v21 = vadd.f32 %v5378_v57, %v3074_v5  ;;  %v5388_v25 = vadd.f32 %v6829_v20, %v2266_v1  ;;  %v5226_v22 = vpop.f32.mrb[56].mxu0  ;;  %v7734_v1 = vld [vmem:[#allocation40_spill] sm:$0xff] }
 0x15a   : > { %v7052_v31 = vadd.f32 %v5383_v50, %v3077_v16  ;;  %v2975_v29 = vpop.f32.mrb[57].mxu0  ;;  %v3080_v20 = vmul.f32 %v5226_v22, %v6716_v0  ;;  %v7736_v22 = vld [vmem:[#allocation45_spill] sm:$0xff] }
 0x15b   : > { %v7054_v62 = vadd.f32 %v5388_v25, %v3075_v42  ;;  %v5158_v28 = vpop.f32.mrb[56].mxu1  ;;  %v5227_v38 = vpop.f32.mrb[58].mxu0  ;;  %v3078_v16 = vmul.f32 %v2975_v29, %v7734_v1 }
 0x15c   : > { %v2271_v8 = vmul.f32 %v5158_v28, %v6458_v49  ;;  %v2166_v41 = vpop.f32.mrb[57].mxu1  ;;  %v2978_v24 = vpop.f32.mrb[59].mxu0 }
 0x15d   : > { %v2269_v11 = vmul.f32 %v2166_v41, %v6445_v19  ;;  %v5159_v23 = vpop.f32.mrb[58].mxu1  ;;  %v7735_v41 = vld [vmem:[#allocation52_spill] sm:$0xff] }
 0x15e   : > { %v5393_v57 = vadd.f32 %v6856_v27, %v2271_v8  ;;  %v2272_v50 = vmul.f32 %v5159_v23, %v6467_v53  ;;  %v2169_v30 = vpop.f32.mrb[59].mxu1  ;;  %v3081_v58 = vmul.f32 %v5227_v38, %v7735_v41  ;;  %v3079_v8 = vmul.f32 %v2978_v24, %v7736_v22 }
 0x15f   : > { %v5398_v5 = vadd.f32 %v6862_v7, %v2269_v11  ;;  %v2270_v25 = vmul.f32 %v2169_v30, %v6451_v32  ;;  %v7737_v30 = vld [vmem:[#allocation6_spill] sm:$0xff] }
 0x160   : > { %v7064_v42 = vadd.f32 %v5393_v57, %v3080_v20  ;;  %v5403_v28 = vadd.f32 %v6868_v17, %v2272_v50  ;;  %v7738_v17 = vld [vmem:[#allocation4_spill] sm:$0xff] }
 0x161   : > { %v7068_v51 = vadd.f32 %v5398_v5, %v3078_v16  ;;  %v5408_v27 = vadd.f32 %v6872_v63, %v2270_v25  ;;  %v5230_v0 = vpop.f32.mrb[60].mxu0  ;;  %v7739_v63 = vld [vmem:[#allocation55_spill] sm:$0xff] }
 0x162   : > { %v7072_v23 = vadd.f32 %v5403_v28, %v3081_v58  ;;  %v2991_v11 = vpop.f32.mrb[61].mxu0  ;;  %v3084_v25 = vmul.f32 %v5230_v0, %v7739_v63  ;;  %v7743_v0 = vld [vmem:[#allocation54_spill] sm:$0xff] }
 0x163   : > { %v7074_v7 = vadd.f32 %v5408_v27, %v3079_v8  ;;  %v5162_v29 = vpop.f32.mrb[60].mxu1  ;;  %v5231_v1 = vpop.f32.mrb[62].mxu0  ;;  %v7740_v27 = vld [vmem:[#allocation53_spill] sm:$0xff] }
 0x164   : > { %v2275_v57 = vmul.f32 %v5162_v29, %v7737_v30  ;;  %v2182_v20 = vpop.f32.mrb[61].mxu1  ;;  %v2994_v5 = vpop.f32.mrb[63].mxu0  ;;  %v3082_v8 = vmul.f32 %v2991_v11, %v7740_v27 }
 0x165   : > { %v2273_v50 = vmul.f32 %v2182_v20, %v7738_v17  ;;  %v5163_v38 = vpop.f32.mrb[62].mxu1  ;;  %v7741_v20 = vld [vmem:[#allocation56_spill] sm:$0xff]  ;;  %v3083_v63 = vmul.f32 %v2994_v5, %v7743_v0 }
 0x166   : > { %v5413_v16 = vadd.f32 %v6894_v4, %v2275_v57  ;;  %v2276_v58 = vmul.f32 %v5163_v38, %v7674_v37  ;;  %v2185_v24 = vpop.f32.mrb[63].mxu1  ;;  %v3085_v36 = vmul.f32 %v5231_v1, %v7741_v20  ;;  %v7742_v4 = vld [vmem:[#allocation7_spill] sm:$0xff] }
 0x167   : > { %v5418_v28 = vadd.f32 %v6900_v14, %v2273_v50  ;;  %v2274_v22 = vmul.f32 %v2185_v24, %v7676_v61  ;;  %v7744_v24 = vld [vmem:[#allocation10_spill] sm:$0xff] }
 0x168   : > { %v7084_v29 = vadd.f32 %v5413_v16, %v3084_v25  ;;  %v5423_v41 = vadd.f32 %v6904_v43, %v2276_v58 }
 0x169   : > { %v7088_v52 = vadd.f32 %v5418_v28, %v3082_v8  ;;  %v5428_v57 = vadd.f32 %v7742_v4, %v2274_v22  ;;  %v5234_v34 = vpop.f32.mrb[64].mxu0  ;;  %v7745_v22 = vld [vmem:[#allocation59_spill] sm:$0xff] }
 0x16a   : > { %v7092_v38 = vadd.f32 %v5423_v41, %v3085_v36  ;;  %v3007_v50 = vpop.f32.mrb[65].mxu0  ;;  %v3088_v8 = vmul.f32 %v5234_v34, %v7745_v22  ;;  %v7750_v34 = vld [vmem:[#allocation58_spill] sm:$0xff] }
 0x16b   : > { %v7094_v14 = vadd.f32 %v5428_v57, %v3083_v63  ;;  %v5166_v11 = vpop.f32.mrb[64].mxu1  ;;  %v5235_v27 = vpop.f32.mrb[66].mxu0  ;;  %v3086_v63 = vmul.f32 %v3007_v50, %v6821_v15 }
 0x16c   : > { %v2279_v16 = vmul.f32 %v5166_v11, %v7744_v24  ;;  %v2198_v25 = vpop.f32.mrb[65].mxu1  ;;  %v3010_v58 = vpop.f32.mrb[67].mxu0  ;;  %v7746_v11 = vld [vmem:[#allocation30_spill] sm:$0xff] }
 0x16d   : > { %v2277_v43 = vmul.f32 %v2198_v25, %v7683_v59  ;;  %v5167_v1 = vpop.f32.mrb[66].mxu1  ;;  %v7747_v25 = vld [vmem:[#allocation60_spill] sm:$0xff]  ;;  %v3087_v22 = vmul.f32 %v3010_v58, %v7750_v34  ;;  %v7756_v58 = vld [vmem:[#allocation15_spill] sm:$0xff] }
 0x16e   : > { %v5433_v28 = vadd.f32 %v6925_v33, %v2279_v16  ;;  %v2280_v36 = vmul.f32 %v5167_v1, %v7684_v9  ;;  %v2201_v41 = vpop.f32.mrb[67].mxu1  ;;  %v3089_v20 = vmul.f32 %v5235_v27, %v7747_v25  ;;  %v7749_v33 = vld [vmem:[#allocation8_spill] sm:$0xff]  ;;  %v7757_v34 = vld [vmem:[#allocation35_spill] sm:$0xff] }
 0x16f   : > { %v5438_v5 = vadd.f32 %v6931_v2, %v2277_v43  ;;  %v2278_v4 = vmul.f32 %v2201_v41, %v7687_v35  ;;  %v7753_v41 = vld [vmem:[#allocation14_spill] sm:$0xff] }
 0x170   : > { %v7104_v57 = vadd.f32 %v5433_v28, %v3088_v8  ;;  %v5443_v0 = vadd.f32 %v7746_v11, %v2280_v36  ;;  %v7754_v36 = vld [vmem:[#allocation12_spill] sm:$0xff] }
 0x171   : > { %v7108_v13 = vadd.f32 %v5438_v5, %v3086_v63  ;;  %v5448_v16 = vadd.f32 %v7749_v33, %v2278_v4  ;;  %v5238_v9 = vpop.f32.mrb[68].mxu0  ;;  %v7755_v4 = vld [vmem:[#allocation49_spill] sm:$0xff] }
 0x172   : > { %v7112_v1 = vadd.f32 %v5443_v0, %v3089_v20  ;;  %v3023_v43 = vpop.f32.mrb[69].mxu0  ;;  %v3092_v33 = vmul.f32 %v5238_v9, %v7755_v4  ;;  %v7764_v9 = vld [vmem:[#allocation62_spill] sm:$0xff] }
 0x173   : > { %7748 = vst [vmem:[#allocation48_spill] sm:$0xff] %v7108_v13  ;;  %v7114_v2 = vadd.f32 %v5448_v16, %v3087_v22  ;;  %v5170_v50 = vpop.f32.mrb[68].mxu1  ;;  %v5239_v15 = vpop.f32.mrb[70].mxu0  ;;  %v7758_v16 = vld [vmem:[#allocation61_spill] sm:$0xff] }
 0x174   : > { %7751 = vst [vmem:[#allocation50_spill] sm:$0xff] %v7112_v1  ;;  %v2283_v28 = vmul.f32 %v5170_v50, %v7753_v41  ;;  %v2214_v8 = vpop.f32.mrb[69].mxu1  ;;  %v3026_v5 = vpop.f32.mrb[71].mxu0  ;;  %v3090_v25 = vmul.f32 %v3023_v43, %v7758_v16  ;;  %v7760_v41 = vld [vmem:[#allocation37_spill] sm:$0xff] }
 0x175   : > { %7752 = vst [vmem:[#allocation51_spill] sm:$0xff] %v7114_v2  ;;  %v2281_v11 = vmul.f32 %v2214_v8, %v7754_v36  ;;  %v5171_v27 = vpop.f32.mrb[70].mxu1  ;;  %v7759_v2 = vld [vmem:[#allocation13_spill] sm:$0xff]  ;;  %v3091_v4 = vmul.f32 %v3026_v5, %v7764_v9  ;;  %v7770_v5 = vld [vmem:[#allocation19_spill] sm:$0xff]  ;;  %v7771_v9 = vld [vmem:[#allocation42_spill] sm:$0xff] }
 0x176   : > { %v5453_v63 = vadd.f32 %v6954_v3, %v2283_v28  ;;  %v2284_v20 = vmul.f32 %v5171_v27, %v7756_v58  ;;  %v2217_v0 = vpop.f32.mrb[71].mxu1  ;;  %v7761_v8 = vld [vmem:[#allocation5_spill] sm:$0xff]  ;;  %v7763_v3 = vld [vmem:[#allocation38_spill] sm:$0xff] }
 0x177   : > { %v5458_v22 = vadd.f32 %v7757_v34, %v2281_v11  ;;  %v2282_v1 = vmul.f32 %v2217_v0, %v7759_v2  ;;  %v3093_v36 = vmul.f32 %v5239_v15, %v7761_v8  ;;  %v7767_v0 = vld [vmem:[#allocation18_spill] sm:$0xff] }
 0x178   : > { %v7124_v50 = vadd.f32 %v5453_v63, %v3092_v33  ;;  %v5463_v13 = vadd.f32 %v7760_v41, %v2284_v20  ;;  %v7768_v41 = vld [vmem:[#allocation16_spill] sm:$0xff] }
 0x179   : > { %v7128_v35 = vadd.f32 %v5458_v22, %v3090_v25  ;;  %v5468_v28 = vadd.f32 %v7763_v3, %v2282_v1  ;;  %v5242_v58 = vpop.f32.mrb[72].mxu0  ;;  %v7769_v1 = vld [vmem:[#allocation32_spill] sm:$0xff] }
 0x17a   : > { %v7132_v27 = vadd.f32 %v5463_v13, %v3093_v36  ;;  %v3039_v11 = vpop.f32.mrb[73].mxu0  ;;  %v3096_v3 = vmul.f32 %v5242_v58, %v7769_v1  ;;  %v7777_v58 = vld [vmem:[#allocation31_spill] sm:$0xff] }
 0x17b   : > { %7762 = vst [vmem:[#allocation21_spill] sm:$0xff] %v7128_v35  ;;  %v7134_v34 = vadd.f32 %v5468_v28, %v3091_v4  ;;  %v5174_v43 = vpop.f32.mrb[72].mxu1  ;;  %v5243_v16 = vpop.f32.mrb[74].mxu0  ;;  %v7772_v28 = vld [vmem:[#allocation29_spill] sm:$0xff] }
 0x17c   : > { %7765 = vst [vmem:[#allocation6_spill] sm:$0xff] %v7132_v27  ;;  %v2287_v63 = vmul.f32 %v5174_v43, %v7767_v0  ;;  %v2230_v33 = vpop.f32.mrb[73].mxu1  ;;  %v3042_v25 = vpop.f32.mrb[75].mxu0  ;;  %v3094_v8 = vmul.f32 %v3039_v11, %v7772_v28  ;;  %v7774_v0 = vld [vmem:[#allocation43_spill] sm:$0xff] }
 0x17d   : > { %7766 = vst [vmem:[#allocation4_spill] sm:$0xff] %v7134_v34  ;;  %v2285_v20 = vmul.f32 %v2230_v33, %v7768_v41  ;;  %v5175_v15 = vpop.f32.mrb[74].mxu1  ;;  %v7773_v34 = vld [vmem:[#allocation17_spill] sm:$0xff]  ;;  %v7775_v33 = vld [vmem:[#allocation36_spill] sm:$0xff]  ;;  %v3095_v1 = vmul.f32 %v3042_v25, %v7777_v58  ;;  %v7784_v25 = vld [vmem:[#allocation23_spill] sm:$0xff] }
 0x17e   : > { %v5473_v22 = vadd.f32 %v6980_v40, %v2287_v63  ;;  %v2288_v13 = vmul.f32 %v5175_v15, %v7770_v5  ;;  %v2233_v36 = vpop.f32.mrb[75].mxu1  ;;  %v3097_v41 = vmul.f32 %v5243_v16, %v7775_v33  ;;  %v7776_v40 = vld [vmem:[#allocation44_spill] sm:$0xff] }
 0x17f   : > { %v5478_v4 = vadd.f32 %v7771_v9, %v2285_v20  ;;  %v2286_v27 = vmul.f32 %v2233_v36, %v7773_v34  ;;  %v7780_v36 = vld [vmem:[#allocation22_spill] sm:$0xff] }
 0x180   : > { %v7144_v43 = vadd.f32 %v5473_v22, %v3096_v3  ;;  %v5483_v35 = vadd.f32 %v7774_v0, %v2288_v13  ;;  %v7781_v0 = vld [vmem:[#allocation20_spill] sm:$0xff] }
 0x181   : > { %v7148_v2 = vadd.f32 %v5478_v4, %v3094_v8  ;;  %v5488_v63 = vadd.f32 %v7776_v40, %v2286_v27  ;;  %v5246_v5 = vpop.f32.mrb[76].mxu0  ;;  %v7782_v4 = vld [vmem:[#allocation47_spill] sm:$0xff]  ;;  %v7783_v27 = vld [vmem:[#allocation64_spill] sm:$0xff] }
 0x182   : > { %v7152_v15 = vadd.f32 %v5483_v35, %v3097_v41  ;;  %v3055_v20 = vpop.f32.mrb[77].mxu0  ;;  %v3100_v40 = vmul.f32 %v5246_v5, %v7783_v27  ;;  %v7787_v5 = vld [vmem:[#allocation41_spill] sm:$0xff] }
 0x183   : > { %v7154_v9 = vadd.f32 %v5488_v63, %v3095_v1  ;;  %v5178_v11 = vpop.f32.mrb[76].mxu1  ;;  %v5247_v28 = vpop.f32.mrb[78].mxu0  ;;  %v7785_v63 = vld [vmem:[#allocation63_spill] sm:$0xff] }
 0x184   : > { %7778 = vst [vmem:[#allocation7_spill] sm:$0xff] %v7152_v15  ;;  %v2291_v22 = vmul.f32 %v5178_v11, %v7780_v36  ;;  %v2246_v3 = vpop.f32.mrb[77].mxu1  ;;  %v3058_v8 = vpop.f32.mrb[79].mxu0  ;;  %v3098_v58 = vmul.f32 %v3055_v20, %v7785_v63  ;;  %v7788_v20 = vld [vmem:[#allocation3_spill] sm:$0xff] }
 0x185   : > { %7779 = vst [vmem:[#allocation10_spill] sm:$0xff] %v7154_v9  ;;  %v2289_v13 = vmul.f32 %v2246_v3, %v7781_v0  ;;  %v5179_v16 = vpop.f32.mrb[78].mxu1  ;;  %v7786_v3 = vld [vmem:[#allocation65_spill] sm:$0xff] }
 0x186   : > { %v5493_v33 = vadd.f32 %v7782_v4, %v2291_v22  ;;  %v2292_v35 = vmul.f32 %v5179_v16, %v7784_v25  ;;  %v2249_v41 = vpop.f32.mrb[79].mxu1  ;;  %v3101_v0 = vmul.f32 %v5247_v28, %v7786_v3  ;;  %v3099_v4 = vmul.f32 %v3058_v8, %v7787_v5 }
 0x187   : > { %v5498_v1 = vadd.f32 %v7009_v48, %v2289_v13  ;;  %v2290_v9 = vmul.f32 %v2249_v41, %v7728_v26 }
 0x188   : > { %v7164_v11 = vadd.f32 %v5493_v33, %v3100_v40  ;;  %v5503_v36 = vadd.f32 %v7012_v47, %v2292_v35  ;;  %v7789_v33 = vld [vmem:[#allocation2_spill] sm:$0xff] }
 0x189   : > { %v7168_v15 = vadd.f32 %v5498_v1, %v3098_v58  ;;  %v5508_v22 = vadd.f32 %v7014_v12, %v2290_v9  ;;  %v5252_v27 = vpop.f32.mrb[80].mxu0 }
 0x18a   : > { %v7172_v16 = vadd.f32 %v5503_v36, %v3101_v0  ;;  %v3462_v13 = vmul.f32 %v5252_v27, %v7788_v20  ;;  %v3333_v41 = vpop.f32.mrb[81].mxu0 }
 0x18b   : > { %v7174_v48 = vadd.f32 %v5508_v22, %v3099_v4  ;;  %v3460_v40 = vmul.f32 %v3333_v41, %v7789_v33  ;;  %v5253_v63 = vpop.f32.mrb[82].mxu0 }
 0x18c   : > { %v3463_v47 = vmul.f32 %v5253_v63, %v6417_v54  ;;  %v3336_v28 = vpop.f32.mrb[83].mxu0  ;;  %v7180_v58 = vadd.f32 %v7024_v44, %v3462_v13 }
 0x18d   : > { %v3461_v12 = vmul.f32 %v3336_v28, %v6403_v45  ;;  %v7184_v9 = vadd.f32 %v7028_v46, %v3460_v40 }
 0x18e   : > { %v7187_v36 = vadd.f32 %v7032_v10, %v3463_v47 }
 0x18f   : > { %v7190_v0 = vadd.f32 %v7034_v56, %v3461_v12 }
 0x191   : > { %v5256_v8 = vpop.f32.mrb[84].mxu0 }
 0x192   : > { %v3466_v27 = vmul.f32 %v5256_v8, %v6435_v6  ;;  %v3349_v35 = vpop.f32.mrb[85].mxu0 }
 0x193   : > { %v3464_v54 = vmul.f32 %v3349_v35, %v6420_v55  ;;  %v5257_v1 = vpop.f32.mrb[86].mxu0 }
 0x194   : > { %v3467_v44 = vmul.f32 %v5257_v1, %v6441_v18  ;;  %v3352_v63 = vpop.f32.mrb[87].mxu0  ;;  %v7196_v45 = vadd.f32 %v7044_v39, %v3466_v27 }
 0x195   : > { %v3465_v46 = vmul.f32 %v3352_v63, %v6428_v60  ;;  %v7200_v10 = vadd.f32 %v7048_v21, %v3464_v54  ;;  %v7794_v63 = vld [vmem:[#allocation51_spill] sm:$0xff] }
 0x196   : > { %v7203_v56 = vadd.f32 %v7052_v31, %v3467_v44 }
 0x197   : > { %v7206_v6 = vadd.f32 %v7054_v62, %v3465_v46 }
 0x199   : > { %v5260_v22 = vpop.f32.mrb[88].mxu0 }
 0x19a   : > { %v3470_v55 = vmul.f32 %v5260_v22, %v6458_v49  ;;  %v3365_v4 = vpop.f32.mrb[89].mxu0 }
 0x19b   : > { %v3468_v18 = vmul.f32 %v3365_v4, %v6445_v19  ;;  %v5261_v20 = vpop.f32.mrb[90].mxu0  ;;  %v7796_v4 = vld [vmem:[#allocation12_spill] sm:$0xff] }
 0x19c   : > { %v3471_v39 = vmul.f32 %v5261_v20, %v6467_v53  ;;  %v3368_v13 = vpop.f32.mrb[91].mxu0  ;;  %v7212_v60 = vadd.f32 %v7064_v42, %v3470_v55 }
 0x19d   : > { %v3469_v21 = vmul.f32 %v3368_v13, %v6451_v32  ;;  %v7216_v31 = vadd.f32 %v7068_v51, %v3468_v18 }
 0x19e   : > { %v7219_v62 = vadd.f32 %v7072_v23, %v3471_v39 }
 0x19f   : > { %v7222_v49 = vadd.f32 %v7074_v7, %v3469_v21 }
 0x1a1   : > { %v5264_v41 = vpop.f32.mrb[92].mxu0 }
 0x1a2   : > { %v3474_v19 = vmul.f32 %v5264_v41, %v7737_v30  ;;  %v3381_v33 = vpop.f32.mrb[93].mxu0  ;;  %v7798_v41 = vld [vmem:[#allocation13_spill] sm:$0xff] }
 0x1a3   : > { %v3472_v53 = vmul.f32 %v3381_v33, %v7738_v17  ;;  %v5265_v40 = vpop.f32.mrb[94].mxu0  ;;  %v7799_v33 = vld [vmem:[#allocation21_spill] sm:$0xff] }
 0x1a4   : > { %v3475_v42 = vmul.f32 %v5265_v40, %v7674_v37  ;;  %v3384_v47 = vpop.f32.mrb[95].mxu0  ;;  %v7228_v32 = vadd.f32 %v7084_v29, %v3474_v19  ;;  %v7790_v29 = vld [vmem:[#allocation11_spill] sm:$0xff]  ;;  %v7800_v40 = vld [vmem:[#allocation6_spill] sm:$0xff] }
 0x1a5   : > { %v3473_v51 = vmul.f32 %v3384_v47, %v7676_v61  ;;  %v7232_v23 = vadd.f32 %v7088_v52, %v3472_v53  ;;  %v7791_v52 = vld [vmem:[#allocation9_spill] sm:$0xff]  ;;  %v7801_v47 = vld [vmem:[#allocation4_spill] sm:$0xff] }
 0x1a6   : > { %v7235_v7 = vadd.f32 %v7092_v38, %v3475_v42  ;;  %v7792_v38 = vld [vmem:[#allocation48_spill] sm:$0xff] }
 0x1a7   : > { %v7238_v30 = vadd.f32 %v7094_v14, %v3473_v51  ;;  %v7793_v14 = vld [vmem:[#allocation50_spill] sm:$0xff] }
 0x1a9   : > { %v5268_v28 = vpop.f32.mrb[96].mxu0 }
 0x1aa   : > { %v3478_v17 = vmul.f32 %v5268_v28, %v7744_v24  ;;  %v3397_v12 = vpop.f32.mrb[97].mxu0 }
 0x1ab   : > { %v3476_v37 = vmul.f32 %v3397_v12, %v7683_v59  ;;  %v5269_v8 = vpop.f32.mrb[98].mxu0  ;;  %v7795_v59 = vld [vmem:[#allocation14_spill] sm:$0xff] }
 0x1ac   : > { %v3479_v27 = vmul.f32 %v5269_v8, %v7790_v29  ;;  %v3400_v35 = vpop.f32.mrb[99].mxu0  ;;  %v7244_v61 = vadd.f32 %v7104_v57, %v3478_v17  ;;  %v7797_v57 = vld [vmem:[#allocation15_spill] sm:$0xff]  ;;  %v7802_v17 = vld [vmem:[#allocation18_spill] sm:$0xff]  ;;  %v7803_v8 = vld [vmem:[#allocation16_spill] sm:$0xff] }
 0x1ad   : > { %v3477_v54 = vmul.f32 %v3400_v35, %v7791_v52  ;;  %v7248_v1 = vadd.f32 %v7792_v38, %v3476_v37 }
 0x1ae   : > { %v7251_v44 = vadd.f32 %v7793_v14, %v3479_v27 }
 0x1af   : > { %v7254_v24 = vadd.f32 %v7794_v63, %v3477_v54  ;;  %v7805_v63 = vld [vmem:[#allocation7_spill] sm:$0xff] }
 0x1b1   : > { %v5272_v46 = vpop.f32.mrb[100].mxu0 }
 0x1b2   : > { %v3482_v22 = vmul.f32 %v5272_v46, %v7795_v59  ;;  %v3413_v55 = vpop.f32.mrb[101].mxu0  ;;  %v7806_v59 = vld [vmem:[#allocation10_spill] sm:$0xff] }
 0x1b3   : > { %v3480_v18 = vmul.f32 %v3413_v55, %v7796_v4  ;;  %v5273_v20 = vpop.f32.mrb[102].mxu0  ;;  %v7807_v4 = vld [vmem:[#allocation22_spill] sm:$0xff] }
 0x1b4   : > { %v3483_v39 = vmul.f32 %v5273_v20, %v7797_v57  ;;  %v3416_v13 = vpop.f32.mrb[103].mxu0  ;;  %v7260_v21 = vadd.f32 %v7124_v50, %v3482_v22  ;;  %v7804_v50 = vld [vmem:[#allocation19_spill] sm:$0xff]  ;;  %v7808_v57 = vld [vmem:[#allocation20_spill] sm:$0xff] }
 0x1b5   : > { %v3481_v19 = vmul.f32 %v3416_v13, %v7798_v41  ;;  %v7264_v53 = vadd.f32 %v7799_v33, %v3480_v18 }
 0x1b6   : > { %v7267_v42 = vadd.f32 %v7800_v40, %v3483_v39 }
 0x1b7   : > { %v7270_v51 = vadd.f32 %v7801_v47, %v3481_v19 }
 0x1b9   : > { %v5276_v28 = vpop.f32.mrb[104].mxu0 }
 0x1ba   : > { %v3486_v12 = vmul.f32 %v5276_v28, %v7802_v17  ;;  %v3429_v37 = vpop.f32.mrb[105].mxu0  ;;  %v7809_v17 = vld [vmem:[#allocation26_spill] sm:$0xff] }
 0x1bb   : > { %v3484_v29 = vmul.f32 %v3429_v37, %v7803_v8  ;;  %v5277_v27 = vpop.f32.mrb[106].mxu0  ;;  %v7810_v8 = vld [vmem:[#allocation24_spill] sm:$0xff] }
 0x1bc   : > { %v3487_v35 = vmul.f32 %v5277_v27, %v7804_v50  ;;  %v3432_v52 = vpop.f32.mrb[107].mxu0  ;;  %v7276_v54 = vadd.f32 %v7144_v43, %v3486_v12  ;;  %v7811_v27 = vld [vmem:[#allocation27_spill] sm:$0xff] }
 0x1bd   : > { %v3485_v38 = vmul.f32 %v3432_v52, %v7773_v34  ;;  %v7280_v14 = vadd.f32 %v7148_v2, %v3484_v29 }
 0x1be   : > { %v7283_v46 = vadd.f32 %v7805_v63, %v3487_v35  ;;  %v7812_v63 = vld [vmem:[#allocation25_spill] sm:$0xff] }
 0x1bf   : > { %v7286_v22 = vadd.f32 %v7806_v59, %v3485_v38 }
 0x1c1   : > { %v5280_v55 = vpop.f32.mrb[108].mxu0 }
 0x1c2   : > { %v3490_v18 = vmul.f32 %v5280_v55, %v7807_v4  ;;  %v3445_v20 = vpop.f32.mrb[109].mxu0  ;;  %v7319_v55 = vld [vmem:[%s7524_s3] ss:$0 sm:$0xff] }
 0x1c3   : > { %v3488_v39 = vmul.f32 %v3445_v20, %v7808_v57  ;;  %v5281_v13 = vpop.f32.mrb[110].mxu0 }
 0x1c4   : > { %v3491_v43 = vmul.f32 %v5281_v13, %v7784_v25  ;;  %v3448_v41 = vpop.f32.mrb[111].mxu0  ;;  %v7292_v34 = vadd.f32 %v7164_v11, %v3490_v18 }
 0x1c5   : > { %v3489_v2 = vmul.f32 %v3448_v41, %v7728_v26  ;;  %v7296_v19 = vadd.f32 %v7168_v15, %v3488_v39  ;;  %v7310_v15 = vld [vmem:[%s7523_s2] ss:$0 sm:$0xff] }
 0x1c6   : > { %v7299_v33 = vadd.f32 %v7172_v16, %v3491_v43 }
 0x1c7   : > { %v7302_v40 = vadd.f32 %v7174_v48, %v3489_v2 }
 0x1c9   : > { %v5320_v47 = vpop.f32.mrb[112].mxu0 }
 0x1ca   : > { %v4271_v12 = vmul.f32 %v5320_v47, %v7809_v17  ;;  %v4142_v25 = vpop.f32.mrb[113].mxu0  ;;  %v7813_v47 = vld [vmem:[#allocation34_spill] sm:$0xff] }
 0x1cb   : > { %v5286_v28 = vpop.f32.mrb[16].mxu1  ;;  %v4269_v26 = vmul.f32 %v4142_v25, %v7810_v8  ;;  %v5321_v29 = vpop.f32.mrb[114].mxu0  ;;  %v7814_v8 = vld [vmem:[#allocation28_spill] sm:$0xff] }
 0x1cc   : > { %v5356_v37 = vadd.f32 %v7180_v58, %v5286_v28  ;;  %v3859_v11 = vpop.f32.mrb[17].mxu1  ;;  %v4272_v50 = vmul.f32 %v5321_v29, %v7811_v27  ;;  %v4145_v35 = vpop.f32.mrb[115].mxu0 }
 0x1cd   : > { %v5361_v16 = vadd.f32 %v7184_v9, %v3859_v11  ;;  %v5287_v48 = vpop.f32.mrb[18].mxu1  ;;  %v4270_v59 = vmul.f32 %v4145_v35, %v7812_v63  ;;  %v7815_v35 = vld [vmem:[#allocation39_spill] sm:$0xff] }
 0x1ce   : > { %v4303_v52 = vadd.f32 %v5356_v37, %v4271_v12  ;;  %v5366_v38 = vadd.f32 %v7187_v36, %v5287_v48  ;;  %v3862_v58 = vpop.f32.mrb[19].mxu1 }
 0x1cf   : > { %v4301_v4 = vadd.f32 %v5361_v16, %v4269_v26  ;;  %v5371_v18 = vadd.f32 %v7190_v0, %v3862_v58 }
 0x1d0   : > { %v4342_v9 = vmul.f32 %v7310_v15, %v4303_v52  ;;  %v4304_v20 = vadd.f32 %v5366_v38, %v4272_v50 }
 0x1d1   : > { %v4340_v57 = vmul.f32 %v7310_v15, %v4301_v4  ;;  %v4302_v39 = vadd.f32 %v5371_v18, %v4270_v59  ;;  %v5324_v43 = vpop.f32.mrb[116].mxu0  ;;  %v7816_v4 = vld [vmem:[#allocation33_spill] sm:$0xff] }
 0x1d2   : > { %v4381_v36 = vadd.f32 %v7319_v55, %v4342_v9  ;;  %v4343_v13 = vmul.f32 %v7310_v15, %v4304_v20  ;;  %v4275_v28 = vmul.f32 %v5324_v43, %v7813_v47  ;;  %v4158_v17 = vpop.f32.mrb[117].mxu0  ;;  %v7817_v47 = vld [vmem:[#allocation46_spill] sm:$0xff] }
 0x1d3   : > { %v4379_v0 = vadd.f32 %v7319_v55, %v4340_v57  ;;  %v4341_v41 = vmul.f32 %v7310_v15, %v4302_v39  ;;  %v5290_v2 = vpop.f32.mrb[20].mxu1  ;;  %v4273_v26 = vmul.f32 %v4158_v17, %v7814_v8  ;;  %v5325_v29 = vpop.f32.mrb[118].mxu0  ;;  %v7818_v8 = vld [vmem:[#allocation40_spill] sm:$0xff] }
 0x1d4   : > { %v4413_v12 = vmax.f32 %v4381_v36, 0.0  ;;  %v4382_v25 = vadd.f32 %v7319_v55, %v4343_v13  ;;  %v5376_v37 = vadd.f32 %v7196_v45, %v5290_v2  ;;  %v3875_v11 = vpop.f32.mrb[21].mxu1  ;;  %v4276_v52 = vmul.f32 %v5325_v29, %v7815_v35  ;;  %v4161_v38 = vpop.f32.mrb[119].mxu0  ;;  %v7819_v35 = vld [vmem:[#allocation52_spill] sm:$0xff] }
 0x1d5   : > { %v4411_v16 = vmax.f32 %v4379_v0, 0.0  ;;  %v4380_v48 = vadd.f32 %v7319_v55, %v4341_v41  ;;  %v5381_v27 = vadd.f32 %v7200_v10, %v3875_v11  ;;  %v5291_v50 = vpop.f32.mrb[22].mxu1  ;;  %v4274_v18 = vmul.f32 %v4161_v38, %v7816_v4 }
 0x1d6   : > { %4446 = vst.msk [vmem:[%s7330_s28 + $0x10] sm:$0xff] %vm4443_vm4, %v4413_v12  ;;  %v4414_v58 = vmax.f32 %v4382_v25, 0.0  ;;  %v4307_v45 = vadd.f32 %v5376_v37, %v4275_v28  ;;  %v5386_v63 = vadd.f32 %v7203_v56, %v5291_v50  ;;  %v3878_v59 = vpop.f32.mrb[23].mxu1 }
 0x1d7   : > { %4444 = vst.msk [vmem:[%s7330_s28] sm:$0xff] %vm4443_vm4, %v4411_v16  ;;  %v4412_v9 = vmax.f32 %v4380_v48, 0.0  ;;  %v4305_v20 = vadd.f32 %v5381_v27, %v4273_v26  ;;  %v5391_v10 = vadd.f32 %v7206_v6, %v3878_v59  ;;  %v7820_v59 = vld [vmem:[#allocation45_spill] sm:$0xff] }
 0x1d8   : > { %4447 = vst.msk [vmem:[%s7330_s28 + $0x18] sm:$0xff] %vm4443_vm4, %v4414_v58  ;;  %v4346_v57 = vmul.f32 %v7310_v15, %v4307_v45  ;;  %v4308_v39 = vadd.f32 %v5386_v63, %v4276_v52 }
 0x1d9   : > { %4445 = vst.msk [vmem:[%s7330_s28 + $0x8] sm:$0xff] %vm4443_vm4, %v4412_v9  ;;  %v4344_v36 = vmul.f32 %v7310_v15, %v4305_v20  ;;  %v4306_v13 = vadd.f32 %v5391_v10, %v4274_v18  ;;  %v5328_v0 = vpop.f32.mrb[120].mxu0 }
 0x1da   : > { %v4385_v56 = vadd.f32 %v7319_v55, %v4346_v57  ;;  %v4347_v43 = vmul.f32 %v7310_v15, %v4308_v39  ;;  %v4279_v28 = vmul.f32 %v5328_v0, %v7817_v47  ;;  %v4174_v17 = vpop.f32.mrb[121].mxu0  ;;  %v7821_v0 = vld [vmem:[#allocation55_spill] sm:$0xff] }
 0x1db   : > { %v4383_v41 = vadd.f32 %v7319_v55, %v4344_v36  ;;  %v4345_v2 = vmul.f32 %v7310_v15, %v4306_v13  ;;  %v5294_v6 = vpop.f32.mrb[24].mxu1  ;;  %v4277_v26 = vmul.f32 %v4174_v17, %v7818_v8  ;;  %v5329_v29 = vpop.f32.mrb[122].mxu0 }
 0x1dc   : > { %v4417_v12 = vmax.f32 %v4385_v56, 0.0  ;;  %v4386_v25 = vadd.f32 %v7319_v55, %v4347_v43  ;;  %v5396_v37 = vadd.f32 %v7212_v60, %v5294_v6  ;;  %v3891_v11 = vpop.f32.mrb[25].mxu1  ;;  %v4280_v52 = vmul.f32 %v5329_v29, %v7819_v35  ;;  %v4177_v38 = vpop.f32.mrb[123].mxu0 }
 0x1dd   : > { %v4415_v16 = vmax.f32 %v4383_v41, 0.0  ;;  %v4384_v48 = vadd.f32 %v7319_v55, %v4345_v2  ;;  %v5401_v27 = vadd.f32 %v7216_v31, %v3891_v11  ;;  %v5295_v50 = vpop.f32.mrb[26].mxu1  ;;  %v4278_v4 = vmul.f32 %v4177_v38, %v7820_v59  ;;  %v7824_v38 = vld [vmem:[#allocation54_spill] sm:$0xff] }
 0x1de   : > { %4450 = vst.msk [vmem:[%s7330_s28 + $0x30] sm:$0xff] %vm4443_vm4, %v4417_v12  ;;  %v4418_v58 = vmax.f32 %v4386_v25, 0.0  ;;  %v4311_v60 = vadd.f32 %v5396_v37, %v4279_v28  ;;  %v5406_v45 = vadd.f32 %v7219_v62, %v5295_v50  ;;  %v3894_v63 = vpop.f32.mrb[27].mxu1  ;;  %v7822_v12 = vld [vmem:[#allocation53_spill] sm:$0xff] }
 0x1df   : > { %4448 = vst.msk [vmem:[%s7330_s28 + $0x20] sm:$0xff] %vm4443_vm4, %v4415_v16  ;;  %v4416_v18 = vmax.f32 %v4384_v48, 0.0  ;;  %v4309_v9 = vadd.f32 %v5401_v27, %v4277_v26  ;;  %v5411_v31 = vadd.f32 %v7222_v49, %v3894_v63  ;;  %v7823_v16 = vld [vmem:[#allocation56_spill] sm:$0xff] }
 0x1e0   : > { %4451 = vst.msk [vmem:[%s7330_s28 + $0x38] sm:$0xff] %vm4443_vm4, %v4418_v58  ;;  %v4350_v20 = vmul.f32 %v7310_v15, %v4311_v60  ;;  %v4312_v10 = vadd.f32 %v5406_v45, %v4280_v52 }
 0x1e1   : > { %4449 = vst.msk [vmem:[%s7330_s28 + $0x28] sm:$0xff] %vm4443_vm4, %v4416_v18  ;;  %v4348_v57 = vmul.f32 %v7310_v15, %v4309_v9  ;;  %v4310_v39 = vadd.f32 %v5411_v31, %v4278_v4  ;;  %v5332_v13 = vpop.f32.mrb[124].mxu0 }
 0x1e2   : > { %v4389_v62 = vadd.f32 %v7319_v55, %v4350_v20  ;;  %v4351_v36 = vmul.f32 %v7310_v15, %v4312_v10  ;;  %v4283_v41 = vmul.f32 %v5332_v13, %v7821_v0  ;;  %v4190_v2 = vpop.f32.mrb[125].mxu0 }
 0x1e3   : > { %v4387_v56 = vadd.f32 %v7319_v55, %v4348_v57  ;;  %v4349_v43 = vmul.f32 %v7310_v15, %v4310_v39  ;;  %v5298_v49 = vpop.f32.mrb[28].mxu1  ;;  %v4281_v25 = vmul.f32 %v4190_v2, %v7822_v12  ;;  %v5333_v37 = vpop.f32.mrb[126].mxu0  ;;  %v7825_v57 = vld [vmem:[#allocation59_spill] sm:$0xff] }
 0x1e4   : > { %v4421_v6 = vmax.f32 %v4389_v62, 0.0  ;;  %v4390_v47 = vadd.f32 %v7319_v55, %v4351_v36  ;;  %v5416_v28 = vadd.f32 %v7228_v32, %v5298_v49  ;;  %v3907_v17 = vpop.f32.mrb[29].mxu1  ;;  %v4284_v48 = vmul.f32 %v5333_v37, %v7823_v16  ;;  %v4193_v27 = vpop.f32.mrb[127].mxu0  ;;  %v7826_v49 = vld [vmem:[#allocation57_spill] sm:$0xff] }
 0x1e5   : > { %v4419_v11 = vmax.f32 %v4387_v56, 0.0  ;;  %v4388_v8 = vadd.f32 %v7319_v55, %v4349_v43  ;;  %v5421_v26 = vadd.f32 %v7232_v23, %v3907_v17  ;;  %v5299_v29 = vpop.f32.mrb[30].mxu1  ;;  %v4282_v58 = vmul.f32 %v4193_v27, %v7824_v38  ;;  %v7827_v17 = vld [vmem:[#allocation60_spill] sm:$0xff] }
 0x1e6   : > { %4454 = vst.msk [vmem:[%s7330_s28 + $0x50] sm:$0xff] %vm4443_vm4, %v4421_v6  ;;  %v4422_v50 = vmax.f32 %v4390_v47, 0.0  ;;  %v4315_v32 = vadd.f32 %v5416_v28, %v4283_v41  ;;  %v5426_v35 = vadd.f32 %v7235_v7, %v5299_v29  ;;  %v3910_v52 = vpop.f32.mrb[31].mxu1 }
 0x1e7   : > { %4452 = vst.msk [vmem:[%s7330_s28 + $0x40] sm:$0xff] %vm4443_vm4, %v4419_v11  ;;  %v4420_v60 = vmax.f32 %v4388_v8, 0.0  ;;  %v4313_v45 = vadd.f32 %v5421_v26, %v4281_v25  ;;  %v5431_v23 = vadd.f32 %v7238_v30, %v3910_v52  ;;  %v7828_v26 = vld [vmem:[#allocation58_spill] sm:$0xff] }
 0x1e8   : > { %4455 = vst.msk [vmem:[%s7330_s28 + $0x58] sm:$0xff] %vm4443_vm4, %v4422_v50  ;;  %v4354_v63 = vmul.f32 %v7310_v15, %v4315_v32  ;;  %v4316_v59 = vadd.f32 %v5426_v35, %v4284_v48 }
 0x1e9   : > { %4453 = vst.msk [vmem:[%s7330_s28 + $0x48] sm:$0xff] %vm4443_vm4, %v4420_v60  ;;  %v4352_v4 = vmul.f32 %v7310_v15, %v4313_v45  ;;  %v4314_v18 = vadd.f32 %v5431_v23, %v4282_v58  ;;  %v5336_v31 = vpop.f32.mrb[128].mxu0  ;;  %v7829_v45 = vld [vmem:[#allocation49_spill] sm:$0xff] }
 0x1ea   : > { %v4393_v7 = vadd.f32 %v7319_v55, %v4354_v63  ;;  %v4355_v9 = vmul.f32 %v7310_v15, %v4316_v59  ;;  %v4287_v39 = vmul.f32 %v5336_v31, %v7825_v57  ;;  %v4206_v62 = vpop.f32.mrb[129].mxu0 }
 0x1eb   : > { %v4391_v20 = vadd.f32 %v7319_v55, %v4352_v4  ;;  %v4353_v10 = vmul.f32 %v7310_v15, %v4314_v18  ;;  %v5302_v30 = vpop.f32.mrb[32].mxu1  ;;  %v4285_v0 = vmul.f32 %v4206_v62, %v7826_v49  ;;  %v5337_v41 = vpop.f32.mrb[130].mxu0  ;;  %v7831_v62 = vld [vmem:[#allocation5_spill] sm:$0xff] }
 0x1ec   : > { %v4425_v36 = vmax.f32 %v4393_v7, 0.0  ;;  %v4394_v13 = vadd.f32 %v7319_v55, %v4355_v9  ;;  %v5436_v56 = vadd.f32 %v7244_v61, %v5302_v30  ;;  %v3923_v43 = vpop.f32.mrb[33].mxu1  ;;  %v4288_v12 = vmul.f32 %v5337_v41, %v7827_v17  ;;  %v4209_v25 = vpop.f32.mrb[131].mxu0  ;;  %v7830_v9 = vld [vmem:[#allocation61_spill] sm:$0xff] }
 0x1ed   : > { %v4423_v2 = vmax.f32 %v4391_v20, 0.0  ;;  %v4392_v6 = vadd.f32 %v7319_v55, %v4353_v10  ;;  %v5441_v47 = vadd.f32 %v7248_v1, %v3923_v43  ;;  %v5303_v28 = vpop.f32.mrb[34].mxu1  ;;  %v4286_v29 = vmul.f32 %v4209_v25, %v7828_v26 }
 0x1ee   : > { %4458 = vst.msk [vmem:[%s7330_s28 + $0x70] sm:$0xff] %vm4443_vm4, %v4425_v36  ;;  %v4426_v37 = vmax.f32 %v4394_v13, 0.0  ;;  %v4319_v61 = vadd.f32 %v5436_v56, %v4287_v39  ;;  %v5446_v11 = vadd.f32 %v7251_v44, %v5303_v28  ;;  %v3926_v8 = vpop.f32.mrb[35].mxu1 }
 0x1ef   : > { %4456 = vst.msk [vmem:[%s7330_s28 + $0x60] sm:$0xff] %vm4443_vm4, %v4423_v2  ;;  %v4424_v16 = vmax.f32 %v4392_v6, 0.0  ;;  %v4317_v48 = vadd.f32 %v5441_v47, %v4285_v0  ;;  %v5451_v1 = vadd.f32 %v7254_v24, %v3926_v8  ;;  %v7832_v0 = vld [vmem:[#allocation62_spill] sm:$0xff]  ;;  %v7833_v8 = vld [vmem:[#allocation32_spill] sm:$0xff] }
 0x1f0   : > { %4459 = vst.msk [vmem:[%s7330_s28 + $0x78] sm:$0xff] %vm4443_vm4, %v4426_v37  ;;  %v4358_v27 = vmul.f32 %v7310_v15, %v4319_v61  ;;  %v4320_v50 = vadd.f32 %v5446_v11, %v4288_v12 }
 0x1f1   : > { %4457 = vst.msk [vmem:[%s7330_s28 + $0x68] sm:$0xff] %vm4443_vm4, %v4424_v16  ;;  %v4356_v32 = vmul.f32 %v7310_v15, %v4317_v48  ;;  %v4318_v35 = vadd.f32 %v5451_v1, %v4286_v29  ;;  %v5340_v38 = vpop.f32.mrb[132].mxu0 }
 0x1f2   : > { %v4397_v44 = vadd.f32 %v7319_v55, %v4358_v27  ;;  %v4359_v52 = vmul.f32 %v7310_v15, %v4320_v50  ;;  %v4291_v23 = vmul.f32 %v5340_v38, %v7829_v45  ;;  %v4222_v63 = vpop.f32.mrb[133].mxu0  ;;  %v7834_v50 = vld [vmem:[#allocation29_spill] sm:$0xff] }
 0x1f3   : > { %v4395_v58 = vadd.f32 %v7319_v55, %v4356_v32  ;;  %v4357_v60 = vmul.f32 %v7310_v15, %v4318_v35  ;;  %v5306_v24 = vpop.f32.mrb[36].mxu1  ;;  %v4289_v31 = vmul.f32 %v4222_v63, %v7830_v9  ;;  %v5341_v20 = vpop.f32.mrb[134].mxu0 }
 0x1f4   : > { %v4429_v59 = vmax.f32 %v4397_v44, 0.0  ;;  %v4398_v4 = vadd.f32 %v7319_v55, %v4359_v52  ;;  %v5456_v18 = vadd.f32 %v7260_v21, %v5306_v24  ;;  %v3939_v7 = vpop.f32.mrb[37].mxu1  ;;  %v4292_v36 = vmul.f32 %v5341_v20, %v7831_v62  ;;  %v4225_v13 = vpop.f32.mrb[135].mxu0 }
 0x1f5   : > { %v4427_v10 = vmax.f32 %v4395_v58, 0.0  ;;  %v4396_v30 = vadd.f32 %v7319_v55, %v4357_v60  ;;  %v5461_v57 = vadd.f32 %v7264_v53, %v3939_v7  ;;  %v5307_v39 = vpop.f32.mrb[38].mxu1  ;;  %v4290_v41 = vmul.f32 %v4225_v13, %v7832_v0  ;;  %v7835_v60 = vld [vmem:[#allocation36_spill] sm:$0xff] }
 0x1f6   : > { %4462 = vst.msk [vmem:[%s7330_s28 + $0x90] sm:$0xff] %vm4443_vm4, %v4429_v59  ;;  %v4430_v56 = vmax.f32 %v4398_v4, 0.0  ;;  %v4323_v21 = vadd.f32 %v5456_v18, %v4291_v23  ;;  %v5466_v43 = vadd.f32 %v7267_v42, %v5307_v39  ;;  %v3942_v49 = vpop.f32.mrb[39].mxu1  ;;  %v7836_v4 = vld [vmem:[#allocation31_spill] sm:$0xff]  ;;  %v7837_v13 = vld [vmem:[#allocation64_spill] sm:$0xff] }
 0x1f7   : > { %4460 = vst.msk [vmem:[%s7330_s28 + $0x80] sm:$0xff] %vm4443_vm4, %v4427_v10  ;;  %v4428_v2 = vmax.f32 %v4396_v30, 0.0  ;;  %v4321_v6 = vadd.f32 %v5461_v57, %v4289_v31  ;;  %v5471_v53 = vadd.f32 %v7270_v51, %v3942_v49 }
 0x1f8   : > { %4463 = vst.msk [vmem:[%s7330_s28 + $0x98] sm:$0xff] %vm4443_vm4, %v4430_v56  ;;  %v4362_v47 = vmul.f32 %v7310_v15, %v4323_v21  ;;  %v4324_v28 = vadd.f32 %v5466_v43, %v4292_v36 }
 0x1f9   : > { %4461 = vst.msk [vmem:[%s7330_s28 + $0x88] sm:$0xff] %vm4443_vm4, %v4428_v2  ;;  %v4360_v17 = vmul.f32 %v7310_v15, %v4321_v6  ;;  %v4322_v12 = vadd.f32 %v5471_v53, %v4290_v41  ;;  %v5344_v37 = vpop.f32.mrb[136].mxu0  ;;  %v7838_v2 = vld [vmem:[#allocation63_spill] sm:$0xff] }
 0x1fa   : > { %v4401_v42 = vadd.f32 %v7319_v55, %v4362_v47  ;;  %v4363_v25 = vmul.f32 %v7310_v15, %v4324_v28  ;;  %v4295_v26 = vmul.f32 %v5344_v37, %v7833_v8  ;;  %v4238_v29 = vpop.f32.mrb[137].mxu0 }
 0x1fb   : > { %v4399_v61 = vadd.f32 %v7319_v55, %v4360_v17  ;;  %v4361_v11 = vmul.f32 %v7310_v15, %v4322_v12  ;;  %v5310_v51 = vpop.f32.mrb[40].mxu1  ;;  %v4293_v32 = vmul.f32 %v4238_v29, %v7834_v50  ;;  %v5345_v35 = vpop.f32.mrb[138].mxu0 }
 0x1fc   : > { %v4433_v16 = vmax.f32 %v4401_v42, 0.0  ;;  %v4402_v48 = vadd.f32 %v7319_v55, %v4363_v25  ;;  %v5476_v1 = vadd.f32 %v7276_v54, %v5310_v51  ;;  %v3955_v27 = vpop.f32.mrb[41].mxu1  ;;  %v4296_v24 = vmul.f32 %v5345_v35, %v7835_v60  ;;  %v4241_v45 = vpop.f32.mrb[139].mxu0 }
 0x1fd   : > { %v4431_v44 = vmax.f32 %v4399_v61, 0.0  ;;  %v4400_v52 = vadd.f32 %v7319_v55, %v4361_v11  ;;  %v5481_v38 = vadd.f32 %v7280_v14, %v3955_v27  ;;  %v5311_v58 = vpop.f32.mrb[42].mxu1  ;;  %v4294_v18 = vmul.f32 %v4241_v45, %v7836_v4 }
 0x1fe   : > { %4466 = vst.msk [vmem:[%s7330_s28 + $0xb0] sm:$0xff] %vm4443_vm4, %v4433_v16  ;;  %v4434_v23 = vmax.f32 %v4402_v48, 0.0  ;;  %v4327_v54 = vadd.f32 %v5476_v1, %v4295_v26  ;;  %v5486_v63 = vadd.f32 %v7283_v46, %v5311_v58  ;;  %v3958_v59 = vpop.f32.mrb[43].mxu1 }
 0x1ff   : > { %4464 = vst.msk [vmem:[%s7330_s28 + $0xa0] sm:$0xff] %vm4443_vm4, %v4431_v44  ;;  %v4432_v7 = vmax.f32 %v4400_v52, 0.0  ;;  %v4325_v9 = vadd.f32 %v5481_v38, %v4293_v32  ;;  %v5491_v14 = vadd.f32 %v7286_v22, %v3958_v59 }
 0x200   : > { %4467 = vst.msk [vmem:[%s7330_s28 + $0xb8] sm:$0xff] %vm4443_vm4, %v4434_v23  ;;  %v4366_v31 = vmul.f32 %v7310_v15, %v4327_v54  ;;  %v4328_v20 = vadd.f32 %v5486_v63, %v4296_v24 }
 0x201   : > { %4465 = vst.msk [vmem:[%s7330_s28 + $0xa8] sm:$0xff] %vm4443_vm4, %v4432_v7  ;;  %v4364_v10 = vmul.f32 %v7310_v15, %v4325_v9  ;;  %v4326_v30 = vadd.f32 %v5491_v14, %v4294_v18  ;;  %v5348_v39 = vpop.f32.mrb[140].mxu0 }
 0x202   : > { %v4405_v46 = vadd.f32 %v7319_v55, %v4366_v31  ;;  %v4367_v57 = vmul.f32 %v7310_v15, %v4328_v20  ;;  %v4299_v56 = vmul.f32 %v5348_v39, %v7837_v13  ;;  %v4254_v21 = vpop.f32.mrb[141].mxu0 }
 0x203   : > { %v4403_v62 = vadd.f32 %v7319_v55, %v4364_v10  ;;  %v4365_v36 = vmul.f32 %v7310_v15, %v4326_v30  ;;  %v5314_v22 = vpop.f32.mrb[44].mxu1  ;;  %v4297_v6 = vmul.f32 %v4254_v21, %v7838_v2  ;;  %v5349_v53 = vpop.f32.mrb[142].mxu0 }
 0x204   : > { %v4437_v43 = vmax.f32 %v4405_v46, 0.0  ;;  %v4406_v49 = vadd.f32 %v7319_v55, %v4367_v57  ;;  %v5496_v0 = vadd.f32 %v7292_v34, %v5314_v22  ;;  %v3971_v41 = vpop.f32.mrb[45].mxu1  ;;  %v4300_v42 = vmul.f32 %v5349_v53, %v7786_v3  ;;  %v4257_v25 = vpop.f32.mrb[143].mxu0 }
 0x205   : > { %v4435_v47 = vmax.f32 %v4403_v62, 0.0  ;;  %v4404_v28 = vadd.f32 %v7319_v55, %v4365_v36  ;;  %v5501_v17 = vadd.f32 %v7296_v19, %v3971_v41  ;;  %v5315_v12 = vpop.f32.mrb[46].mxu1  ;;  %v4298_v51 = vmul.f32 %v4257_v25, %v7787_v5 }
 0x206   : > { %4470 = vst.msk [vmem:[%s7330_s28 + $0xd0] sm:$0xff] %vm4443_vm4, %v4437_v43  ;;  %v4438_v37 = vmax.f32 %v4406_v49, 0.0  ;;  %v4331_v34 = vadd.f32 %v5496_v0, %v4299_v56  ;;  %v5506_v61 = vadd.f32 %v7299_v33, %v5315_v12  ;;  %v3974_v11 = vpop.f32.mrb[47].mxu1 }
 0x207   : > { %4468 = vst.msk [vmem:[%s7330_s28 + $0xc0] sm:$0xff] %vm4443_vm4, %v4435_v47  ;;  %v4436_v8 = vmax.f32 %v4404_v28, 0.0  ;;  %v4329_v26 = vadd.f32 %v5501_v17, %v4297_v6  ;;  %v5511_v19 = vadd.f32 %v7302_v40, %v3974_v11 }
 0x208   : > { %4471 = vst.msk [vmem:[%s7330_s28 + $0xd8] sm:$0xff] %vm4443_vm4, %v4438_v37  ;;  %v4370_v3 = vmul.f32 %v7310_v15, %v4331_v34  ;;  %v4332_v29 = vadd.f32 %v5506_v61, %v4300_v42 }
 0x209   : > { %4469 = vst.msk [vmem:[%s7330_s28 + $0xc8] sm:$0xff] %vm4443_vm4, %v4436_v8  ;;  %v4368_v33 = vmul.f32 %v7310_v15, %v4329_v26  ;;  %v4330_v5 = vadd.f32 %v5511_v19, %v4298_v51 }
 0x20a   : > { %v4409_v16 = vadd.f32 %v7319_v55, %v4370_v3  ;;  %v4371_v48 = vmul.f32 %v7310_v15, %v4332_v29 }
 0x20b   : > { %v4407_v1 = vadd.f32 %v7319_v55, %v4368_v33  ;;  %v4369_v40 = vmul.f32 %v7310_v15, %v4330_v5 }
 0x20c   : > { %v4441_v27 = vmax.f32 %v4409_v16, 0.0  ;;  %v4410_v50 = vadd.f32 %v7319_v55, %v4371_v48 }
 0x20d   : > { %v4439_v32 = vmax.f32 %v4407_v1, 0.0  ;;  %v4408_v35 = vadd.f32 %v7319_v55, %v4369_v40 }
 0x20e   : > { %4474 = vst.msk [vmem:[%s7330_s28 + $0xf0] sm:$0xff] %vm4443_vm4, %v4441_v27  ;;  %v4442_v44 = vmax.f32 %v4410_v50, 0.0 }
 0x20f   : > { %4472 = vst.msk [vmem:[%s7330_s28 + $0xe0] sm:$0xff] %vm4443_vm4, %v4439_v32  ;;  %v4440_v52 = vmax.f32 %v4408_v35, 0.0 }
 0x210   : > { %4475 = vst.msk [vmem:[%s7330_s28 + $0xf8] sm:$0xff] %vm4443_vm4, %v4442_v44 }
 0x211   : > { %4473 = vst.msk [vmem:[%s7330_s28 + $0xe8] sm:$0xff] %vm4443_vm4, %v4440_v52 }
 0x212 PF: > { %s16_s23 = sadd.s32 1, %s5738_s23   ;;  %s7839_s21 = smov %s5734_s22 }
 0x213   : > { %p13_p5 = scmp.ge.s32.totalorder %s16_s23, 4   ;;  %s7840_s22 = smov %s7842_s24 }
 0x215   :  { %15 = sbr.rel (!%p13_p5) target bundleno = 2 (0x2), region = 91 }

</bundles_post_ra>
